<compile_context>
chip_gen: v6e
topology: v6e:2x2x1
jax: 0.10.0
libtpu: 0.0.40
codegen_flags: <defaults>
</compile_context>

<pallas_src>
import functools

import numpy as np
import jax
import jax.numpy as jnp
from jax.experimental import pallas as pl
from jax.experimental.pallas import tpu as pltpu

LANE = 128  # TPU lane width; channels are padded up to a multiple of this.


def _silu(x):
    # Exact SiLU: x * sigmoid(x).  exp() runs on the EUP slot; the divide is
    # exact so the kernel matches the reference numerics (no approx recip).
    return x * (1.0 / (1.0 + jnp.exp(-x)))


def bottleneck_kernel(x_ref, w1_ref, s1_ref, b1_ref, w2_ref, s2_ref, b2_ref,
                      o_ref, hp_ref, *, add_residual):
    """One (image n, row-tile i) grid step of the fused Bottleneck.

    x_ref:  (H, W, Cpi)       f32  full image n (resident across row tiles)
    w1_ref: (Cpi, Cpm)        bf16 1x1 conv weight
    s1/b1:  (1, Cpm)          f32  folded BN1 scale / bias
    w2_ref: (9, Cpm, Cpo)     bf16 3x3 conv weight, tap-major
    s2/b2:  (1, Cpo)          f32  folded BN2 scale / bias
    o_ref:  (TH, W, Cpo)      f32  output row tile
    hp_ref: (H+2, W+2, Cpm)   bf16 scratch: zero-padded cv1 output, whole image
    """
    H, W, Cpi = x_ref.shape
    TH = o_ref.shape[0]
    Cpm = w1_ref.shape[1]
    Cpo = w2_ref.shape[2]
    M = TH * W

    i = pl.program_id(1)

    # ---- cv1 for the WHOLE image, once per image (row tile 0) --------------
    @pl.when(i == 0)
    def _cv1_whole_image():
        # Zero the 1-pixel halo border once; interior rows/cols are always
        # fully overwritten below, so nothing else ever touches the border.
        zrow = jnp.zeros((1, W + 2, Cpm), hp_ref.dtype)
        hp_ref[0:1, :, :] = zrow
        hp_ref[H + 1:H + 2, :, :] = zrow
        zcol = jnp.zeros((H + 2, 1, Cpm), hp_ref.dtype)
        hp_ref[:, 0:1, :] = zcol
        hp_ref[:, W + 1:W + 2, :] = zcol

        # conv1x1 + BN1 + SiLU as ONE MXU matmul (M = H*W, K = Cpi).
        x_all = x_ref[...].reshape(H * W, Cpi).astype(jnp.bfloat16)
        z = jnp.dot(x_all, w1_ref[...], preferred_element_type=jnp.float32)
        z = _silu(z * s1_ref[...] + b1_ref[...])
        hp_ref[1:H + 1, 1:W + 1, :] = (
            z.reshape(H, W, Cpm).astype(hp_ref.dtype))

    # ---- cv2: 3x3 conv on this row tile = 9 accumulating MXU matmuls -------
    start = pl.multiple_of(i * TH, TH)          # first output row of the tile
    y = jnp.zeros((M, Cpo), jnp.float32)
    for t in range(9):
        kh, kw = divmod(t, 3)
        win = hp_ref[pl.ds(start + kh, TH), kw:kw + W, :]       # (TH,W,Cpm) bf16
        y = y + jnp.dot(win.reshape(M, Cpm), w2_ref[t],
                        preferred_element_type=jnp.float32)
    y = _silu(y * s2_ref[...] + b2_ref[...])

    # ---- residual add (shortcut and Cin == Cout, stride 1) -----------------
    if add_residual:
        # Re-read from the VMEM-resident x block; don't keep a large f32
        # value live across the matmuls.
        y = y + x_ref[pl.ds(start, TH), :, :].reshape(M, Cpi)
    o_ref[...] = y.reshape(TH, W, Cpo).astype(o_ref.dtype)


def _round_up(c, m=LANE):
    return ((c + m - 1) // m) * m


def _pick_tile_h(H, tile_h):
    """Largest divisor of H that is <= tile_h, preferring multiples of 8."""
    cap = max(1, min(tile_h, H))
    divs = [d for d in range(1, cap + 1) if H % d == 0]
    pref = [d for d in divs if d % 8 == 0]
    return (pref or divs)[-1]


def bottleneck_pallas(x_nchw, w1, s1, b1, w2, s2, b2, *, shortcut=True,
                      tile_h=32):
    """Fused Bottleneck forward.  x_nchw: (N, Cin, H, W) f32 -> (N, Cout, H, W)."""
    N, Cin, H, W = x_nchw.shape
    Cmid = w1.shape[1]
    Cout = w2.shape[-1]
    add = bool(shortcut) and (Cin == Cout)

    # Lane-dense channel padding (multiple of 128).  On v6e/v7x (2x256 MXU),
    # padding to 256 is preferable once real channel counts approach it.
    Cpi, Cpm, Cpo = _round_up(Cin), _round_up(Cmid), _round_up(Cout)
    if add:
        Cpi = Cpo = max(Cpi, Cpo)

    th = _pick_tile_h(H, tile_h)
    n_h = H // th

    # ---- operand packing (layout glue, outside the kernel) -----------------
    x_nhwc = jnp.transpose(x_nchw, (0, 2, 3, 1)).astype(jnp.float32)
    xp = jnp.zeros((N, H, W, Cpi), jnp.float32).at[..., :Cin].set(x_nhwc)
    w1p = (jnp.zeros((Cpi, Cpm), jnp.float32)
           .at[:Cin, :Cmid].set(w1).astype(jnp.bfloat16))
    w2p = (jnp.zeros((3, 3, Cpm, Cpo), jnp.float32)
           .at[:, :, :Cmid, :Cout].set(w2)
           .reshape(9, Cpm, Cpo).astype(jnp.bfloat16))
    s1p = jnp.zeros((1, Cpm), jnp.float32).at[0, :Cmid].set(s1)
    b1p = jnp.zeros((1, Cpm), jnp.float32).at[0, :Cmid].set(b1)
    s2p = jnp.zeros((1, Cpo), jnp.float32).at[0, :Cout].set(s2)
    b2p = jnp.zeros((1, Cpo), jnp.float32).at[0, :Cout].set(b2)

    # VMEM budget derived from the actual resident buffers (double-buffered
    # ins/outs, persistent hp scratch, cv1/cv2 temporaries) with headroom.
    # Never clamp below the real need; cap well under physical VMEM.
    est = (2 * H * W * Cpi * 4                       # x block (double-buffered)
           + 2 * th * W * Cpo * 4                    # output tile
           + 2 * (Cpi * Cpm + 9 * Cpm * Cpo) * 2     # weights (bf16)
           + (H + 2) * (W + 2) * Cpm * 2             # hp scratch (bf16)
           + H * W * (Cpm * 4 + Cpi * 2)             # cv1 temporaries (i==0)
           + 2 * th * W * (Cpo * 4 + Cpm * 2))       # cv2 temporaries
    vmem_limit = max(2 * est, 32 * 1024 * 1024)
    vmem_limit = min(vmem_limit, 100 * 1024 * 1024)
    vmem_limit = int(max(vmem_limit, int(1.25 * est)))

    kernel = functools.partial(bottleneck_kernel, add_residual=add)

    grid_spec = pltpu.PrefetchScalarGridSpec(
        num_scalar_prefetch=0,
        grid=(N, n_h),
        in_specs=[
            # Full image per n; same block across row tiles -> stays resident.
            pl.BlockSpec((None, H, W, Cpi), lambda n, i: (n, 0, 0, 0)),
            pl.BlockSpec((Cpi, Cpm), lambda n, i: (0, 0)),
            pl.BlockSpec((1, Cpm), lambda n, i: (0, 0)),
            pl.BlockSpec((1, Cpm), lambda n, i: (0, 0)),
            pl.BlockSpec((9, Cpm, Cpo), lambda n, i: (0, 0, 0)),
            pl.BlockSpec((1, Cpo), lambda n, i: (0, 0)),
            pl.BlockSpec((1, Cpo), lambda n, i: (0, 0)),
        ],
        out_specs=pl.BlockSpec((None, th, W, Cpo), lambda n, i: (n, i, 0, 0)),
        scratch_shapes=[
            pltpu.VMEM((H + 2, W + 2, Cpm), jnp.bfloat16),   # padded cv1 out
        ],
    )

    out = pl.pallas_call(
        kernel,
        out_shape=jax.ShapeDtypeStruct((N, H, W, Cpo), jnp.float32),
        grid_spec=grid_spec,
        compiler_params=pltpu.CompilerParams(
            # Row-tile axis must stay sequential on one core (cv1 at i==0
            # feeds later tiles of the same image); batch axis is megacore-
            # parallel.
            dimension_semantics=("parallel", "arbitrary"),
            vmem_limit_bytes=vmem_limit,
        ),
    )(xp, w1p, s1p, b1p, w2p, s2p, b2p)

    out = out[..., :Cout]
    return jnp.transpose(out, (0, 3, 1, 2))  # back to NCHW


def reference_forward(x_nchw, w1, s1, b1, w2, s2, b2, *, shortcut=True,
                      matmul_dtype=jnp.float32):
    """Pure-JAX reference. matmul_dtype=bfloat16 mirrors the kernel's MXU policy."""
    add = bool(shortcut) and (x_nchw.shape[1] == w2.shape[-1])
    cast = lambda a: a.astype(matmul_dtype)
    x = jnp.transpose(x_nchw, (0, 2, 3, 1))
    N, H, W, _ = x.shape
    h = jnp.einsum('nhwc,cd->nhwd', cast(x), cast(w1),
                   preferred_element_type=jnp.float32)
    h = h * s1 + b1
    h = h * jax.nn.sigmoid(h)
    hp = jnp.pad(h, ((0, 0), (1, 1), (1, 1), (0, 0)))
    y = jnp.zeros(x.shape[:3] + (w2.shape[-1],), jnp.float32)
    for kh in range(3):
        for kw in range(3):
            y = y + jnp.einsum('nhwc,cd->nhwd',
                               cast(hp[:, kh:kh + H, kw:kw + W, :]),
                               cast(w2[kh, kw]),
                               preferred_element_type=jnp.float32)
    y = y * s2 + b2
    y = y * jax.nn.sigmoid(y)
    out = x + y if add else y
    return jnp.transpose(out, (0, 3, 1, 2))


if __name__ == "__main__":
    # Shapes consistent with Bottleneck(in_channels=4, out_channels=4, e=0.5):
    #   cv1: 1x1 conv 4 -> 2, cv2: 3x3 conv 2 -> 4, residual add enabled.
    N, Cin, H, W = 2, 4, 16, 16
    Cout = Cin
    Cmid = int(Cout * 0.5)
    eps = 1e-5

    key = jax.random.PRNGKey(0)
    kx, kw1, kw2 = jax.random.split(key, 3)

    x = jax.random.normal(kx, (N, Cin, H, W), jnp.float32)

    # Deterministic Kaiming-normal-style weights (fan_in = C * k * k).
    w1 = jax.random.normal(kw1, (Cin, Cmid), jnp.float32) * np.sqrt(2.0 / (Cin * 1 * 1))
    w2 = jax.random.normal(kw2, (3, 3, Cmid, Cout), jnp.float32) * np.sqrt(2.0 / (Cmid * 3 * 3))

    # BatchNorm (inference): gamma=1, beta=0, running_mean=0, running_var=1.
    def fold_bn(c):
        gamma = jnp.ones((c,), jnp.float32)
        beta = jnp.zeros((c,), jnp.float32)
        mean = jnp.zeros((c,), jnp.float32)
        var = jnp.ones((c,), jnp.float32)
        scale = gamma / jnp.sqrt(var + eps)
        bias = beta - mean * scale
        return scale, bias

    s1, b1 = fold_bn(Cmid)
    s2, b2 = fold_bn(Cout)

    # Multi-row-tile configuration (exercises the i-axis / persistent hp path).
    out = bottleneck_pallas(x, w1, s1, b1, w2, s2, b2, tile_h=8)
    out = jax.block_until_ready(out)
    assert out.shape == (N, Cout, H, W)

    # Tight check vs. a reference using the same bf16-matmul / f32-accumulate
    # numerics as the kernel (validates conv structure, halo and residual).
    ref_bf16 = reference_forward(x, w1, s1, b1, w2, s2, b2,
                                 matmul_dtype=jnp.bfloat16)
    np.testing.assert_allclose(np.asarray(out), np.asarray(ref_bf16),
                               rtol=1e-2, atol=1e-2)

    # Loose check vs. the pure-f32 reference (original module semantics); the
    # only deviation is the intended bf16 quantization of MXU matmul inputs.
    ref_f32 = reference_forward(x, w1, s1, b1, w2, s2, b2)
    np.testing.assert_allclose(np.asarray(out), np.asarray(ref_f32),
                               rtol=1e-1, atol=1e-1)

    # Also check the single-tile-per-image configuration (default tile_h).
    out_big = bottleneck_pallas(x, w1, s1, b1, w2, s2, b2)
    out_big = jax.block_until_ready(out_big)
    np.testing.assert_allclose(np.asarray(out_big), np.asarray(ref_bf16),
                               rtol=1e-2, atol=1e-2)

    print("KERNEL_OK")
</pallas_src>

<mosaic_0001>
module attributes {stable_mosaic.version = 11 : i64} {
  func.func @bottleneck_kernel(%arg0: i32, %arg1: i32, %arg2: memref<1x16x16x128xf32, #tpu.memory_space<vmem>>, %arg3: memref<128x128xbf16, #tpu.memory_space<vmem>>, %arg4: memref<1x128xf32, #tpu.memory_space<vmem>>, %arg5: memref<1x128xf32, #tpu.memory_space<vmem>>, %arg6: memref<9x128x128xbf16, #tpu.memory_space<vmem>>, %arg7: memref<1x128xf32, #tpu.memory_space<vmem>>, %arg8: memref<1x128xf32, #tpu.memory_space<vmem>>, %arg9: memref<1x8x16x128xf32, #tpu.memory_space<vmem>>, %arg10: memref<18x18x128xbf16, #tpu.memory_space<vmem>>) attributes {dimension_semantics = [#tpu.dimension_semantics<parallel>, #tpu.dimension_semantics<arbitrary>], iteration_bounds = array<i64: 2, 2>, scalar_prefetch = 0 : i64, scratch_operands = 1 : i64, tpu.core_type = #tpu.core_type<tc>, window_params = [{transform_indices = @transform_0, window_bounds = array<i64: 1, 16, 16, 128>}, {pipeline_mode = #tpu.pipeline_mode<synchronous>, transform_indices = @transform_1, window_bounds = array<i64: 128, 128>}, {pipeline_mode = #tpu.pipeline_mode<synchronous>, transform_indices = @transform_2, window_bounds = array<i64: 1, 128>}, {pipeline_mode = #tpu.pipeline_mode<synchronous>, transform_indices = @transform_3, window_bounds = array<i64: 1, 128>}, {pipeline_mode = #tpu.pipeline_mode<synchronous>, transform_indices = @transform_4, window_bounds = array<i64: 9, 128, 128>}, {pipeline_mode = #tpu.pipeline_mode<synchronous>, transform_indices = @transform_5, window_bounds = array<i64: 1, 128>}, {pipeline_mode = #tpu.pipeline_mode<synchronous>, transform_indices = @transform_6, window_bounds = array<i64: 1, 128>}, {transform_indices = @transform_7, window_bounds = array<i64: 1, 8, 16, 128>}]} {
    %c0_i32 = arith.constant 0 : i32
    %0 = arith.cmpi eq, %arg1, %c0_i32 : i32
    %1 = arith.extui %0 : i1 to i32
    %c0_i32_0 = arith.constant 0 : i32
    %2 = arith.cmpi ne, %1, %c0_i32_0 : i32
    scf.if %2 {
      %cst_67 = arith.constant 0.000000e+00 : bf16
      %101 = vector.broadcast %cst_67 : bf16 to vector<1x18x128xbf16>
      %c0_68 = arith.constant 0 : index
      %c0_69 = arith.constant 0 : index
      %c0_70 = arith.constant 0 : index
      %102 = vector.load %arg10[%c0_68, %c0_69, %c0_70] : memref<18x18x128xbf16, #tpu.memory_space<vmem>>, vector<1x18x128xbf16>
      tpu.vector_store %arg10[%c0_68, %c0_69, %c0_70], %101 {strides = array<i32>} : memref<18x18x128xbf16, #tpu.memory_space<vmem>>, vector<1x18x128xbf16>,
      %c17 = arith.constant 17 : index
      %c0_71 = arith.constant 0 : index
      %c0_72 = arith.constant 0 : index
      %103 = vector.load %arg10[%c17, %c0_71, %c0_72] : memref<18x18x128xbf16, #tpu.memory_space<vmem>>, vector<1x18x128xbf16>
      tpu.vector_store %arg10[%c17, %c0_71, %c0_72], %101 {strides = array<i32>} : memref<18x18x128xbf16, #tpu.memory_space<vmem>>, vector<1x18x128xbf16>,
      %cst_73 = arith.constant 0.000000e+00 : bf16
      %104 = vector.broadcast %cst_73 : bf16 to vector<18x1x128xbf16>
      %c0_74 = arith.constant 0 : index
      %c0_75 = arith.constant 0 : index
      %c0_76 = arith.constant 0 : index
      %105 = vector.load %arg10[%c0_74, %c0_75, %c0_76] : memref<18x18x128xbf16, #tpu.memory_space<vmem>>, vector<18x1x128xbf16>
      tpu.vector_store %arg10[%c0_74, %c0_75, %c0_76], %104 {strides = array<i32>} : memref<18x18x128xbf16, #tpu.memory_space<vmem>>, vector<18x1x128xbf16>,
      %c0_77 = arith.constant 0 : index
      %c17_78 = arith.constant 17 : index
      %c0_79 = arith.constant 0 : index
      %106 = vector.load %arg10[%c0_77, %c17_78, %c0_79] : memref<18x18x128xbf16, #tpu.memory_space<vmem>>, vector<18x1x128xbf16>
      tpu.vector_store %arg10[%c0_77, %c17_78, %c0_79], %104 {strides = array<i32>} : memref<18x18x128xbf16, #tpu.memory_space<vmem>>, vector<18x1x128xbf16>,
      %c0_80 = arith.constant 0 : index
      %c0_81 = arith.constant 0 : index
      %c0_82 = arith.constant 0 : index
      %c0_83 = arith.constant 0 : index
      %107 = vector.load %arg2[%c0_80, %c0_81, %c0_82, %c0_83] : memref<1x16x16x128xf32, #tpu.memory_space<vmem>>, vector<1x16x16x128xf32>
      %108 = vector.shape_cast %107 : vector<1x16x16x128xf32> to vector<16x16x128xf32>
      %109 = vector.shape_cast %108 : vector<16x16x128xf32> to vector<256x128xf32>
      %110 = arith.truncf %109 : vector<256x128xf32> to vector<256x128xbf16>
      %c0_84 = arith.constant 0 : index
      %c0_85 = arith.constant 0 : index
      %111 = vector.load %arg3[%c0_84, %c0_85] : memref<128x128xbf16, #tpu.memory_space<vmem>>, vector<128x128xbf16>
      %cst_86 = arith.constant dense<0.000000e+00> : vector<256x128xf32>
      %112 = tpu.matmul %110, %111, %cst_86 {dimension_numbers = #tpu.dot_dimension_numbers<[1], [0], [0], [1], [0, 0, 1, 1], [], []>} : vector<256x128xbf16>, vector<128x128xbf16>, vector<256x128xf32> -> vector<256x128xf32>
      %c0_87 = arith.constant 0 : index
      %c0_88 = arith.constant 0 : index
      %113 = vector.load %arg4[%c0_87, %c0_88] : memref<1x128xf32, #tpu.memory_space<vmem>>, vector<1x128xf32>
      %114 = vector.broadcast %113 : vector<1x128xf32> to vector<256x128xf32>
      %115 = arith.mulf %112, %114 : vector<256x128xf32>
      %c0_89 = arith.constant 0 : index
      %c0_90 = arith.constant 0 : index
      %116 = vector.load %arg5[%c0_89, %c0_90] : memref<1x128xf32, #tpu.memory_space<vmem>>, vector<1x128xf32>
      %117 = vector.broadcast %116 : vector<1x128xf32> to vector<256x128xf32>
      %118 = arith.addf %115, %117 : vector<256x128xf32>
      %cst_91 = arith.constant 0.000000e+00 : f32
      %119 = vector.broadcast %cst_91 : f32 to vector<256x128xf32>
      %120 = arith.subf %119, %118 : vector<256x128xf32>
      %121 = math.exp %120 : vector<256x128xf32>
      %cst_92 = arith.constant 1.000000e+00 : f32
      %122 = vector.broadcast %cst_92 : f32 to vector<256x128xf32>
      %123 = arith.addf %122, %121 : vector<256x128xf32>
      %cst_93 = arith.constant 1.000000e+00 : f32
      %124 = vector.broadcast %cst_93 : f32 to vector<256x128xf32>
      %125 = arith.divf %124, %123 : vector<256x128xf32>
      %126 = arith.mulf %118, %125 : vector<256x128xf32>
      %127 = vector.shape_cast %126 : vector<256x128xf32> to vector<16x16x128xf32>
      %128 = arith.truncf %127 : vector<16x16x128xf32> to vector<16x16x128xbf16>
      %c1_94 = arith.constant 1 : index
      %c1_95 = arith.constant 1 : index
      %c0_96 = arith.constant 0 : index
      %129 = vector.load %arg10[%c1_94, %c1_95, %c0_96] : memref<18x18x128xbf16, #tpu.memory_space<vmem>>, vector<16x16x128xbf16>
      tpu.vector_store %arg10[%c1_94, %c1_95, %c0_96], %128 {strides = array<i32>} : memref<18x18x128xbf16, #tpu.memory_space<vmem>>, vector<16x16x128xbf16>,
    } else {
    }
    %c8_i32 = arith.constant 8 : i32
    %3 = arith.muli %arg1, %c8_i32 : i32
    %4 = tpu.assume_multiple %3, 8 : i32
    %cst = arith.constant 0.000000e+00 : f32
    %5 = vector.broadcast %cst : f32 to vector<128x128xf32>
    %c0_i32_1 = arith.constant 0 : i32
    %6 = arith.addi %4, %c0_i32_1 : i32
    %7 = arith.index_cast %6 : i32 to index
    %c0 = arith.constant 0 : index
    %c0_2 = arith.constant 0 : index
    %8 = vector.load %arg10[%7, %c0, %c0_2] : memref<18x18x128xbf16, #tpu.memory_space<vmem>>, vector<8x16x128xbf16>
    %9 = vector.shape_cast %8 : vector<8x16x128xbf16> to vector<128x128xbf16>
    %c0_3 = arith.constant 0 : index
    %c0_4 = arith.constant 0 : index
    %c0_5 = arith.constant 0 : index
    %10 = vector.load %arg6[%c0_3, %c0_4, %c0_5] : memref<9x128x128xbf16, #tpu.memory_space<vmem>>, vector<1x128x128xbf16>
    %11 = vector.shape_cast %10 : vector<1x128x128xbf16> to vector<128x128xbf16>
    %cst_6 = arith.constant dense<0.000000e+00> : vector<128x128xf32>
    %12 = tpu.matmul %9, %11, %cst_6 {dimension_numbers = #tpu.dot_dimension_numbers<[1], [0], [0], [1], [0, 0, 1, 1], [], []>} : vector<128x128xbf16>, vector<128x128xbf16>, vector<128x128xf32> -> vector<128x128xf32>
    %13 = arith.addf %5, %12 : vector<128x128xf32>
    %c0_i32_7 = arith.constant 0 : i32
    %14 = arith.addi %4, %c0_i32_7 : i32
    %15 = arith.index_cast %14 : i32 to index
    %c1 = arith.constant 1 : index
    %c0_8 = arith.constant 0 : index
    %16 = vector.load %arg10[%15, %c1, %c0_8] : memref<18x18x128xbf16, #tpu.memory_space<vmem>>, vector<8x16x128xbf16>
    %17 = vector.shape_cast %16 : vector<8x16x128xbf16> to vector<128x128xbf16>
    %c1_9 = arith.constant 1 : index
    %c0_10 = arith.constant 0 : index
    %c0_11 = arith.constant 0 : index
    %18 = vector.load %arg6[%c1_9, %c0_10, %c0_11] : memref<9x128x128xbf16, #tpu.memory_space<vmem>>, vector<1x128x128xbf16>
    %19 = vector.shape_cast %18 : vector<1x128x128xbf16> to vector<128x128xbf16>
    %cst_12 = arith.constant dense<0.000000e+00> : vector<128x128xf32>
    %20 = tpu.matmul %17, %19, %cst_12 {dimension_numbers = #tpu.dot_dimension_numbers<[1], [0], [0], [1], [0, 0, 1, 1], [], []>} : vector<128x128xbf16>, vector<128x128xbf16>, vector<128x128xf32> -> vector<128x128xf32>
    %21 = arith.addf %13, %20 : vector<128x128xf32>
    %c0_i32_13 = arith.constant 0 : i32
    %22 = arith.addi %4, %c0_i32_13 : i32
    %23 = arith.index_cast %22 : i32 to index
    %c2 = arith.constant 2 : index
    %c0_14 = arith.constant 0 : index
    %24 = vector.load %arg10[%23, %c2, %c0_14] : memref<18x18x128xbf16, #tpu.memory_space<vmem>>, vector<8x16x128xbf16>
    %25 = vector.shape_cast %24 : vector<8x16x128xbf16> to vector<128x128xbf16>
    %c2_15 = arith.constant 2 : index
    %c0_16 = arith.constant 0 : index
    %c0_17 = arith.constant 0 : index
    %26 = vector.load %arg6[%c2_15, %c0_16, %c0_17] : memref<9x128x128xbf16, #tpu.memory_space<vmem>>, vector<1x128x128xbf16>
    %27 = vector.shape_cast %26 : vector<1x128x128xbf16> to vector<128x128xbf16>
    %cst_18 = arith.constant dense<0.000000e+00> : vector<128x128xf32>
    %28 = tpu.matmul %25, %27, %cst_18 {dimension_numbers = #tpu.dot_dimension_numbers<[1], [0], [0], [1], [0, 0, 1, 1], [], []>} : vector<128x128xbf16>, vector<128x128xbf16>, vector<128x128xf32> -> vector<128x128xf32>
    %29 = arith.addf %21, %28 : vector<128x128xf32>
    %c1_i32 = arith.constant 1 : i32
    %30 = arith.addi %4, %c1_i32 : i32
    %31 = arith.index_cast %30 : i32 to index
    %c0_19 = arith.constant 0 : index
    %c0_20 = arith.constant 0 : index
    %32 = vector.load %arg10[%31, %c0_19, %c0_20] : memref<18x18x128xbf16, #tpu.memory_space<vmem>>, vector<8x16x128xbf16>
    %33 = vector.shape_cast %32 : vector<8x16x128xbf16> to vector<128x128xbf16>
    %c3 = arith.constant 3 : index
    %c0_21 = arith.constant 0 : index
    %c0_22 = arith.constant 0 : index
    %34 = vector.load %arg6[%c3, %c0_21, %c0_22] : memref<9x128x128xbf16, #tpu.memory_space<vmem>>, vector<1x128x128xbf16>
    %35 = vector.shape_cast %34 : vector<1x128x128xbf16> to vector<128x128xbf16>
    %cst_23 = arith.constant dense<0.000000e+00> : vector<128x128xf32>
    %36 = tpu.matmul %33, %35, %cst_23 {dimension_numbers = #tpu.dot_dimension_numbers<[1], [0], [0], [1], [0, 0, 1, 1], [], []>} : vector<128x128xbf16>, vector<128x128xbf16>, vector<128x128xf32> -> vector<128x128xf32>
    %37 = arith.addf %29, %36 : vector<128x128xf32>
    %c1_i32_24 = arith.constant 1 : i32
    %38 = arith.addi %4, %c1_i32_24 : i32
    %39 = arith.index_cast %38 : i32 to index
    %c1_25 = arith.constant 1 : index
    %c0_26 = arith.constant 0 : index
    %40 = vector.load %arg10[%39, %c1_25, %c0_26] : memref<18x18x128xbf16, #tpu.memory_space<vmem>>, vector<8x16x128xbf16>
    %41 = vector.shape_cast %40 : vector<8x16x128xbf16> to vector<128x128xbf16>
    %c4 = arith.constant 4 : index
    %c0_27 = arith.constant 0 : index
    %c0_28 = arith.constant 0 : index
    %42 = vector.load %arg6[%c4, %c0_27, %c0_28] : memref<9x128x128xbf16, #tpu.memory_space<vmem>>, vector<1x128x128xbf16>
    %43 = vector.shape_cast %42 : vector<1x128x128xbf16> to vector<128x128xbf16>
    %cst_29 = arith.constant dense<0.000000e+00> : vector<128x128xf32>
    %44 = tpu.matmul %41, %43, %cst_29 {dimension_numbers = #tpu.dot_dimension_numbers<[1], [0], [0], [1], [0, 0, 1, 1], [], []>} : vector<128x128xbf16>, vector<128x128xbf16>, vector<128x128xf32> -> vector<128x128xf32>
    %45 = arith.addf %37, %44 : vector<128x128xf32>
    %c1_i32_30 = arith.constant 1 : i32
    %46 = arith.addi %4, %c1_i32_30 : i32
    %47 = arith.index_cast %46 : i32 to index
    %c2_31 = arith.constant 2 : index
    %c0_32 = arith.constant 0 : index
    %48 = vector.load %arg10[%47, %c2_31, %c0_32] : memref<18x18x128xbf16, #tpu.memory_space<vmem>>, vector<8x16x128xbf16>
    %49 = vector.shape_cast %48 : vector<8x16x128xbf16> to vector<128x128xbf16>
    %c5 = arith.constant 5 : index
    %c0_33 = arith.constant 0 : index
    %c0_34 = arith.constant 0 : index
    %50 = vector.load %arg6[%c5, %c0_33, %c0_34] : memref<9x128x128xbf16, #tpu.memory_space<vmem>>, vector<1x128x128xbf16>
    %51 = vector.shape_cast %50 : vector<1x128x128xbf16> to vector<128x128xbf16>
    %cst_35 = arith.constant dense<0.000000e+00> : vector<128x128xf32>
    %52 = tpu.matmul %49, %51, %cst_35 {dimension_numbers = #tpu.dot_dimension_numbers<[1], [0], [0], [1], [0, 0, 1, 1], [], []>} : vector<128x128xbf16>, vector<128x128xbf16>, vector<128x128xf32> -> vector<128x128xf32>
    %53 = arith.addf %45, %52 : vector<128x128xf32>
    %c2_i32 = arith.constant 2 : i32
    %54 = arith.addi %4, %c2_i32 : i32
    %55 = arith.index_cast %54 : i32 to index
    %c0_36 = arith.constant 0 : index
    %c0_37 = arith.constant 0 : index
    %56 = vector.load %arg10[%55, %c0_36, %c0_37] : memref<18x18x128xbf16, #tpu.memory_space<vmem>>, vector<8x16x128xbf16>
    %57 = vector.shape_cast %56 : vector<8x16x128xbf16> to vector<128x128xbf16>
    %c6 = arith.constant 6 : index
    %c0_38 = arith.constant 0 : index
    %c0_39 = arith.constant 0 : index
    %58 = vector.load %arg6[%c6, %c0_38, %c0_39] : memref<9x128x128xbf16, #tpu.memory_space<vmem>>, vector<1x128x128xbf16>
    %59 = vector.shape_cast %58 : vector<1x128x128xbf16> to vector<128x128xbf16>
    %cst_40 = arith.constant dense<0.000000e+00> : vector<128x128xf32>
    %60 = tpu.matmul %57, %59, %cst_40 {dimension_numbers = #tpu.dot_dimension_numbers<[1], [0], [0], [1], [0, 0, 1, 1], [], []>} : vector<128x128xbf16>, vector<128x128xbf16>, vector<128x128xf32> -> vector<128x128xf32>
    %61 = arith.addf %53, %60 : vector<128x128xf32>
    %c2_i32_41 = arith.constant 2 : i32
    %62 = arith.addi %4, %c2_i32_41 : i32
    %63 = arith.index_cast %62 : i32 to index
    %c1_42 = arith.constant 1 : index
    %c0_43 = arith.constant 0 : index
    %64 = vector.load %arg10[%63, %c1_42, %c0_43] : memref<18x18x128xbf16, #tpu.memory_space<vmem>>, vector<8x16x128xbf16>
    %65 = vector.shape_cast %64 : vector<8x16x128xbf16> to vector<128x128xbf16>
    %c7 = arith.constant 7 : index
    %c0_44 = arith.constant 0 : index
    %c0_45 = arith.constant 0 : index
    %66 = vector.load %arg6[%c7, %c0_44, %c0_45] : memref<9x128x128xbf16, #tpu.memory_space<vmem>>, vector<1x128x128xbf16>
    %67 = vector.shape_cast %66 : vector<1x128x128xbf16> to vector<128x128xbf16>
    %cst_46 = arith.constant dense<0.000000e+00> : vector<128x128xf32>
    %68 = tpu.matmul %65, %67, %cst_46 {dimension_numbers = #tpu.dot_dimension_numbers<[1], [0], [0], [1], [0, 0, 1, 1], [], []>} : vector<128x128xbf16>, vector<128x128xbf16>, vector<128x128xf32> -> vector<128x128xf32>
    %69 = arith.addf %61, %68 : vector<128x128xf32>
    %c2_i32_47 = arith.constant 2 : i32
    %70 = arith.addi %4, %c2_i32_47 : i32
    %71 = arith.index_cast %70 : i32 to index
    %c2_48 = arith.constant 2 : index
    %c0_49 = arith.constant 0 : index
    %72 = vector.load %arg10[%71, %c2_48, %c0_49] : memref<18x18x128xbf16, #tpu.memory_space<vmem>>, vector<8x16x128xbf16>
    %73 = vector.shape_cast %72 : vector<8x16x128xbf16> to vector<128x128xbf16>
    %c8 = arith.constant 8 : index
    %c0_50 = arith.constant 0 : index
    %c0_51 = arith.constant 0 : index
    %74 = vector.load %arg6[%c8, %c0_50, %c0_51] : memref<9x128x128xbf16, #tpu.memory_space<vmem>>, vector<1x128x128xbf16>
    %75 = vector.shape_cast %74 : vector<1x128x128xbf16> to vector<128x128xbf16>
    %cst_52 = arith.constant dense<0.000000e+00> : vector<128x128xf32>
    %76 = tpu.matmul %73, %75, %cst_52 {dimension_numbers = #tpu.dot_dimension_numbers<[1], [0], [0], [1], [0, 0, 1, 1], [], []>} : vector<128x128xbf16>, vector<128x128xbf16>, vector<128x128xf32> -> vector<128x128xf32>
    %77 = arith.addf %69, %76 : vector<128x128xf32>
    %c0_53 = arith.constant 0 : index
    %c0_54 = arith.constant 0 : index
    %78 = vector.load %arg7[%c0_53, %c0_54] : memref<1x128xf32, #tpu.memory_space<vmem>>, vector<1x128xf32>
    %79 = vector.broadcast %78 : vector<1x128xf32> to vector<128x128xf32>
    %80 = arith.mulf %77, %79 : vector<128x128xf32>
    %c0_55 = arith.constant 0 : index
    %c0_56 = arith.constant 0 : index
    %81 = vector.load %arg8[%c0_55, %c0_56] : memref<1x128xf32, #tpu.memory_space<vmem>>, vector<1x128xf32>
    %82 = vector.broadcast %81 : vector<1x128xf32> to vector<128x128xf32>
    %83 = arith.addf %80, %82 : vector<128x128xf32>
    %cst_57 = arith.constant 0.000000e+00 : f32
    %84 = vector.broadcast %cst_57 : f32 to vector<128x128xf32>
    %85 = arith.subf %84, %83 : vector<128x128xf32>
    %86 = math.exp %85 : vector<128x128xf32>
    %cst_58 = arith.constant 1.000000e+00 : f32
    %87 = vector.broadcast %cst_58 : f32 to vector<128x128xf32>
    %88 = arith.addf %87, %86 : vector<128x128xf32>
    %cst_59 = arith.constant 1.000000e+00 : f32
    %89 = vector.broadcast %cst_59 : f32 to vector<128x128xf32>
    %90 = arith.divf %89, %88 : vector<128x128xf32>
    %91 = arith.mulf %83, %90 : vector<128x128xf32>
    %c0_60 = arith.constant 0 : index
    %92 = arith.index_cast %4 : i32 to index
    %c0_61 = arith.constant 0 : index
    %c0_62 = arith.constant 0 : index
    %93 = vector.load %arg2[%c0_60, %92, %c0_61, %c0_62] : memref<1x16x16x128xf32, #tpu.memory_space<vmem>>, vector<1x8x16x128xf32>
    %94 = vector.shape_cast %93 : vector<1x8x16x128xf32> to vector<8x16x128xf32>
    %95 = vector.shape_cast %94 : vector<8x16x128xf32> to vector<128x128xf32>
    %96 = arith.addf %91, %95 : vector<128x128xf32>
    %97 = vector.shape_cast %96 : vector<128x128xf32> to vector<8x16x128xf32>
    %c0_63 = arith.constant 0 : index
    %c0_64 = arith.constant 0 : index
    %c0_65 = arith.constant 0 : index
    %c0_66 = arith.constant 0 : index
    %98 = vector.load %arg9[%c0_63, %c0_64, %c0_65, %c0_66] : memref<1x8x16x128xf32, #tpu.memory_space<vmem>>, vector<1x8x16x128xf32>
    %99 = vector.shape_cast %98 : vector<1x8x16x128xf32> to vector<8x16x128xf32>
    %100 = vector.shape_cast %97 : vector<8x16x128xf32> to vector<1x8x16x128xf32>
    tpu.vector_store %arg9[%c0_63, %c0_64, %c0_65, %c0_66], %100 {strides = array<i32>} : memref<1x8x16x128xf32, #tpu.memory_space<vmem>>, vector<1x8x16x128xf32>,
    return
  }
  func.func @transform_0(%arg0: i32, %arg1: i32) -> (i32, i32, i32, i32) {
    %c0_i32 = arith.constant 0 : i32
    %c0_i32_0 = arith.constant 0 : i32
    %c0_i32_1 = arith.constant 0 : i32
    %c0_i32_2 = arith.constant 0 : i32
    return %arg0, %c0_i32, %c0_i32_0, %c0_i32_1 : i32, i32, i32, i32
  }
  func.func @transform_1(%arg0: i32, %arg1: i32) -> (i32, i32) {
    %c0_i32 = arith.constant 0 : i32
    %c0_i32_0 = arith.constant 0 : i32
    %c0_i32_1 = arith.constant 0 : i32
    return %c0_i32, %c0_i32_0 : i32, i32
  }
  func.func @transform_2(%arg0: i32, %arg1: i32) -> (i32, i32) {
    %c0_i32 = arith.constant 0 : i32
    %c0_i32_0 = arith.constant 0 : i32
    %c0_i32_1 = arith.constant 0 : i32
    return %c0_i32, %c0_i32_0 : i32, i32
  }
  func.func @transform_3(%arg0: i32, %arg1: i32) -> (i32, i32) {
    %c0_i32 = arith.constant 0 : i32
    %c0_i32_0 = arith.constant 0 : i32
    %c0_i32_1 = arith.constant 0 : i32
    return %c0_i32, %c0_i32_0 : i32, i32
  }
  func.func @transform_4(%arg0: i32, %arg1: i32) -> (i32, i32, i32) {
    %c0_i32 = arith.constant 0 : i32
    %c0_i32_0 = arith.constant 0 : i32
    %c0_i32_1 = arith.constant 0 : i32
    %c0_i32_2 = arith.constant 0 : i32
    return %c0_i32, %c0_i32_0, %c0_i32_1 : i32, i32, i32
  }
  func.func @transform_5(%arg0: i32, %arg1: i32) -> (i32, i32) {
    %c0_i32 = arith.constant 0 : i32
    %c0_i32_0 = arith.constant 0 : i32
    %c0_i32_1 = arith.constant 0 : i32
    return %c0_i32, %c0_i32_0 : i32, i32
  }
  func.func @transform_6(%arg0: i32, %arg1: i32) -> (i32, i32) {
    %c0_i32 = arith.constant 0 : i32
    %c0_i32_0 = arith.constant 0 : i32
    %c0_i32_1 = arith.constant 0 : i32
    return %c0_i32, %c0_i32_0 : i32, i32
  }
  func.func @transform_7(%arg0: i32, %arg1: i32) -> (i32, i32, i32, i32) {
    %c0_i32 = arith.constant 0 : i32
    %c0_i32_0 = arith.constant 0 : i32
    %c0_i32_1 = arith.constant 0 : i32
    return %arg0, %arg1, %c0_i32, %c0_i32_0 : i32, i32, i32, i32
  }
}

</mosaic_0001>

<bundles_post_ra>
// kernel: tpu_custom_call.1
= control target key start
LH: loop header
LB: loop body
LE: loop exit
PB: predicated region body
PF: predicated region fallthrough
CT: control target
= control target key end

     0   :  { %s7976_s0 = inlined_call_operand.hbm [shape: f32[2,16,16,128], index: 0, kind: input, shape index: {}]   ;;  %s7977_s1 = inlined_call_operand.hbm [shape: bf16[128,128], index: 1, kind: input, shape index: {}]   ;;  %s7978_s2 = inlined_call_operand.vmem [shape: f32[1,128], index: 2, kind: input, shape index: {}]   ;;  %s7979_s3 = inlined_call_operand.vmem [shape: f32[1,128], index: 3, kind: input, shape index: {}]   ;;  %s7980_s4 = inlined_call_operand.hbm [shape: bf16[9,128,128], index: 4, kind: input, shape index: {}]   ;;  %s7981_s5 = inlined_call_operand.vmem [shape: f32[1,128], index: 5, kind: input, shape index: {}]   ;;  %s7982_s6 = inlined_call_operand.vmem [shape: f32[1,128], index: 6, kind: input, shape index: {}]   ;;  %s7983_s7 = inlined_call_operand.hbm [shape: f32[2,16,16,128], index: 7, kind: output, shape index: {}]  }
   0x1   :  { %7994 = sst [smem:[#allocation30_spill]] %s7977_s1 }
   0x2   :  { %7995 = sst [smem:[#allocation31_spill]] %s7980_s4 }
   0x3   :  { %7996 = sst [smem:[#allocation32_spill]] %s7981_s5 }
   0x4   :  { %7997 = sst [smem:[#allocation33_spill]] %s7982_s6 }
   0x5   :  { %7998 = sst [smem:[#allocation34_spill]] %s7983_s7 }
   0x6   :  { %12 = vsyncpa [#allocation4], 0 }
   0x7   :  { %14 = vsyncpa [#allocation4 + $0x1], 0 }
   0x8   :  { %15 = vsyncpa [#allocation7], 0 }
   0x9   :  { %16 = vsyncpa [#allocation5], 0 }
   0xa   :  { %18 = vsyncpa [#allocation5 + $0x1], 0  ;;  %s6369_s24 = smov 0   ;;  %s6371_s25 = smov 0  }
   0xb   :  { %s6373_s26 = smov 0   ;;  %s6375_s27 = smov 0  }
   0xc   :  { %s6377_s28 = smov 0   ;;  %s6379_s29 = smov 0  }
   0xd   :  { %s6381_s30 = smov 0   ;;  %s6383_s8 = smov 0  }
   0xe   :  { %s6385_s9 = smov 0   ;;  %s6387_s10 = smov 0  }
   0xf   :  { %s6389_s11 = smov 0  }
  0x10 LB: > { %7999 = sst [smem:[#allocation13_spill]] %s6276_s24  ;;  %s4776_s12 = sadd.s32 4294967295, %s6316_s11   ;;  %s6316_s11 = sphi %s6389_s11, %s24_s11   ;;  %s6312_s10 = sphi %s6387_s10, %s8070_s10   ;;  %s6308_s9 = sphi %s6385_s9, %s8069_s9   ;;  %s6304_s8 = sphi %s6383_s8, %s8068_s8   ;;  %s6300_s30 = sphi %s6381_s30, %s8060_s30   ;;  %s6296_s29 = sphi %s6379_s29, %s8067_s29   ;;  %s6292_s28 = sphi %s6377_s28, %s8066_s28   ;;  %s6288_s27 = sphi %s6375_s27, %s8065_s27   ;;  %s6284_s26 = sphi %s6373_s26, %s8064_s26   ;;  %s6280_s25 = sphi %s6371_s25, %s8063_s25   ;;  %s6276_s24 = sphi %s6369_s24, %s8062_s24  }
  0x11   : > { %8000 = sst [smem:[#allocation14_spill]] %s6304_s8  ;;  %s4777_s13 = sadd.s32 4294967294, %s6316_s11  }
  0x12   : > { %8001 = sst [smem:[#allocation15_spill]] %s6308_s9  ;;  %p56_p0 = scmp.ne.s32.totalorder %s6292_s28, %s6288_s27 }
  0x13   : > { %p6425_p1 = scmp.eq.s32.totalorder %s4776_s12, 0  ;;  %p207_p2 = scmp.ne.s32.totalorder %s6284_s26, %s6280_s25 }
  0x14   : > { %p208_p4 = scmp.eq.s32.totalorder %s4776_s12, 3  ;;  %p213_p5 = scmp.ne.s32.totalorder %s6280_s25, %s6276_s24 }
  0x15   : > { %s8002_s14 = scalar_select %p6425_p1, 1, 0 }
  0x16   : > { %p6434_p3 = por %p6425_p1, %p56_p0  ;;  %p214_p6 = scmp.eq.s32.totalorder %s4777_s13, 3 }
  0x17   : > { %p6440_p7 = por %p208_p4, %p207_p2  ;;  %p4778_p8 = scmp.ge.s32.totalorder %s6316_s11, 1 }
  0x18   : > { %p6445_p9 = por %p214_p6, %p213_p5  ;;  %p221_p10 = scmp.lt.s32.totalorder %s6316_s11, 5 }
  0x19   : > { %s8004_s17 = scalar_select %p6440_p7, 1, 0 }
  0x1a   : > { %s8006_s18 = scalar_select %p6445_p9, 1, 0 }
  0x1b   : > { %8005 = sst [smem:[#allocation16_spill]] %s8004_s17  ;;  %p6450_p11 = pnand %p4778_p8, %p221_p10 }
  0x1c   : > { %8007 = sst [smem:[#allocation17_spill]] %s8006_s18  ;;  %s6318_s20 = smov [#allocation6]  }
  0x1d   : > { %s233_s21 = sshll.u32 %s6318_s20, 4  ;;  %p5698_p12 = pneg %p6450_p11  ;;  %s234_s21 = int_to_ptr.vmem [resolvable:$true] %s233_s21 }
  0x1e   : > { %s6319_s23 = smov [#allocation8]   ;;  %s6123_s12 = scalar_lea.vmem %s234_s21, 1024 }
  0x1f   : > { %p6458_p13 = pnand %p5698_p12, %p6425_p1  ;;  %s252_s27 = sshll.u32 %s6319_s23, 4  ;;  %s253_s27 = int_to_ptr.vmem [resolvable:$true] %s252_s27 }
  0x20   : > { %p6124_p2 = scmp.ne.s32.totalorder %s234_s21, %s6123_s12  ;;  %p6131_p6 = scmp.lt.s32.totalorder %s234_s21, %s234_s21 }
  0x21   : > { %p6114_p0 = pneg %p6458_p13  ;;  %p6132_p8 = scmp.lt.s32.totalorder %s6123_s12, %s6123_s12 }
  0x23   : > { %p6126_p4 = pnand %p6124_p2, %p6114_p0  ;;  %p6133_p10 = por %p6132_p8, %p6131_p6 }
  0x25   : > { %p6127_p5 = pneg %p6126_p4 }
  0x27   : > { %p6134_p12 = pnand %p6133_p10, %p6127_p5 }
  0x29   : > { %6137 = shalt.err (!%p6134_p12)
}
  0x2a   : > { %s6320_s13 = smov 64   ;;  %s6321_s20 = smov 4  }
  0x2b   : > { %s8010_s1 = sld [smem:[#allocation30_spill]]  ;;  %s6149_s18 = scalar_lea.vmem %s253_s27, 9216 }
  0x2c   : > { %p6150_p9 = scmp.ne.s32.totalorder %s253_s27, %s6149_s18  ;;  %p6157_p7 = scmp.lt.s32.totalorder %s253_s27, %s253_s27 }
  0x2d   : > { %p6158_p1 = scmp.lt.s32.totalorder %s6149_s18, %s6149_s18 }
  0x2e   : > { %p6152_p2 = pnand %p6150_p9, %p6114_p0 }
  0x2f   : > { %p6159_p6 = por %p6158_p1, %p6157_p7 }
  0x30   : > { %p6153_p4 = pneg %p6152_p2 }
  0x31   : > { %5701 = dma.hbm_to_vmem [thread:$0]  (!%p6458_p13), %s8010_s1, 1024, %s234_s21, [#allocation7], %s6320_s13, %s6320_s13, %s6321_s20  }
  0x32   : > { %p6160_p5 = pnand %p6159_p6, %p6153_p4 }
  0x34   : > { %6163 = shalt.err (!%p6160_p5)
}
  0x35   : > { %s8011_s4 = sld [smem:[#allocation31_spill]]  ;;  %s33_s15 = sadd.s32 1, %s6308_s9 }
  0x36   : > { %s36_s18 = sadd.s32 1, %s6312_s10  ;;  %p34_p1 = scmp.ge.s32.totalorder %s33_s15, 2 }
  0x37   : > { %s43_s21 = sadd.s32 1, %s6296_s29  ;;  %p50_p7 = scmp.ne.s32.totalorder %s6296_s29, %s6292_s28 }
  0x38   : > { %p51_p9 = scmp.eq.s32.totalorder %s6316_s11, 0  ;;  %s8072_s15 = smov (%p34_p1, %s33_s15), 0 }
  0x39   : > { %8012 = sst [smem:[#allocation18_spill]] %s8072_s15  ;;  %s8074_s18 = smov (!%p34_p1, %s36_s18), %s6312_s10 }
  0x3a   : > { %p6489_p0 = por %p51_p9, %p50_p7  ;;  %s193_s22 = ssub.s32 %s6308_s9, %s8072_s15 }
  0x3b   : > { %5704 = dma.hbm_to_vmem [thread:$0]  (!%p6458_p13), %s8011_s4, 9216, %s253_s27, [#allocation7], %s6320_s13, %s6320_s13, %s6321_s20  }
  0x3c   : > { %p38_p13 = scmp.ge.s32.totalorder %s8074_s18, 2  ;;  %p5715_p8 = scmp.lt.s32.totalorder %s6316_s11, 4 }
  0x3d   : > { %s272_s27 = sand.u32 1, %s6296_s29   ;;  %s5114_s13 = sshll.u32 %s6312_s10, 12 }
  0x3e   : > { %s8076_s18 = smov (%p38_p13, %s8074_s18), 0  ;;  %s4782_s20 = sshll.u32 %s272_s27, 8 }
  0x3f   : > { %s40_s23 = ssub.s32 %s6312_s10, %s8076_s18  ;;  %s282_s7 = scalar_lea.hbm %s7976_s0, %s5114_s13 }
  0x40   : > { %p41_p10 = scmp.eq.s32.totalorder %s40_s23, 0  ;;  %s194_s12 = sor.u32 %s193_s22, %s40_s23 }
  0x41   : > { %p195_p12 = scmp.eq.s32.totalorder %s194_s12, 0  ;;  %s8014_s15 = sadd.s32 1, %s6284_s26 }
  0x42   : > { %s6506_s17 = scalar_select %p41_p10, %s6296_s29, %s43_s21  }
  0x43   : > { %s6511_s9 = scalar_select %p195_p12, %s6284_s26, %s8014_s15  }
  0x44   : > { %s276_s8 = scalar_lea.vmem [#allocation3], %s4782_s20  ;;  %p6517_p2 = pnand %p5715_p8, %p6489_p0 }
  0x45   : > { %s283_s6 = sshll.u32 %s276_s8, 4  ;;  %s273_s22 = scalar_lea.sflag [#allocation4], %s272_s27  ;;  %s284_s6 = int_to_ptr.vmem [resolvable:$true] %s283_s6 }
  0x46   : > { %p6166_p4 = pneg %p6517_p2  ;;  %s6177_s1 = scalar_lea.vmem %s284_s6, 4096 }
  0x47   : > { %p6178_p6 = scmp.ne.s32.totalorder %s284_s6, %s6177_s1  ;;  %s6322_s4 = smov [#allocation3]  }
  0x48   : > { %s6182_s15 = sshll.u32 %s6322_s4, 4  ;;  %s6183_s15 = int_to_ptr.vmem [resolvable:$false] %s6182_s15 }
  0x49   : > { %p6180_p5 = pnand %p6178_p6, %p6166_p4  ;;  %s6184_s21 = scalar_lea.vmem %s6183_s15, 8192 }
  0x4a   : > { %p6185_p7 = scmp.lt.s32.totalorder %s284_s6, %s6183_s15  ;;  %p6186_p9 = scmp.lt.s32.totalorder %s6184_s21, %s6177_s1 }
  0x4b   : > { %p6181_p1 = pneg %p6180_p5 }
  0x4c   : > { %p6187_p13 = por %p6186_p9, %p6185_p7 }
  0x4e   : > { %p6188_p0 = pnand %p6187_p13, %p6181_p1 }
  0x50   : > { %6191 = shalt.err (!%p6188_p0)
}
  0x51   : > { %s6323_s8 = smov 128   ;;  %s6324_s24 = smov 8  }
  0x52   : > { %5708 = dma.hbm_to_vmem [thread:$0]  (!%p6517_p2), %s282_s7, 4096, %s284_s6, %s273_s22, %s6323_s8, %s6323_s8, %s6324_s24  }
  0x53   : > { %295 = sbr.rel (%p6450_p11) target bundleno = 935 (0x3a7), region = 48 }
  0x58   : > { %s297_s27 = sand.u32 1, %s6292_s28  }
  0x59   : > { %s4786_s13 = sshll.u32 %s297_s27, 8  ;;  %s298_s20 = scalar_lea.sflag [#allocation4], %s297_s27 }
  0x5a   : > { %s6528_s23 = scalar_lea.vmem [#allocation3], %s4786_s13 }
  0x5b   : > { %6263 = dma.done.wait (%p6434_p3), %s298_s20, 4096  }
  0x5c   : > { %6265 = vsyncadd (%p6434_p3), %s298_s20, 4294963200  ;;  %p8016_p8 = scmp.ne.s32.totalorder %s8002_s14, 0 }
  0x5e   : > { %6267 = dma.done.wait (%p8016_p8), [#allocation7], 10240  }
  0x5f   : > { %6269 = vsyncadd (%p8016_p8), [#allocation7], 4294957056  ;;  %s337_s5 = sand.u32 1, %s6280_s25   ;;  %p4790_p11 = scmp.ne.s32.totalorder %s6300_s30, 0 }
  0x60   : > { %s4789_s6 = sshll.u32 %s337_s5, 7 }
  0x61   : > { %s6541_s7 = scalar_lea.vmem [#allocation9], %s4789_s6  ;;  %345 = sbr.rel (%p4790_p11) target bundleno = 485 (0x1e5), region = 64 }
  0x66   : > { %v5816_v0 = vld [vmem:[#allocation6 + $0x38] sm:$0xff]   ;;  %v6325_v1 = vmov 0   ;;  %v5817_v2 = vld [vmem:[#allocation6 + $0x30] sm:$0xff]   ;;  %v5818_v3 = vld [vmem:[#allocation6 + $0x28] sm:$0xff]   ;;  %vm353_vm0 = vcmask 1040384   ;;  %vm1460_vm5 = vcmask 1043456  }
  0x67   : > { %346 = vst [vmem:[#allocation2] sm:$0xf] %v6325_v1  ;;  %347 = vst [vmem:[#allocation2 + $0x4] sm:$0xf] %v6325_v1  ;;  %5318 = vmatprep.subr.bf16.mxu0 %v5816_v0  ;;  %5654 = vmatprep.subr.bf16.mxu1 %v5816_v0  ;;  %v5819_v4 = vld [vmem:[#allocation6 + $0x20] sm:$0xff]   ;;  %v467_v6 = vld [vmem:[%s6528_s23 + $0x8] sm:$0xff] }
  0x68   : > { %348 = vst [vmem:[#allocation2 + $0x8] sm:$0x1] %v6325_v1  ;;  %350 = vst [vmem:[#allocation2 + $0xcc] sm:$0xf] %v6325_v1  ;;  %5319 = vmatpush3.bf16.msra.mxu0 %v5816_v0  ;;  %5662 = vmatpush3.bf16.msra.mxu1 %v5816_v0  ;;  %v466_v5 = vld [vmem:[%s6528_s23] sm:$0xff]  ;;  %v483_v9 = vld [vmem:[%s6528_s23 + $0x88] sm:$0xff] }
  0x69   : > { %351 = vst [vmem:[#allocation2 + $0xd0] sm:$0xf] %v6325_v1  ;;  %352 = vst [vmem:[#allocation2 + $0xd4] sm:$0x1] %v6325_v1  ;;  %5320 = vmatprep.subr.bf16.mxu0 %v5817_v2  ;;  %5655 = vmatprep.subr.bf16.mxu1 %v5817_v2  ;;  %v498_v7 = vpack.c.bf16 %v467_v6, %v466_v5  ;;  %v482_v8 = vld [vmem:[%s6528_s23 + $0x80] sm:$0xff]  ;;  %v5820_v11 = vld [vmem:[#allocation6 + $0x18] sm:$0xff]  }
  0x6a   : > { %v506_v10 = vpack.c.bf16 %v483_v9, %v482_v8  ;;  %v5821_v12 = vld [vmem:[#allocation6 + $0x10] sm:$0xff]   ;;  %vm354_vm1 = vsmask.f32 256  ;;  %vm410_vm2 = vsmask.f32 7938  ;;  %v5822_v17 = vld [vmem:[#allocation6 + $0x8] sm:$0xff]  }
  0x6b   : > { %5334 = vmatprep.mubr.bf16.mxu0 %v498_v7  ;;  %vm6550_vm3 = vmand %vm353_vm0, %vm354_vm1  ;;  %v362_v19 = vld [vmem:[#allocation2 + $0x18] sm:$0x1]  ;;  %v468_v27 = vld [vmem:[%s6528_s23 + $0x10] sm:$0xff]  ;;  %vm1137_vm6 = vsmask.f32 4368 }
  0x6c   : > { %5321 = vmatpush3.bf16.msra.mxu0 %v5817_v2  ;;  %5663 = vmatpush3.bf16.msra.mxu1 %v5817_v2  ;;  %v363_v21 = vsel %vm6550_vm3, 0, %v362_v19  ;;  %vm6562_vm4 = vmand %vm353_vm0, %vm410_vm2  ;;  %v5823_v26 = vld [vmem:[#allocation6] sm:$0xff]   ;;  %v469_v28 = vld [vmem:[%s6528_s23 + $0x18] sm:$0xff] }
  0x6d   : > { %5322 = vmatprep.subr.bf16.mxu0 %v5818_v3  ;;  %5656 = vmatprep.subr.bf16.mxu1 %v5818_v3  ;;  %364 = vst [vmem:[#allocation2 + $0x18] sm:$0x1] %v363_v21  ;;  %v484_v29 = vld [vmem:[%s6528_s23 + $0x90] sm:$0xff]  ;;  %v485_v30 = vld [vmem:[%s6528_s23 + $0x98] sm:$0xff]  ;;  %v470_v31 = vld [vmem:[%s6528_s23 + $0x20] sm:$0xff]  ;;  %v499_v35 = vpack.c.bf16 %v469_v28, %v468_v27 }
  0x6e   : > { %5350 = vmatprep.mubr.bf16.mxu1 %v506_v10  ;;  %v356_v13 = vld [vmem:[#allocation2] sm:$0x1]  ;;  %v486_v33 = vld [vmem:[%s6528_s23 + $0xa0] sm:$0xff]  ;;  %v507_v36 = vpack.c.bf16 %v485_v30, %v484_v29  ;;  %v472_v39 = vld [vmem:[%s6528_s23 + $0x30] sm:$0xff] }
  0x6f   : > { %v407_v14 = vld [vmem:[#allocation2 + $0xcc] sm:$0x1]  ;;  %v412_v15 = vld [vmem:[#allocation2 + $0x8] sm:$0x1]  ;;  %v357_v20 = vsel %vm6550_vm3, 0, %v356_v13  ;;  %v471_v32 = vld [vmem:[%s6528_s23 + $0x28] sm:$0xff] }
  0x70   : > { %5323 = vmatpush3.bf16.msra.mxu0 %v5818_v3  ;;  %5664 = vmatpush3.bf16.msra.mxu1 %v5818_v3  ;;  %v463_v16 = vld [vmem:[#allocation2 + $0xd4] sm:$0x1]  ;;  %v408_v22 = vsel %vm6550_vm3, 0, %v407_v14  ;;  %358 = vst [vmem:[#allocation2] sm:$0x1] %v357_v20  ;;  %v413_v24 = vsel %vm6562_vm4, 0, %v412_v15  ;;  %v500_v37 = vpack.c.bf16 %v471_v32, %v470_v31  ;;  %vm6813_vm7 = vmand %vm1460_vm5, %vm410_vm2 }
  0x71   : > { %5324 = vmatprep.subr.bf16.mxu0 %v5819_v4  ;;  %5657 = vmatprep.subr.bf16.mxu1 %v5819_v4  ;;  %409 = vst [vmem:[#allocation2 + $0xcc] sm:$0x1] %v408_v22  ;;  %v464_v25 = vsel %vm6562_vm4, 0, %v463_v16  ;;  %414 = vst [vmem:[#allocation2 + $0x8] sm:$0x1] %v413_v24  ;;  %v487_v34 = vld [vmem:[%s6528_s23 + $0xa8] sm:$0xff] }
  0x72   : > { %465 = vst [vmem:[#allocation2 + $0xd4] sm:$0x1] %v464_v25  ;;  %v508_v38 = vpack.c.bf16 %v487_v34, %v486_v33  ;;  %v473_v40 = vld [vmem:[%s6528_s23 + $0x38] sm:$0xff]  ;;  %v488_v41 = vld [vmem:[%s6528_s23 + $0xb0] sm:$0xff]  ;;  %v474_v43 = vld [vmem:[%s6528_s23 + $0x40] sm:$0xff] }
  0x73   : > { %v489_v42 = vld [vmem:[%s6528_s23 + $0xb8] sm:$0xff]  ;;  %v475_v44 = vld [vmem:[%s6528_s23 + $0x48] sm:$0xff]  ;;  %v490_v45 = vld [vmem:[%s6528_s23 + $0xc0] sm:$0xff]  ;;  %v501_v47 = vpack.c.bf16 %v473_v40, %v472_v39 }
  0x74   : > { %5325 = vmatpush3.bf16.msra.mxu0 %v5819_v4  ;;  %5665 = vmatpush3.bf16.msra.mxu1 %v5819_v4  ;;  %v491_v46 = vld [vmem:[%s6528_s23 + $0xc8] sm:$0xff]  ;;  %v509_v48 = vpack.c.bf16 %v489_v42, %v488_v41  ;;  %v502_v49 = vpack.c.bf16 %v475_v44, %v474_v43  ;;  %v476_v51 = vld [vmem:[%s6528_s23 + $0x50] sm:$0xff]  ;;  %v477_v52 = vld [vmem:[%s6528_s23 + $0x58] sm:$0xff] }
  0x75   : > { %5326 = vmatprep.subr.bf16.mxu0 %v5820_v11  ;;  %5658 = vmatprep.subr.bf16.mxu1 %v5820_v11  ;;  %v510_v50 = vpack.c.bf16 %v491_v46, %v490_v45  ;;  %v492_v53 = vld [vmem:[%s6528_s23 + $0xd0] sm:$0xff]  ;;  %v493_v54 = vld [vmem:[%s6528_s23 + $0xd8] sm:$0xff]  ;;  %v478_v55 = vld [vmem:[%s6528_s23 + $0x60] sm:$0xff]  ;;  %v503_v59 = vpack.c.bf16 %v477_v52, %v476_v51 }
  0x76   : > { %v479_v56 = vld [vmem:[%s6528_s23 + $0x68] sm:$0xff]  ;;  %v494_v57 = vld [vmem:[%s6528_s23 + $0xe0] sm:$0xff]  ;;  %v511_v60 = vpack.c.bf16 %v493_v54, %v492_v53  ;;  %v480_v63 = vld [vmem:[%s6528_s23 + $0x70] sm:$0xff] }
  0x77   : > { %v495_v58 = vld [vmem:[%s6528_s23 + $0xe8] sm:$0xff]  ;;  %v504_v61 = vpack.c.bf16 %v479_v56, %v478_v55  ;;  %v481_v0 = vld [vmem:[%s6528_s23 + $0x78] sm:$0xff]  ;;  %v496_v1 = vld [vmem:[%s6528_s23 + $0xf0] sm:$0xff] }
  0x78   : > { %5327 = vmatpush3.bf16.msra.mxu0 %v5820_v11  ;;  %5666 = vmatpush3.bf16.msra.mxu1 %v5820_v11  ;;  %v512_v62 = vpack.c.bf16 %v495_v58, %v494_v57  ;;  %v497_v2 = vld [vmem:[%s6528_s23 + $0xf8] sm:$0xff]  ;;  %v505_v3 = vpack.c.bf16 %v481_v0, %v480_v63  ;;  %v386_v5 = vld [vmem:[#allocation2 + $0x78] sm:$0x1]  ;;  %v359_v7 = vld [vmem:[#allocation2 + $0xc] sm:$0x1] }
  0x79   : > { %5328 = vmatprep.subr.bf16.mxu0 %v5821_v12  ;;  %5659 = vmatprep.subr.bf16.mxu1 %v5821_v12  ;;  %v513_v4 = vpack.c.bf16 %v497_v2, %v496_v1  ;;  %v387_v6 = vsel %vm6550_vm3, 0, %v386_v5  ;;  %v383_v8 = vld [vmem:[#allocation2 + $0x6c] sm:$0x1]  ;;  %v360_v9 = vsel %vm6550_vm3, 0, %v359_v7  ;;  %v418_v11 = vld [vmem:[#allocation2 + $0x20] sm:$0x1]  ;;  %vm6841_vm8 = vmor %vm354_vm1, %vm1137_vm6 }
  0x7a   : > { %388 = vst [vmem:[#allocation2 + $0x78] sm:$0x1] %v387_v6  ;;  %v384_v10 = vsel %vm6550_vm3, 0, %v383_v8  ;;  %361 = vst [vmem:[#allocation2 + $0xc] sm:$0x1] %v360_v9 }
  0x7b   : > { %385 = vst [vmem:[#allocation2 + $0x6c] sm:$0x1] %v384_v10  ;;  %v442_v13 = vld [vmem:[#allocation2 + $0x80] sm:$0x1]  ;;  %v415_v15 = vld [vmem:[#allocation2 + $0x14] sm:$0x1] }
  0x7c   : > { %5329 = vmatpush3.bf16.msra.mxu0 %v5821_v12  ;;  %5667 = vmatpush3.bf16.msra.mxu1 %v5821_v12  ;;  %v419_v12 = vsel %vm6562_vm4, 0, %v418_v11  ;;  %v443_v14 = vsel %vm6562_vm4, 0, %v442_v13  ;;  %v416_v16 = vsel %vm6562_vm4, 0, %v415_v15  ;;  %v368_v20 = vld [vmem:[#allocation2 + $0x30] sm:$0x1] }
  0x7d   : > { %5330 = vmatprep.subr.bf16.mxu0 %v5822_v17  ;;  %5660 = vmatprep.subr.bf16.mxu1 %v5822_v17  ;;  %420 = vst [vmem:[#allocation2 + $0x20] sm:$0x1] %v419_v12  ;;  %444 = vst [vmem:[#allocation2 + $0x80] sm:$0x1] %v443_v14  ;;  %v392_v21 = vld [vmem:[#allocation2 + $0x90] sm:$0x1] }
  0x7e   : > { %417 = vst [vmem:[#allocation2 + $0x14] sm:$0x1] %v416_v16  ;;  %v369_v22 = vsel %vm6550_vm3, 0, %v368_v20  ;;  %v393_v24 = vsel %vm6550_vm3, 0, %v392_v21  ;;  %v365_v25 = vld [vmem:[#allocation2 + $0x24] sm:$0x1] }
  0x7f   : > { %370 = vst [vmem:[#allocation2 + $0x30] sm:$0x1] %v369_v22  ;;  %394 = vst [vmem:[#allocation2 + $0x90] sm:$0x1] %v393_v24  ;;  %v366_v27 = vsel %vm6550_vm3, 0, %v365_v25 }
  0x80   : > { %5331 = vmatpush3.bf16.msra.mxu0 %v5822_v17  ;;  %5668 = vmatpush3.bf16.msra.mxu1 %v5822_v17  ;;  %v439_v17 = vld [vmem:[#allocation2 + $0x74] sm:$0x1]  ;;  %367 = vst [vmem:[#allocation2 + $0x24] sm:$0x1] %v366_v27  ;;  %v424_v29 = vld [vmem:[#allocation2 + $0x38] sm:$0x1] }
  0x81   : > { %5332 = vmatprep.subr.bf16.mxu0 %v5823_v26  ;;  %5661 = vmatprep.subr.bf16.mxu1 %v5823_v26  ;;  %v440_v19 = vsel %vm6562_vm4, 0, %v439_v17  ;;  %v448_v30 = vld [vmem:[#allocation2 + $0x98] sm:$0x1]  ;;  %v425_v31 = vsel %vm6562_vm4, 0, %v424_v29  ;;  %v421_v33 = vld [vmem:[#allocation2 + $0x2c] sm:$0x1] }
  0x82   : > { %441 = vst [vmem:[#allocation2 + $0x74] sm:$0x1] %v440_v19  ;;  %v449_v32 = vsel %vm6562_vm4, 0, %v448_v30  ;;  %426 = vst [vmem:[#allocation2 + $0x38] sm:$0x1] %v425_v31  ;;  %v422_v34 = vsel %vm6562_vm4, 0, %v421_v33 }
  0x83   : > { %450 = vst [vmem:[#allocation2 + $0x98] sm:$0x1] %v449_v32  ;;  %423 = vst [vmem:[#allocation2 + $0x2c] sm:$0x1] %v422_v34  ;;  %v371_v41 = vld [vmem:[#allocation2 + $0x3c] sm:$0x1] }
  0x84   : > { %5333 = vmatpush3.bf16.msra.mxu0 %v5823_v26  ;;  %5669 = vmatpush3.bf16.msra.mxu1 %v5823_v26  ;;  %v389_v26 = vld [vmem:[#allocation2 + $0x84] sm:$0x1]  ;;  %v372_v42 = vsel %vm6550_vm3, 0, %v371_v41  ;;  %v395_v43 = vld [vmem:[#allocation2 + $0x9c] sm:$0x1] }
  0x85   : > { %v390_v28 = vsel %vm6550_vm3, 0, %v389_v26  ;;  %373 = vst [vmem:[#allocation2 + $0x3c] sm:$0x1] %v372_v42  ;;  %v396_v44 = vsel %vm6550_vm3, 0, %v395_v43  ;;  %v430_v45 = vld [vmem:[#allocation2 + $0x50] sm:$0x1] }
  0x86   : > { %391 = vst [vmem:[#allocation2 + $0x84] sm:$0x1] %v390_v28  ;;  %397 = vst [vmem:[#allocation2 + $0x9c] sm:$0x1] %v396_v44  ;;  %v454_v46 = vld [vmem:[#allocation2 + $0xb0] sm:$0x1] }
  0x87   : > { %5335 = vmatmul.mubr.bf16.vlgmr.msra.gmra.mxu0 %v499_v35  ;;  %5351 = vmatmul.mubr.bf16.vlgmr.msra.gmra.mxu1 %v507_v36  ;;  %v445_v35 = vld [vmem:[#allocation2 + $0x8c] sm:$0x1]  ;;  %v380_v53 = vld [vmem:[#allocation2 + $0x60] sm:$0x1]  ;;  %v377_v57 = vld [vmem:[#allocation2 + $0x54] sm:$0x1] }
  0x88   : > { %5338 = vmatprep.mubr.bf16.mxu0 %v500_v37  ;;  %5354 = vmatprep.mubr.bf16.mxu1 %v508_v38  ;;  %v446_v36 = vsel %vm6562_vm4, 0, %v445_v35  ;;  %v374_v37 = vld [vmem:[#allocation2 + $0x48] sm:$0x1]  ;;  %v381_v54 = vsel %vm6550_vm3, 0, %v380_v53  ;;  %v404_v55 = vld [vmem:[#allocation2 + $0xc0] sm:$0x1] }
  0x89   : > { %447 = vst [vmem:[#allocation2 + $0x8c] sm:$0x1] %v446_v36  ;;  %v398_v38 = vld [vmem:[#allocation2 + $0xa8] sm:$0x1]  ;;  %v375_v39 = vsel %vm6550_vm3, 0, %v374_v37  ;;  %v405_v56 = vsel %vm6550_vm3, 0, %v404_v55 }
  0x8a   : > { %v399_v40 = vsel %vm6550_vm3, 0, %v398_v38  ;;  %376 = vst [vmem:[#allocation2 + $0x48] sm:$0x1] %v375_v39  ;;  %382 = vst [vmem:[#allocation2 + $0x60] sm:$0x1] %v381_v54 }
  0x8b   : > { %400 = vst [vmem:[#allocation2 + $0xa8] sm:$0x1] %v399_v40  ;;  %406 = vst [vmem:[#allocation2 + $0xc0] sm:$0x1] %v405_v56  ;;  %v401_v58 = vld [vmem:[#allocation2 + $0xb4] sm:$0x1] }
  0x8c   : > { %v460_v63 = vld [vmem:[#allocation2 + $0xc8] sm:$0x1]  ;;  %v433_v7 = vld [vmem:[#allocation2 + $0x5c] sm:$0x1] }
  0x8d   : > { %v461_v1 = vsel %vm6562_vm4, 0, %v460_v63  ;;  %v434_v10 = vsel %vm6562_vm4, 0, %v433_v7  ;;  %v457_v15 = vld [vmem:[#allocation2 + $0xbc] sm:$0x1] }
  0x8e   : > { %462 = vst [vmem:[#allocation2 + $0xc8] sm:$0x1] %v461_v1  ;;  %435 = vst [vmem:[#allocation2 + $0x5c] sm:$0x1] %v434_v10  ;;  %v458_v19 = vsel %vm6562_vm4, 0, %v457_v15 }
  0x8f   : > { %5339 = vmatmul.mubr.bf16.gmra.mxu0 %v501_v47  ;;  %5355 = vmatmul.mubr.bf16.gmra.mxu1 %v509_v48  ;;  %v431_v47 = vsel %vm6562_vm4, 0, %v430_v45  ;;  %v455_v48 = vsel %vm6562_vm4, 0, %v454_v46  ;;  %459 = vst [vmem:[#allocation2 + $0xbc] sm:$0x1] %v458_v19 }
  0x90   : > { %5342 = vmatprep.mubr.bf16.mxu0 %v502_v49  ;;  %5358 = vmatprep.mubr.bf16.mxu1 %v510_v50  ;;  %432 = vst [vmem:[#allocation2 + $0x50] sm:$0x1] %v431_v47  ;;  %456 = vst [vmem:[#allocation2 + $0xb0] sm:$0x1] %v455_v48  ;;  %v427_v49 = vld [vmem:[#allocation2 + $0x44] sm:$0x1] }
  0x91   : > { %v451_v50 = vld [vmem:[#allocation2 + $0xa4] sm:$0x1]  ;;  %v428_v51 = vsel %vm6562_vm4, 0, %v427_v49 }
  0x92   : > { %v452_v52 = vsel %vm6562_vm4, 0, %v451_v50  ;;  %429 = vst [vmem:[#allocation2 + $0x44] sm:$0x1] %v428_v51 }
  0x93   : > { %453 = vst [vmem:[#allocation2 + $0xa4] sm:$0x1] %v452_v52 }
  0x97   : > { %5343 = vmatmul.mubr.bf16.gmra.mxu0 %v503_v59  ;;  %5359 = vmatmul.mubr.bf16.gmra.mxu1 %v511_v60  ;;  %v378_v59 = vsel %vm6550_vm3, 0, %v377_v57  ;;  %v402_v60 = vsel %vm6550_vm3, 0, %v401_v58 }
  0x98   : > { %5346 = vmatprep.mubr.bf16.mxu0 %v504_v61  ;;  %5362 = vmatprep.mubr.bf16.mxu1 %v512_v62  ;;  %379 = vst [vmem:[#allocation2 + $0x54] sm:$0x1] %v378_v59  ;;  %403 = vst [vmem:[#allocation2 + $0xb4] sm:$0x1] %v402_v60  ;;  %v6655_v61 = vld [vmem:[%s7978_s2] ss:$0 sm:$0xff] }
  0x99   : > { %v436_v62 = vld [vmem:[#allocation2 + $0x68] sm:$0x1] }
  0x9a   : > { %v437_v0 = vsel %vm6562_vm4, 0, %v436_v62 }
  0x9b   : > { %438 = vst [vmem:[#allocation2 + $0x68] sm:$0x1] %v437_v0 }
  0x9f   : > { %5347 = vmatmul.mubr.bf16.gmra.mxu0 %v505_v3  ;;  %5363 = vmatmul.mubr.bf16.gmra.mxu1 %v513_v4  ;;  %v6664_v3 = vld [vmem:[%s7979_s3] ss:$0 sm:$0xff] }
 0x147   : > { %v5336_v2 = vpop.f32.mrf.mxu0  ;;  %v5352_v4 = vpop.f32.mrf.mxu1 }
 0x148   : > { %v748_v5 = vmul.f32 %v5336_v2, %v6655_v61  ;;  %v764_v6 = vmul.f32 %v5352_v4, %v6655_v61 }
 0x149   : > { %v612_v8 = vpop.f32.mrf.mxu0  ;;  %v676_v9 = vpop.f32.mrf.mxu1 }
 0x14a   : > { %v6671_v11 = vadd.f32 %v6664_v3, %v748_v5  ;;  %v6674_v12 = vadd.f32 %v6664_v3, %v764_v6  ;;  %v746_v13 = vmul.f32 %v6655_v61, %v612_v8  ;;  %v762_v14 = vmul.f32 %v6655_v61, %v676_v9 }
 0x14b   : > { %v5337_v16 = vpop.f32.mrf.mxu0  ;;  %v5353_v17 = vpop.f32.mrf.mxu1 }
 0x14c   : > { %v819_v20 = vsub.f32 0.0, %v6671_v11  ;;  %v835_v21 = vsub.f32 0.0, %v6674_v12  ;;  %v6683_v22 = vadd.f32 %v6664_v3, %v746_v13  ;;  %v6686_v24 = vadd.f32 %v6664_v3, %v762_v14 }
 0x14d   : > { %v749_v25 = vmul.f32 %v5337_v16, %v6655_v61  ;;  %v765_v26 = vmul.f32 %v5353_v17, %v6655_v61  ;;  %v615_v27 = vpop.f32.mrf.mxu0  ;;  %v679_v28 = vpop.f32.mrf.mxu1 }
 0x14e   : > { %v853_v29 = vmul.f32 1.442695, %v819_v20  ;;  %v885_v23 = vmul.f32 1.442695, %v835_v21  ;;  %v817_v30 = vsub.f32 0.0, %v6683_v22  ;;  %v833_v31 = vsub.f32 0.0, %v6686_v24 }
 0x14f   : > { %v6693_v32 = vadd.f32 %v6664_v3, %v749_v25  ;;  %v6696_v33 = vadd.f32 %v6664_v3, %v765_v26  ;;  %v747_v34 = vmul.f32 %v6655_v61, %v615_v27  ;;  %v763_v35 = vmul.f32 %v6655_v61, %v679_v28  ;;  %v5340_v36 = vpop.f32.mrf.mxu0  ;;  %v5356_v37 = vpop.f32.mrf.mxu1 }
 0x150   : > { %5824 = vpow2.f32 %v853_v29  ;;  %v849_v38 = vmul.f32 1.442695, %v817_v30  ;;  %v881_v39 = vmul.f32 1.442695, %v833_v31  ;;  %v752_v40 = vmul.f32 %v5340_v36, %v6655_v61 }
 0x151   : > { %5826 = vpow2.f32 %v885_v23  ;;  %v820_v41 = vsub.f32 0.0, %v6693_v32  ;;  %v836_v42 = vsub.f32 0.0, %v6696_v33  ;;  %v6704_v43 = vadd.f32 %v6664_v3, %v747_v34  ;;  %v628_v44 = vpop.f32.mrf.mxu0  ;;  %v692_v45 = vpop.f32.mrf.mxu1 }
 0x152   : > { %5828 = vpow2.f32 %v849_v38  ;;  %v6707_v46 = vadd.f32 %v6664_v3, %v763_v35  ;;  %v6710_v47 = vadd.f32 %v6664_v3, %v752_v40  ;;  %v768_v48 = vmul.f32 %v5356_v37, %v6655_v61 }
 0x153   : > { %5830 = vpow2.f32 %v881_v39  ;;  %v855_v49 = vmul.f32 1.442695, %v820_v41  ;;  %v887_v50 = vmul.f32 1.442695, %v836_v42  ;;  %v818_v51 = vsub.f32 0.0, %v6704_v43  ;;  %v5341_v52 = vpop.f32.mrf.mxu0  ;;  %v5357_v53 = vpop.f32.mrf.mxu1 }
 0x154   : > { %v834_v54 = vsub.f32 0.0, %v6707_v46  ;;  %v823_v55 = vsub.f32 0.0, %v6710_v47  ;;  %v6717_v56 = vadd.f32 %v6664_v3, %v768_v48  ;;  %v750_v57 = vmul.f32 %v6655_v61, %v628_v44 }
 0x155   : > { %5832 = vpow2.f32 %v855_v49  ;;  %v851_v58 = vmul.f32 1.442695, %v818_v51  ;;  %v766_v59 = vmul.f32 %v6655_v61, %v692_v45  ;;  %v753_v60 = vmul.f32 %v5341_v52, %v6655_v61  ;;  %v631_v62 = vpop.f32.mrf.mxu0  ;;  %v695_v63 = vpop.f32.mrf.mxu1 }
 0x156   : > { %5834 = vpow2.f32 %v887_v50  ;;  %v883_v0 = vmul.f32 1.442695, %v834_v54  ;;  %v861_v1 = vmul.f32 1.442695, %v823_v55  ;;  %v839_v2 = vsub.f32 0.0, %v6717_v56 }
 0x157   : > { %5836 = vpow2.f32 %v851_v58  ;;  %v6724_v4 = vadd.f32 %v6664_v3, %v750_v57  ;;  %v6727_v5 = vadd.f32 %v6664_v3, %v766_v59  ;;  %v6730_v6 = vadd.f32 %v6664_v3, %v753_v60  ;;  %v5344_v10 = vpop.f32.mrf.mxu0  ;;  %v5360_v13 = vpop.f32.mrf.mxu1 }
 0x158   : > { %5838 = vpow2.f32 %v883_v0  ;;  %v893_v7 = vmul.f32 1.442695, %v839_v2  ;;  %v769_v8 = vmul.f32 %v5357_v53, %v6655_v61  ;;  %v751_v9 = vmul.f32 %v6655_v61, %v631_v62 }
 0x159   : > { %5840 = vpow2.f32 %v861_v1  ;;  %v821_v14 = vsub.f32 0.0, %v6724_v4  ;;  %v837_v15 = vsub.f32 0.0, %v6727_v5  ;;  %v824_v16 = vsub.f32 0.0, %v6730_v6  ;;  %v644_v28 = vpop.f32.mrf.mxu0  ;;  %v708_v29 = vpop.f32.mrf.mxu1 }
 0x15a   : > { %5842 = vpow2.f32 %v893_v7  ;;  %v6738_v17 = vadd.f32 %v6664_v3, %v769_v8  ;;  %v6741_v19 = vadd.f32 %v6664_v3, %v751_v9  ;;  %v767_v20 = vmul.f32 %v6655_v61, %v695_v63 }
 0x15b   : > { %v857_v21 = vmul.f32 1.442695, %v821_v14  ;;  %v889_v25 = vmul.f32 1.442695, %v837_v15  ;;  %v863_v26 = vmul.f32 1.442695, %v824_v16  ;;  %v756_v30 = vmul.f32 %v5344_v10, %v6655_v61  ;;  %v5345_v45 = vpop.f32.mrf.mxu0  ;;  %v5361_v48 = vpop.f32.mrf.mxu1 }
 0x15c   : > { %v840_v27 = vsub.f32 0.0, %v6738_v17  ;;  %v822_v35 = vsub.f32 0.0, %v6741_v19  ;;  %v6748_v36 = vadd.f32 %v6664_v3, %v767_v20  ;;  %v772_v39 = vmul.f32 %v5360_v13, %v6655_v61 }
 0x15d   : > { %v5825_v23 = vpop.eup %5824  ;;  %5844 = vpow2.f32 %v857_v21  ;;  %v754_v44 = vmul.f32 %v6655_v61, %v644_v28  ;;  %v6753_v50 = vadd.f32 %v6664_v3, %v756_v30  ;;  %v770_v51 = vmul.f32 %v6655_v61, %v708_v29  ;;  %v647_v1 = vpop.f32.mrf.mxu0 }
 0x15e   : > { %v5827_v31 = vpop.eup %5826  ;;  %v915_v34 = vadd.f32 1.0, %v5825_v23  ;;  %5846 = vpow2.f32 %v889_v25  ;;  %v895_v42 = vmul.f32 1.442695, %v840_v27  ;;  %v859_v53 = vmul.f32 1.442695, %v822_v35  ;;  %v711_v23 = vpop.f32.mrf.mxu1 }
 0x15f   : > { %v5829_v37 = vpop.eup %5828  ;;  %v931_v38 = vadd.f32 1.0, %v5827_v31  ;;  %5848 = vpow2.f32 %v863_v26  ;;  %v838_v54 = vsub.f32 0.0, %v6748_v36  ;;  %v757_v58 = vmul.f32 %v5345_v45, %v6655_v61 }
 0x160   : > { %v5831_v40 = vpop.eup %5830  ;;  %5850 = vrcp.f32 %v915_v34  ;;  %v913_v41 = vadd.f32 1.0, %v5829_v37  ;;  %v773_v59 = vmul.f32 %v5361_v48, %v6655_v61  ;;  %v6760_v63 = vadd.f32 %v6664_v3, %v772_v39 }
 0x161   : > { %5852 = vrcp.f32 %v931_v38  ;;  %v929_v49 = vadd.f32 1.0, %v5831_v40  ;;  %v6763_v0 = vadd.f32 %v6664_v3, %v754_v44  ;;  %v827_v8 = vsub.f32 0.0, %v6753_v50  ;;  %v5348_v40 = vpop.f32.mrf.mxu0 }
 0x162   : > { %v5833_v52 = vpop.eup %5832  ;;  %5854 = vrcp.f32 %v913_v41  ;;  %v6767_v9 = vadd.f32 %v6664_v3, %v770_v51  ;;  %v891_v14 = vmul.f32 1.442695, %v838_v54  ;;  %v6770_v15 = vadd.f32 %v6664_v3, %v757_v58 }
 0x163   : > { %v5835_v55 = vpop.eup %5834  ;;  %5856 = vrcp.f32 %v929_v49  ;;  %v916_v57 = vadd.f32 1.0, %v5833_v52  ;;  %v6773_v21 = vadd.f32 %v6664_v3, %v773_v59  ;;  %v755_v25 = vmul.f32 %v6655_v61, %v647_v1 }
 0x164   : > { %v5837_v60 = vpop.eup %5836  ;;  %v932_v62 = vadd.f32 1.0, %v5835_v55  ;;  %5858 = vpow2.f32 %v895_v42  ;;  %v843_v27 = vsub.f32 0.0, %v6760_v63  ;;  %v825_v28 = vsub.f32 0.0, %v6763_v0 }
 0x165   : > { %v5839_v2 = vpop.eup %5838  ;;  %5860 = vrcp.f32 %v916_v57  ;;  %v914_v7 = vadd.f32 1.0, %v5837_v60  ;;  %v841_v29 = vsub.f32 0.0, %v6767_v9  ;;  %v869_v31 = vmul.f32 1.442695, %v827_v8 }
 0x166   : > { %v5841_v10 = vpop.eup %5840  ;;  %5862 = vrcp.f32 %v932_v62  ;;  %v930_v13 = vadd.f32 1.0, %v5839_v2  ;;  %v828_v34 = vsub.f32 0.0, %v6770_v15  ;;  %v844_v38 = vsub.f32 0.0, %v6773_v21 }
 0x167   : > { %v5843_v16 = vpop.eup %5842  ;;  %5864 = vrcp.f32 %v914_v7  ;;  %v919_v20 = vadd.f32 1.0, %v5841_v10  ;;  %v6782_v39 = vadd.f32 %v6664_v3, %v755_v25  ;;  %v901_v44 = vmul.f32 1.442695, %v843_v27 }
 0x168   : > { %5866 = vrcp.f32 %v930_v13  ;;  %v935_v26 = vadd.f32 1.0, %v5843_v16  ;;  %v6784_v45 = vmul.f32 1.442695, %v825_v28  ;;  %v6786_v51 = vmul.f32 1.442695, %v841_v29 }
 0x169   : > { %5868 = vrcp.f32 %v919_v20  ;;  %v771_v52 = vmul.f32 %v6655_v61, %v711_v23  ;;  %v6790_v57 = vmul.f32 1.442695, %v828_v34  ;;  %v6793_v58 = vmul.f32 %v5348_v40, %v6655_v61 }
 0x16a   : > { %v5845_v30 = vpop.eup %5844  ;;  %5870 = vrcp.f32 %v935_v26  ;;  %v6796_v62 = vmul.f32 1.442695, %v844_v38  ;;  %v826_v1 = vsub.f32 0.0, %v6782_v39 }
 0x16b   : > { %v5847_v35 = vpop.eup %5846  ;;  %v917_v37 = vadd.f32 1.0, %v5845_v30  ;;  %5872 = vpow2.f32 %v859_v53  ;;  %v5364_v53 = vpop.f32.mrf.mxu1 }
 0x16c   : > { %v5849_v41 = vpop.eup %5848  ;;  %v933_v42 = vadd.f32 1.0, %v5847_v35  ;;  %5874 = vpow2.f32 %v891_v14 }
 0x16d   : > { %v5851_v48 = vpop.eup %5850  ;;  %5876 = vrcp.f32 %v917_v37  ;;  %v920_v49 = vadd.f32 1.0, %v5849_v41  ;;  %v1469_v41 = vld [vmem:[#allocation2 + $0x18] sm:$0xf] }
 0x16e   : > { %v5853_v54 = vpop.eup %5852  ;;  %v1011_v55 = vmul.f32 %v5851_v48, %v6671_v11  ;;  %5878 = vrcp.f32 %v933_v42  ;;  %v6801_v11 = vmul.f32 %v5364_v53, %v6655_v61 }
 0x16f   : > { %v5855_v59 = vpop.eup %5854  ;;  %v1027_v60 = vmul.f32 %v5853_v54, %v6674_v12  ;;  %5880 = vrcp.f32 %v920_v49  ;;  %v6805_v12 = vadd.f32 %v6664_v3, %v771_v52  ;;  %v1525_v54 = vld [vmem:[#allocation2 + $0x78] sm:$0xf] }
 0x170   : > { %v5857_v2 = vpop.eup %5856  ;;  %v5117_v7 = vpack.c.bf16 %v1011_v55, %v1011_v55  ;;  %v1009_v8 = vmul.f32 %v5855_v59, %v6683_v22  ;;  %5882 = vpow2.f32 %v869_v31 }
 0x171   : > { %v5859_v10 = vpop.eup %5858  ;;  %v5133_v13 = vpack.c.bf16 %v1027_v60, %v1027_v60  ;;  %v1025_v14 = vmul.f32 %v5857_v2, %v6686_v24  ;;  %5884 = vpow2.f32 %v901_v44 }
 0x172   : > { %v5861_v16 = vpop.eup %5860  ;;  %v1157_v20 = vshrl.u32 %v5117_v7, 16  ;;  %v1160_v25 = vshll.u32 %v5117_v7, 16  ;;  %v5115_v26 = vpack.c.bf16 %v1009_v8, %v1009_v8  ;;  %v6807_v27 = vadd.f32 1.0, %v5859_v10  ;;  %v1462_v7 = vld [vmem:[#allocation2 + $0xc] sm:$0xf] }
 0x173   : > { %v5863_v28 = vpop.eup %5862  ;;  %v1293_v22 = vshrl.u32 %v5133_v13, 16  ;;  %v1296_v29 = vshll.u32 %v5133_v13, 16  ;;  %v5131_v23 = vpack.c.bf16 %v1025_v14, %v1025_v14  ;;  %v1012_v30 = vmul.f32 %v5861_v16, %v6693_v32 }
 0x174   : > { %v5865_v31 = vpop.eup %5864  ;;  %v1159_v34 = vrot.slane %v1157_v20, 7  ;;  %v1140_v35 = vshrl.u32 %v5115_v26, 16  ;;  %v1143_v24 = vshll.u32 %v5115_v26, 16  ;;  %v1028_v37 = vmul.f32 %v5863_v28, %v6696_v33 }
 0x175   : > { %v5867_v38 = vpop.eup %5866  ;;  %v6817_v42 = vrot.slane %v1293_v22, 7  ;;  %v1276_v44 = vshrl.u32 %v5131_v23, 16  ;;  %v1279_v48 = vshll.u32 %v5131_v23, 16  ;;  %v5118_v49 = vpack.c.bf16 %v1012_v30, %v1012_v30 }
 0x176   : > { %v5869_v32 = vpop.eup %5868  ;;  %v1162_v52 = vor.u32 %v1160_v25, %v1159_v34  ;;  %v1163_v53 = vrot.slane %v1159_v34, 4  ;;  %v6819_v55 = vrot.slane %v1140_v35, 7  ;;  %v5134_v33 = vpack.c.bf16 %v1028_v37, %v1028_v37  ;;  %v1518_v25 = vld [vmem:[#allocation2 + $0x6c] sm:$0xf]  ;;  %v1473_v37 = vld [vmem:[#allocation2 + $0x20] sm:$0x1] }
 0x177   : > { %v5871_v59 = vpop.eup %5870  ;;  %v1298_v60 = vor.u32 %v1296_v29, %v6817_v42  ;;  %v1299_v2 = vrot.slane %v6817_v42, 4  ;;  %v6823_v8 = vrot.slane %v1276_v44, 7  ;;  %v1165_v10 = vshrl.u32 %v5118_v49, 16 }
 0x178   : > { %v6825_v13 = vpop.eup %5872  ;;  %v1470_v14 = vsel %vm6813_vm7, %v1162_v52, %v1469_v41  ;;  %v1145_v16 = vor.u32 %v1143_v24, %v6819_v55  ;;  %v1146_v20 = vrot.slane %v6819_v55, 4  ;;  %v1168_v26 = vshll.u32 %v5118_v49, 16 }
 0x179   : > { %v6831_v28 = vpop.eup %5874  ;;  %1471 = vst [vmem:[#allocation2 + $0x18] sm:$0xf] %v1470_v14  ;;  %v1526_v22 = vsel %vm6813_vm7, %v1298_v60, %v1525_v54  ;;  %v1281_v29 = vor.u32 %v1279_v48, %v6823_v8  ;;  %v1282_v23 = vrot.slane %v6823_v8, 4  ;;  %v1167_v30 = vrot.slane %v1165_v10, 7 }
 0x17a   : > { %v5877_v34 = vpop.eup %5876  ;;  %1527 = vst [vmem:[#allocation2 + $0x78] sm:$0xf] %v1526_v22  ;;  %v1463_v35 = vsel %vm6813_vm7, %v1145_v16, %v1462_v7  ;;  %v1301_v41 = vshrl.u32 %v5134_v33, 16  ;;  %v1304_v42 = vshll.u32 %v5134_v33, 16  ;;  %v1010_v44 = vmul.f32 %v5865_v31, %v6704_v43 }
 0x17b   : > { %v6846_v48 = vpop.eup %5878  ;;  %1464 = vst [vmem:[#allocation2 + $0xc] sm:$0xf] %v1463_v35  ;;  %v1519_v49 = vsel %vm6813_vm7, %v1281_v29, %v1518_v25  ;;  %v1170_v52 = vor.u32 %v1168_v26, %v1167_v30  ;;  %v1172_v54 = vrot.slane %v1167_v30, 4  ;;  %v1026_v60 = vmul.f32 %v5867_v38, %v6707_v46  ;;  %v1529_v26 = vld [vmem:[#allocation2 + $0x80] sm:$0x1] }
 0x17c   : > { %v6851_v7 = vpop.eup %5880  ;;  %1520 = vst [vmem:[#allocation2 + $0x6c] sm:$0xf] %v1519_v49  ;;  %v1303_v10 = vrot.slane %v1301_v41, 7  ;;  %v5116_v14 = vpack.c.bf16 %v1010_v44, %v1010_v44  ;;  %v1015_v16 = vmul.f32 %v5869_v32, %v6710_v47  ;;  %v1031_v33 = vmul.f32 %v5871_v59, %v6717_v56 }
 0x17d   : > { %v6855_v43 = vpop.eup %5882  ;;  %v1171_v31 = vsel %vm6841_vm8, %v1163_v53, %v1170_v52  ;;  %v1474_v25 = vsel %vm6550_vm3, %v1172_v54, %v1473_v37  ;;  %v5132_v22 = vpack.c.bf16 %v1026_v60, %v1026_v60  ;;  %v1013_v46 = vmul.f32 %v5877_v34, %v6724_v4  ;;  %v1466_v34 = vld [vmem:[#allocation2 + $0x14] sm:$0x1] }
 0x17e   : > { %v6862_v38 = vpop.eup %5884  ;;  %1472 = vst [vmem:[#allocation2 + $0x1c] sm:$0xf] %v1171_v31  ;;  %1475 = vst [vmem:[#allocation2 + $0x20] sm:$0x1] %v1474_v25  ;;  %v1306_v29 = vor.u32 %v1304_v42, %v1303_v10  ;;  %v1308_v47 = vrot.slane %v1303_v10, 4  ;;  %v1148_v32 = vshrl.u32 %v5116_v14, 16  ;;  %v5121_v35 = vpack.c.bf16 %v1015_v16, %v1015_v16 }
 0x17f   : > { %v1151_v56 = vshll.u32 %v5116_v14, 16  ;;  %v1284_v59 = vshrl.u32 %v5132_v22, 16  ;;  %v1287_v30 = vshll.u32 %v5132_v22, 16  ;;  %v5137_v41 = vpack.c.bf16 %v1031_v33, %v1031_v33  ;;  %v1522_v14 = vld [vmem:[#allocation2 + $0x74] sm:$0x1] }
 0x180   : > { %v1307_v53 = vsel %vm6841_vm8, %v1299_v2, %v1306_v29  ;;  %v1530_v37 = vsel %vm6550_vm3, %v1308_v47, %v1529_v26  ;;  %v1150_v44 = vrot.slane %v1148_v32, 7  ;;  %v5119_v4 = vpack.c.bf16 %v1013_v46, %v1013_v46  ;;  %v660_v26 = vpop.f32.mrf.mxu0  ;;  %v1483_v47 = vld [vmem:[#allocation2 + $0x30] sm:$0xf] }
 0x181   : > { %1528 = vst [vmem:[#allocation2 + $0x7c] sm:$0xf] %v1307_v53  ;;  %1531 = vst [vmem:[#allocation2 + $0x80] sm:$0x1] %v1530_v37  ;;  %v1286_v49 = vrot.slane %v1284_v59, 7  ;;  %v1191_v42 = vshrl.u32 %v5121_v35, 16  ;;  %v758_v37 = vmul.f32 %v6655_v61, %v660_v26  ;;  %5886 = vrcp.f32 %v6807_v27 }
 0x182   : > { %v1194_v52 = vshll.u32 %v5121_v35, 16  ;;  %v1327_v54 = vshrl.u32 %v5137_v41, 16  ;;  %v1153_v60 = vor.u32 %v1151_v56, %v1150_v44  ;;  %v1155_v10 = vrot.slane %v1150_v44, 4  ;;  %v1476_v35 = vld [vmem:[#allocation2 + $0x24] sm:$0xf]  ;;  %v724_v44 = vpop.f32.mrf.mxu1 }
 0x183   : > { %v1330_v16 = vshll.u32 %v5137_v41, 16  ;;  %v1174_v33 = vshrl.u32 %v5119_v4, 16  ;;  %v1289_v31 = vor.u32 %v1287_v30, %v1286_v49  ;;  %v1291_v25 = vrot.slane %v1286_v49, 4  ;;  %v5349_v49 = vpop.f32.mrf.mxu0 }
 0x184   : > { %v6868_v2 = vrot.slane %v1191_v42, 7  ;;  %v6870_v22 = vrot.slane %v1327_v54, 7  ;;  %v1154_v46 = vsel %vm6841_vm8, %v1146_v20, %v1153_v60  ;;  %v1467_v29 = vsel %vm6550_vm3, %v1155_v10, %v1466_v34  ;;  %v1539_v20 = vld [vmem:[#allocation2 + $0x90] sm:$0xf] }
 0x185   : > { %v6878_v32 = vrot.slane %v1174_v33, 7  ;;  %v1177_v56 = vshll.u32 %v5119_v4, 16  ;;  %1465 = vst [vmem:[#allocation2 + $0x10] sm:$0xf] %v1154_v46  ;;  %1468 = vst [vmem:[#allocation2 + $0x14] sm:$0x1] %v1467_v29  ;;  %v1290_v59 = vsel %vm6841_vm8, %v1282_v23, %v1289_v31  ;;  %v1523_v55 = vsel %vm6550_vm3, %v1291_v25, %v1522_v14  ;;  %v663_v31 = vpop.f32.mrf.mxu0 }
 0x186   : > { %v1196_v30 = vor.u32 %v1194_v52, %v6868_v2  ;;  %v6889_v41 = vadd.f32 %v6664_v3, %v6793_v58  ;;  %1521 = vst [vmem:[#allocation2 + $0x70] sm:$0xf] %v1290_v59  ;;  %1524 = vst [vmem:[#allocation2 + $0x74] sm:$0x1] %v1523_v55  ;;  %v1332_v53 = vor.u32 %v1330_v16, %v6870_v22  ;;  %v6895_v23 = vmul.f32 1.442695, %v826_v1 }
 0x187   : > { %v1179_v8 = vor.u32 %v1177_v56, %v6878_v32  ;;  %v1029_v58 = vmul.f32 %v6846_v48, %v6727_v5  ;;  %v1016_v34 = vmul.f32 %v6851_v7, %v6730_v6  ;;  %v918_v52 = vadd.f32 1.0, %v6825_v13  ;;  %v5365_v13 = vpop.f32.mrf.mxu1  ;;  %v1487_v56 = vld [vmem:[#allocation2 + $0x38] sm:$0x1] }
 0x188   : > { %v1484_v4 = vsel %vm6813_vm7, %v1196_v30, %v1483_v47  ;;  %v1540_v1 = vsel %vm6813_vm7, %v1332_v53, %v1539_v20  ;;  %v934_v54 = vadd.f32 1.0, %v6831_v28  ;;  %v923_v6 = vadd.f32 1.0, %v6855_v43  ;;  %v1532_v47 = vld [vmem:[#allocation2 + $0x84] sm:$0xf] }
 0x189   : > { %1485 = vst [vmem:[#allocation2 + $0x30] sm:$0xf] %v1484_v4  ;;  %v1477_v42 = vsel %vm6813_vm7, %v1179_v8, %v1476_v35  ;;  %1541 = vst [vmem:[#allocation2 + $0x90] sm:$0xf] %v1540_v1  ;;  %v5135_v5 = vpack.c.bf16 %v1029_v58, %v1029_v58  ;;  %v5122_v48 = vpack.c.bf16 %v1016_v34, %v1016_v34  ;;  %5888 = vrcp.f32 %v918_v52 }
 0x18a   : > { %1478 = vst [vmem:[#allocation2 + $0x24] sm:$0xf] %v1477_v42  ;;  %v6914_v27 = vadd.f32 %v6664_v3, %v6801_v11  ;;  %v939_v7 = vadd.f32 1.0, %v6862_v38  ;;  %v842_v60 = vsub.f32 0.0, %v6805_v12  ;;  %v774_v10 = vmul.f32 %v6655_v61, %v724_v44 }
 0x18b   : > { %v1310_v14 = vshrl.u32 %v5135_v5, 16  ;;  %v1199_v28 = vshrl.u32 %v5122_v48, 16  ;;  %v831_v16 = vsub.f32 0.0, %v6889_v41  ;;  %v761_v33 = vmul.f32 %v5349_v49, %v6655_v61 }
 0x18c   : > { %v1313_v43 = vshll.u32 %v5135_v5, 16  ;;  %v1202_v25 = vshll.u32 %v5122_v48, 16  ;;  %5890 = vrcp.f32 %v934_v54  ;;  %v6922_v11 = vadd.f32 %v6664_v3, %v758_v37 }
 0x18d   : > { %v6924_v26 = vrot.slane %v1310_v14, 7  ;;  %v1201_v38 = vrot.slane %v1199_v28, 7  ;;  %5892 = vrcp.f32 %v923_v6  ;;  %v777_v46 = vmul.f32 %v5365_v13, %v6655_v61 }
 0x18e   : > { %v1197_v29 = vrot.slane %v6868_v2, 4  ;;  %5894 = vrcp.f32 %v939_v7  ;;  %v6929_v59 = vadd.f32 %v6664_v3, %v774_v10  ;;  %v759_v55 = vmul.f32 %v6655_v61, %v663_v31  ;;  %v5887_v52 = vpop.eup %5886 }
 0x18f   : > { %v1315_v30 = vor.u32 %v1313_v43, %v6924_v26  ;;  %v1204_v20 = vor.u32 %v1202_v25, %v1201_v38  ;;  %v1206_v35 = vrot.slane %v1201_v38, 4  ;;  %v6934_v53 = vadd.f32 %v6664_v3, %v761_v33 }
 0x190   : > { %5896 = vpow2.f32 %v6784_v45  ;;  %v847_v8 = vsub.f32 0.0, %v6914_v27  ;;  %v829_v2 = vsub.f32 0.0, %v6922_v11  ;;  %v6940_v37 = vadd.f32 %v6664_v3, %v777_v46 }
 0x191   : > { %v1533_v44 = vsel %vm6813_vm7, %v1315_v30, %v1532_v47  ;;  %v1205_v4 = vsel %vm6841_vm8, %v1197_v29, %v1204_v20  ;;  %v1488_v58 = vsel %vm6550_vm3, %v1206_v35, %v1487_v56  ;;  %5898 = vpow2.f32 %v6786_v51  ;;  %v1543_v29 = vld [vmem:[#allocation2 + $0x98] sm:$0x1] }
 0x192   : > { %1534 = vst [vmem:[#allocation2 + $0x84] sm:$0xf] %v1533_v44  ;;  %1486 = vst [vmem:[#allocation2 + $0x34] sm:$0xf] %v1205_v4  ;;  %v899_v45 = vmul.f32 1.442695, %v842_v60  ;;  %v6951_v49 = vadd.f32 %v6664_v3, %v759_v55  ;;  %5900 = vpow2.f32 %v6790_v57  ;;  %v1032_v5 = vmul.f32 %v5887_v52, %v6738_v17 }
 0x193   : > { %1489 = vst [vmem:[#allocation2 + $0x38] sm:$0x1] %v1488_v58  ;;  %v845_v34 = vsub.f32 0.0, %v6929_v59  ;;  %v877_v1 = vmul.f32 1.442695, %v831_v16  ;;  %v832_v42 = vsub.f32 0.0, %v6934_v53  ;;  %5902 = vpow2.f32 %v6796_v62 }
 0x194   : > { %v909_v54 = vmul.f32 1.442695, %v847_v8  ;;  %v848_v51 = vsub.f32 0.0, %v6940_v37  ;;  %5904 = vpow2.f32 %v6895_v23  ;;  %v873_v48 = vmul.f32 1.442695, %v829_v2 }
 0x195   : > { %5906 = vpow2.f32 %v899_v45  ;;  %v905_v6 = vmul.f32 1.442695, %v845_v34  ;;  %v830_v7 = vsub.f32 0.0, %v6951_v49  ;;  %v5138_v57 = vpack.c.bf16 %v1032_v5, %v1032_v5  ;;  %v1480_v58 = vld [vmem:[#allocation2 + $0x2c] sm:$0x1] }
 0x196   : > { %v5889_v60 = vpop.eup %5888  ;;  %5908 = vpow2.f32 %v877_v1  ;;  %v879_v10 = vmul.f32 1.442695, %v832_v42  ;;  %v1333_v13 = vrot.slane %v6870_v22, 4  ;;  %v911_v14 = vmul.f32 1.442695, %v848_v51 }
 0x197   : > { %v1014_v62 = vmul.f32 %v5889_v60, %v6741_v19  ;;  %5910 = vpow2.f32 %v909_v54  ;;  %v1180_v17 = vrot.slane %v6878_v32, 4  ;;  %v1316_v23 = vrot.slane %v6924_v26, 4  ;;  %v1536_v5 = vld [vmem:[#allocation2 + $0x8c] sm:$0x1] }
 0x198   : > { %v1335_v16 = vshrl.u32 %v5138_v57, 16  ;;  %5912 = vpow2.f32 %v873_v48  ;;  %v875_v25 = vmul.f32 1.442695, %v830_v7  ;;  %v1338_v22 = vshll.u32 %v5138_v57, 16 }
 0x199   : > { %v5891_v28 = vpop.eup %5890  ;;  %v5120_v31 = vpack.c.bf16 %v1014_v62, %v1014_v62  ;;  %5914 = vpow2.f32 %v905_v6 }
 0x19a   : > { %v5893_v33 = vpop.eup %5892  ;;  %v1030_v43 = vmul.f32 %v5891_v28, %v6748_v36  ;;  %v1337_v46 = vrot.slane %v1335_v16, 7  ;;  %5916 = vpow2.f32 %v879_v10  ;;  %v1497_v28 = vld [vmem:[#allocation2 + $0x48] sm:$0xf]  ;;  %v727_v16 = vpop.f32.mrf.mxu1 }
 0x19b   : > { %v5895_v38 = vpop.eup %5894  ;;  %v1019_v19 = vmul.f32 %v5893_v33, %v6753_v50  ;;  %v1182_v47 = vshrl.u32 %v5120_v31, 16  ;;  %5918 = vpow2.f32 %v911_v14  ;;  %v1185_v20 = vshll.u32 %v5120_v31, 16 }
 0x19c   : > { %v5136_v56 = vpack.c.bf16 %v1030_v43, %v1030_v43  ;;  %v1035_v32 = vmul.f32 %v5895_v38, %v6760_v63  ;;  %v1340_v55 = vor.u32 %v1338_v22, %v1337_v46  ;;  %v1342_v30 = vrot.slane %v1337_v46, 4  ;;  %v1553_v22 = vld [vmem:[#allocation2 + $0xa8] sm:$0xf] }
 0x19d   : > { %v5897_v26 = vpop.eup %5896  ;;  %v5125_v35 = vpack.c.bf16 %v1019_v19, %v1019_v19  ;;  %v1184_v8 = vrot.slane %v1182_v47, 7  ;;  %5920 = vpow2.f32 %v875_v25 }
 0x19e   : > { %v5899_v36 = vpop.eup %5898  ;;  %v1318_v2 = vshrl.u32 %v5136_v56, 16  ;;  %v5141_v44 = vpack.c.bf16 %v1035_v32, %v1035_v32  ;;  %v1341_v50 = vsel %vm6841_vm8, %v1333_v13, %v1340_v55  ;;  %v1544_v4 = vsel %vm6550_vm3, %v1342_v30, %v1543_v29 }
 0x19f   : > { %v1321_v45 = vshll.u32 %v5136_v56, 16  ;;  %v1225_v63 = vshrl.u32 %v5125_v35, 16  ;;  %v5901_v34 = vpop.eup %5900  ;;  %1542 = vst [vmem:[#allocation2 + $0x94] sm:$0xf] %v1341_v50  ;;  %1545 = vst [vmem:[#allocation2 + $0x98] sm:$0x1] %v1544_v4  ;;  %v1187_v1 = vor.u32 %v1185_v20, %v1184_v8 }
 0x1a0   : > { %v1189_v42 = vrot.slane %v1184_v8, 4  ;;  %v1320_v52 = vrot.slane %v1318_v2, 7  ;;  %v1361_v54 = vshrl.u32 %v5141_v44, 16  ;;  %v5903_v51 = vpop.eup %5902  ;;  %v1228_v6 = vshll.u32 %v5125_v35, 16 }
 0x1a1   : > { %v6971_v48 = vrot.slane %v1225_v63, 7  ;;  %v921_v7 = vadd.f32 1.0, %v5897_v26  ;;  %v937_v60 = vadd.f32 1.0, %v5899_v36  ;;  %v5905_v57 = vpop.eup %5904  ;;  %v1188_v10 = vsel %vm6841_vm8, %v1180_v17, %v1187_v1 }
 0x1a2   : > { %v1481_v13 = vsel %vm6550_vm3, %v1189_v42, %v1480_v58  ;;  %v1323_v62 = vor.u32 %v1321_v45, %v1320_v52  ;;  %v1325_v14 = vrot.slane %v1320_v52, 4  ;;  %v5907_v33 = vpop.eup %5906  ;;  %1479 = vst [vmem:[#allocation2 + $0x28] sm:$0xf] %v1188_v10  ;;  %v6978_v43 = vrot.slane %v1361_v54, 7 }
 0x1a3   : > { %1482 = vst [vmem:[#allocation2 + $0x2c] sm:$0x1] %v1481_v13  ;;  %v1230_v31 = vor.u32 %v1228_v6, %v6971_v48  ;;  %v1364_v25 = vshll.u32 %v5141_v44, 16  ;;  %5922 = vrcp.f32 %v921_v7  ;;  %v5909_v38 = vpop.eup %5908  ;;  %v924_v19 = vadd.f32 1.0, %v5901_v34 }
 0x1a4   : > { %v1324_v17 = vsel %vm6841_vm8, %v1316_v23, %v1323_v62  ;;  %v1537_v46 = vsel %vm6550_vm3, %v1325_v14, %v1536_v5  ;;  %5924 = vrcp.f32 %v937_v60  ;;  %v5911_v29 = vpop.eup %5910  ;;  %v940_v32 = vadd.f32 1.0, %v5903_v51 }
 0x1a5   : > { %1535 = vst [vmem:[#allocation2 + $0x88] sm:$0xf] %v1324_v17  ;;  %1538 = vst [vmem:[#allocation2 + $0x8c] sm:$0x1] %v1537_v46  ;;  %v1498_v47 = vsel %vm6813_vm7, %v1230_v31, %v1497_v28  ;;  %v1366_v56 = vor.u32 %v1364_v25, %v6978_v43  ;;  %v775_v26 = vmul.f32 %v6655_v61, %v727_v16  ;;  %v5913_v55 = vpop.eup %5912  ;;  %5926 = vrcp.f32 %v924_v19 }
 0x1a6   : > { %1499 = vst [vmem:[#allocation2 + $0x48] sm:$0xf] %v1498_v47  ;;  %v922_v23 = vadd.f32 1.0, %v5905_v57  ;;  %v938_v30 = vadd.f32 1.0, %v5907_v33  ;;  %v5915_v20 = vpop.eup %5914  ;;  %5928 = vrcp.f32 %v940_v32  ;;  %v927_v2 = vadd.f32 1.0, %v5909_v38 }
 0x1a7   : > { %v1554_v35 = vsel %vm6813_vm7, %v1366_v56, %v1553_v22  ;;  %v5917_v36 = vpop.eup %5916  ;;  %v6991_v44 = vadd.f32 %v6664_v3, %v775_v26  ;;  %v943_v61 = vadd.f32 1.0, %v5911_v29  ;;  %v925_v4 = vadd.f32 1.0, %v5913_v55  ;;  %v1546_v47 = vld [vmem:[#allocation2 + $0x9c] sm:$0xf] }
 0x1a8   : > { %1555 = vst [vmem:[#allocation2 + $0xa8] sm:$0xf] %v1554_v35  ;;  %5930 = vrcp.f32 %v922_v23  ;;  %v5919_v8 = vpop.eup %5918  ;;  %v941_v58 = vadd.f32 1.0, %v5915_v20  ;;  %v928_v45 = vadd.f32 1.0, %v5917_v36  ;;  %v1231_v60 = vrot.slane %v6971_v48, 4 }
 0x1a9   : > { %5932 = vrcp.f32 %v938_v30  ;;  %v846_v63 = vsub.f32 0.0, %v6991_v44  ;;  %v944_v34 = vadd.f32 1.0, %v5919_v8  ;;  %v1367_v62 = vrot.slane %v6978_v43, 4  ;;  %v1501_v35 = vld [vmem:[#allocation2 + $0x50] sm:$0x1] }
 0x1aa   : > { %v5921_v50 = vpop.eup %5920  ;;  %5934 = vrcp.f32 %v927_v2 }
 0x1ab   : > { %5936 = vrcp.f32 %v943_v61  ;;  %v926_v42 = vadd.f32 1.0, %v5921_v50  ;;  %v907_v3 = vmul.f32 1.442695, %v846_v63 }
 0x1ac   : > { %5938 = vrcp.f32 %v925_v4 }
 0x1ad   : > { %5940 = vrcp.f32 %v941_v58 }
 0x1ae   : > { %5942 = vrcp.f32 %v928_v45  ;;  %v1557_v45 = vld [vmem:[#allocation2 + $0xb0] sm:$0x1] }
 0x1af   : > { %5944 = vrcp.f32 %v944_v34 }
 0x1b0   : > { %v5923_v1 = vpop.eup %5922  ;;  %5946 = vrcp.f32 %v926_v42 }
 0x1b1   : > { %v5925_v52 = vpop.eup %5924  ;;  %v1017_v54 = vmul.f32 %v5923_v1, %v6763_v0  ;;  %5948 = vpow2.f32 %v907_v3 }
 0x1b2   : > { %v1033_v51 = vmul.f32 %v5925_v52, %v6767_v9  ;;  %v5927_v5 = vpop.eup %5926  ;;  %v1494_v52 = vld [vmem:[#allocation2 + $0x44] sm:$0x1] }
 0x1b3   : > { %v5123_v6 = vpack.c.bf16 %v1017_v54, %v1017_v54  ;;  %v5929_v7 = vpop.eup %5928  ;;  %v1020_v10 = vmul.f32 %v5927_v5, %v6770_v15  ;;  %v1490_v15 = vld [vmem:[#allocation2 + $0x3c] sm:$0xf] }
 0x1b4   : > { %v5139_v57 = vpack.c.bf16 %v1033_v51, %v1033_v51  ;;  %v1036_v0 = vmul.f32 %v5929_v7, %v6773_v21 }
 0x1b5   : > { %v5931_v13 = vpop.eup %5930  ;;  %v1208_v14 = vshrl.u32 %v5123_v6, 16  ;;  %v1211_v16 = vshll.u32 %v5123_v6, 16  ;;  %v5126_v33 = vpack.c.bf16 %v1020_v10, %v1020_v10 }
 0x1b6   : > { %v5933_v28 = vpop.eup %5932  ;;  %v1344_v9 = vshrl.u32 %v5139_v57, 16  ;;  %v1018_v31 = vmul.f32 %v5931_v13, %v6782_v39  ;;  %v1347_v38 = vshll.u32 %v5139_v57, 16  ;;  %v5142_v48 = vpack.c.bf16 %v1036_v0, %v1036_v0 }
 0x1b7   : > { %v1210_v25 = vrot.slane %v1208_v14, 7  ;;  %v1034_v17 = vmul.f32 %v5933_v28, %v6805_v12  ;;  %v1233_v22 = vshrl.u32 %v5126_v33, 16  ;;  %v1236_v43 = vshll.u32 %v5126_v33, 16  ;;  %v5935_v26 = vpop.eup %5934 }
 0x1b8   : > { %v7002_v46 = vrot.slane %v1344_v9, 7  ;;  %v5124_v19 = vpack.c.bf16 %v1018_v31, %v1018_v31  ;;  %v1369_v56 = vshrl.u32 %v5142_v48, 16  ;;  %v1372_v32 = vshll.u32 %v5142_v48, 16  ;;  %v5937_v20 = vpop.eup %5936  ;;  %v1550_v9 = vld [vmem:[#allocation2 + $0xa4] sm:$0x1] }
 0x1b9   : > { %v1213_v29 = vor.u32 %v1211_v16, %v1210_v25  ;;  %v1214_v21 = vrot.slane %v1210_v25, 4  ;;  %v1235_v23 = vrot.slane %v1233_v22, 7  ;;  %v5140_v2 = vpack.c.bf16 %v1034_v17, %v1034_v17  ;;  %v5939_v61 = vpop.eup %5938 }
 0x1ba   : > { %v1349_v55 = vor.u32 %v1347_v38, %v7002_v46  ;;  %v1350_v39 = vrot.slane %v7002_v46, 4  ;;  %v1216_v30 = vshrl.u32 %v5124_v19, 16  ;;  %v1371_v36 = vrot.slane %v1369_v56, 7  ;;  %v5941_v34 = vpop.eup %5940 }
 0x1bb   : > { %v1491_v12 = vsel %vm6813_vm7, %v1213_v29, %v1490_v15  ;;  %v1219_v8 = vshll.u32 %v5124_v19, 16  ;;  %v1238_v4 = vor.u32 %v1236_v43, %v1235_v23  ;;  %v1240_v58 = vrot.slane %v1235_v23, 4  ;;  %v5943_v51 = vpop.eup %5942 }
 0x1bc   : > { %1492 = vst [vmem:[#allocation2 + $0x3c] sm:$0xf] %v1491_v12  ;;  %v1547_v50 = vsel %vm6813_vm7, %v1349_v55, %v1546_v47  ;;  %v1218_v63 = vrot.slane %v1216_v30, 7  ;;  %v1374_v1 = vor.u32 %v1372_v32, %v1371_v36  ;;  %v1376_v42 = vrot.slane %v1371_v36, 4  ;;  %v5945_v10 = vpop.eup %5944  ;;  %v1511_v55 = vld [vmem:[#allocation2 + $0x60] sm:$0xf] }
 0x1bd   : > { %1548 = vst [vmem:[#allocation2 + $0x9c] sm:$0xf] %v1547_v50  ;;  %v1352_v54 = vshrl.u32 %v5140_v2, 16  ;;  %v1355_v3 = vshll.u32 %v5140_v2, 16  ;;  %v1239_v5 = vsel %vm6841_vm8, %v1231_v60, %v1238_v4  ;;  %v1502_v6 = vsel %vm6550_vm3, %v1240_v58, %v1501_v35  ;;  %v1504_v12 = vld [vmem:[#allocation2 + $0x54] sm:$0xf] }
 0x1be   : > { %v1221_v7 = vor.u32 %v1219_v8, %v1218_v63  ;;  %v1223_v57 = vrot.slane %v1218_v63, 4  ;;  %1500 = vst [vmem:[#allocation2 + $0x4c] sm:$0xf] %v1239_v5  ;;  %1503 = vst [vmem:[#allocation2 + $0x50] sm:$0x1] %v1502_v6  ;;  %v1375_v13 = vsel %vm6841_vm8, %v1367_v62, %v1374_v1  ;;  %v1558_v14 = vsel %vm6550_vm3, %v1376_v42, %v1557_v45  ;;  %v5947_v62 = vpop.eup %5946 }
 0x1bf   : > { %v1354_v0 = vrot.slane %v1352_v54, 7  ;;  %v1023_v28 = vmul.f32 %v5935_v26, %v6889_v41  ;;  %1556 = vst [vmem:[#allocation2 + $0xac] sm:$0xf] %v1375_v13  ;;  %1559 = vst [vmem:[#allocation2 + $0xb0] sm:$0x1] %v1558_v14  ;;  %v1039_v33 = vmul.f32 %v5937_v20, %v6914_v27  ;;  %v1021_v31 = vmul.f32 %v5939_v61, %v6922_v11  ;;  %v5949_v17 = vpop.eup %5948 }
 0x1c0   : > { %v1222_v60 = vsel %vm6841_vm8, %v1214_v21, %v1221_v7  ;;  %v1495_v16 = vsel %vm6550_vm3, %v1223_v57, %v1494_v52  ;;  %v1037_v41 = vmul.f32 %v5941_v34, %v6929_v59  ;;  %v1024_v22 = vmul.f32 %v5943_v51, %v6934_v53  ;;  %v1560_v1 = vld [vmem:[#allocation2 + $0xb4] sm:$0xf]  ;;  %v1515_v5 = vld [vmem:[#allocation2 + $0x68] sm:$0x1] }
 0x1c1   : > { %1493 = vst [vmem:[#allocation2 + $0x40] sm:$0xf] %v1222_v60  ;;  %1496 = vst [vmem:[#allocation2 + $0x44] sm:$0x1] %v1495_v16  ;;  %v1357_v25 = vor.u32 %v1355_v3, %v1354_v0  ;;  %v1359_v38 = vrot.slane %v1354_v0, 4  ;;  %v5129_v48 = vpack.c.bf16 %v1023_v28, %v1023_v28  ;;  %v5145_v15 = vpack.c.bf16 %v1039_v33, %v1039_v33 }
 0x1c2   : > { %v5127_v46 = vpack.c.bf16 %v1021_v31, %v1021_v31  ;;  %v1040_v43 = vmul.f32 %v5945_v10, %v6940_v37  ;;  %v5143_v32 = vpack.c.bf16 %v1037_v41, %v1037_v41  ;;  %v5130_v26 = vpack.c.bf16 %v1024_v22, %v1024_v22  ;;  %v1571_v14 = vld [vmem:[#allocation2 + $0xc8] sm:$0x1] }
 0x1c3   : > { %v1358_v27 = vsel %vm6841_vm8, %v1350_v39, %v1357_v25  ;;  %v1551_v11 = vsel %vm6550_vm3, %v1359_v38, %v1550_v9  ;;  %v1259_v19 = vshrl.u32 %v5129_v48, 16  ;;  %v1262_v29 = vshll.u32 %v5129_v48, 16  ;;  %v1567_v39 = vld [vmem:[#allocation2 + $0xc0] sm:$0xf]  ;;  %v1508_v38 = vld [vmem:[#allocation2 + $0x5c] sm:$0x1] }
 0x1c4   : > { %1549 = vst [vmem:[#allocation2 + $0xa0] sm:$0xf] %v1358_v27  ;;  %1552 = vst [vmem:[#allocation2 + $0xa4] sm:$0x1] %v1551_v11  ;;  %v1395_v21 = vshrl.u32 %v5145_v15, 16  ;;  %v1242_v47 = vshrl.u32 %v5127_v46, 16  ;;  %v5146_v30 = vpack.c.bf16 %v1040_v43, %v1040_v43  ;;  %v1022_v36 = vmul.f32 %v5947_v62, %v6951_v49 }
 0x1c5   : > { %v1261_v59 = vrot.slane %v1259_v19, 7  ;;  %v1398_v56 = vshll.u32 %v5145_v15, 16  ;;  %v1245_v37 = vshll.u32 %v5127_v46, 16  ;;  %v1378_v35 = vshrl.u32 %v5143_v32, 16 }
 0x1c6   : > { %v1397_v53 = vrot.slane %v1395_v21, 7  ;;  %v1244_v23 = vrot.slane %v1242_v47, 7  ;;  %v942_v61 = vadd.f32 1.0, %v5949_v17  ;;  %v1381_v58 = vshll.u32 %v5143_v32, 16  ;;  %v1564_v21 = vld [vmem:[#allocation2 + $0xbc] sm:$0x1] }
 0x1c7   : > { %v1264_v20 = vor.u32 %v1262_v29, %v1261_v59  ;;  %v1380_v4 = vrot.slane %v1378_v35, 7  ;;  %v1267_v45 = vshrl.u32 %v5130_v26, 16  ;;  %v1403_v42 = vshrl.u32 %v5146_v30, 16 }
 0x1c8   : > { %v1400_v8 = vor.u32 %v1398_v56, %v1397_v53  ;;  %v1247_v2 = vor.u32 %v1245_v37, %v1244_v23  ;;  %v1270_v54 = vshll.u32 %v5130_v26, 16  ;;  %v5128_v3 = vpack.c.bf16 %v1022_v36, %v1022_v36 }
 0x1c9   : > { %v1512_v50 = vsel %vm6813_vm7, %v1264_v20, %v1511_v55  ;;  %v1383_v49 = vor.u32 %v1381_v58, %v1380_v4  ;;  %v1269_v52 = vrot.slane %v1267_v45, 7  ;;  %v1265_v51 = vrot.slane %v1261_v59, 4 }
 0x1ca   : > { %1513 = vst [vmem:[#allocation2 + $0x60] sm:$0xf] %v1512_v50  ;;  %v1568_v63 = vsel %vm6813_vm7, %v1400_v8, %v1567_v39  ;;  %v1505_v34 = vsel %vm6813_vm7, %v1247_v2, %v1504_v12  ;;  %v1405_v6 = vrot.slane %v1403_v42, 7  ;;  %v1406_v7 = vshll.u32 %v5146_v30, 16 }
 0x1cb   : > { %1569 = vst [vmem:[#allocation2 + $0xc0] sm:$0xf] %v1568_v63  ;;  %1506 = vst [vmem:[#allocation2 + $0x54] sm:$0xf] %v1505_v34  ;;  %5950 = vrcp.f32 %v942_v61  ;;  %v1561_v57 = vsel %vm6813_vm7, %v1383_v49, %v1560_v1  ;;  %v1272_v10 = vor.u32 %v1270_v54, %v1269_v52  ;;  %v1274_v13 = vrot.slane %v1269_v52, 4 }
 0x1cc   : > { %v1250_v0 = vshrl.u32 %v5128_v3, 16  ;;  %v1401_v28 = vrot.slane %v1397_v53, 4  ;;  %1562 = vst [vmem:[#allocation2 + $0xb4] sm:$0xf] %v1561_v57  ;;  %v1408_v60 = vor.u32 %v1406_v7, %v1405_v6  ;;  %v1410_v16 = vrot.slane %v1405_v6, 4 }
 0x1cd   : > { %v1273_v9 = vsel %vm6841_vm8, %v1265_v51, %v1272_v10  ;;  %v1516_v33 = vsel %vm6550_vm3, %v1274_v13, %v1515_v5  ;;  %v1253_v62 = vshll.u32 %v5128_v3, 16  ;;  %v1248_v48 = vrot.slane %v1244_v23, 4 }
 0x1ce   : > { %v1252_v31 = vrot.slane %v1250_v0, 7  ;;  %1514 = vst [vmem:[#allocation2 + $0x64] sm:$0xf] %v1273_v9  ;;  %1517 = vst [vmem:[#allocation2 + $0x68] sm:$0x1] %v1516_v33  ;;  %v1409_v40 = vsel %vm6841_vm8, %v1401_v28, %v1408_v60  ;;  %v1572_v25 = vsel %vm6550_vm3, %v1410_v16, %v1571_v14  ;;  %v1384_v47 = vrot.slane %v1380_v4, 4 }
 0x1cf   : > { %1570 = vst [vmem:[#allocation2 + $0xc4] sm:$0xf] %v1409_v40  ;;  %1573 = vst [vmem:[#allocation2 + $0xc8] sm:$0x1] %v1572_v25 }
 0x1d0   : > { %v1255_v41 = vor.u32 %v1253_v62, %v1252_v31  ;;  %v1257_v17 = vrot.slane %v1252_v31, 4 }
 0x1d2   : > { %v1256_v15 = vsel %vm6841_vm8, %v1248_v48, %v1255_v41  ;;  %v1509_v46 = vsel %vm6550_vm3, %v1257_v17, %v1508_v38 }
 0x1d3   : > { %1507 = vst [vmem:[#allocation2 + $0x58] sm:$0xf] %v1256_v15  ;;  %1510 = vst [vmem:[#allocation2 + $0x5c] sm:$0x1] %v1509_v46 }
 0x1d8   : > { %v5951_v22 = vpop.eup %5950 }
 0x1d9   : > { %v1038_v43 = vmul.f32 %v5951_v22, %v6991_v44 }
 0x1db   : > { %v5144_v27 = vpack.c.bf16 %v1038_v43, %v1038_v43 }
 0x1dd   : > { %v1386_v11 = vshrl.u32 %v5144_v27, 16  ;;  %v1389_v29 = vshll.u32 %v5144_v27, 16 }
 0x1df   : > { %v1388_v19 = vrot.slane %v1386_v11, 7 }
 0x1e1   : > { %v1391_v59 = vor.u32 %v1389_v29, %v1388_v19  ;;  %v1393_v56 = vrot.slane %v1388_v19, 4 }
 0x1e3   : > { %v1392_v32 = vsel %vm6841_vm8, %v1384_v47, %v1391_v59  ;;  %v1565_v26 = vsel %vm6550_vm3, %v1393_v56, %v1564_v21 }
 0x1e4   : > { %1563 = vst [vmem:[#allocation2 + $0xb8] sm:$0xf] %v1392_v32  ;;  %1566 = vst [vmem:[#allocation2 + $0xbc] sm:$0x1] %v1565_v26 }
 0x1e5 PF: > { %v5952_v55 = vld [vmem:[#allocation8 + $0x78] sm:$0xff]   ;;  %v5954_v44 = vld [vmem:[#allocation8 + $0x70] sm:$0xff]   ;;  %v5956_v37 = vld [vmem:[#allocation8 + $0x68] sm:$0xff]   ;;  %s5147_s22 = smul.u32 96, %s6300_s30  ;;  %vm1618_vm9 = vsmask.f32 3328 }
 0x1e6   : > { %v5953_v53 = vld [vmem:[#allocation8 + $0x38] sm:$0xff]   ;;  %5366 = vmatprep.subr.bf16.mxu0 %v5952_v55  ;;  %v5955_v23 = vld [vmem:[#allocation8 + $0x30] sm:$0xff]   ;;  %v5957_v24 = vld [vmem:[#allocation8 + $0x28] sm:$0xff]   ;;  %vm1619_vm10 = vsmask.f32 7440  ;;  %vm2224_vm12 = vcmask 1042432  }
 0x1e7   : > { %5398 = vmatprep.subr.bf16.mxu1 %v5953_v53  ;;  %5367 = vmatpush3.bf16.msra.mxu0 %v5952_v55  ;;  %v5958_v18 = vld [vmem:[#allocation8 + $0x60] sm:$0xff]   ;;  %v5960_v20 = vld [vmem:[#allocation8 + $0x58] sm:$0xff]   ;;  %v5962_v12 = vld [vmem:[#allocation8 + $0x50] sm:$0xff]   ;;  %s7059_s1 = scalar_lea.vmem [#allocation2], %s5147_s22  ;;  %vm2225_vm13 = vcmask 1046532   ;;  %s8045_s21 = sld [smem:[#allocation32_spill]] }
 0x1e8   : > { %5399 = vmatpush3.bf16.msra.mxu1 %v5953_v53  ;;  %5368 = vmatprep.subr.bf16.mxu0 %v5954_v44  ;;  %v5959_v30 = vld [vmem:[#allocation8 + $0x20] sm:$0xff]   ;;  %v5961_v39 = vld [vmem:[#allocation8 + $0x18] sm:$0xff]   ;;  %v5963_v35 = vld [vmem:[#allocation8 + $0x10] sm:$0xff]   ;;  %s8049_s27 = sld [smem:[#allocation33_spill]]  ;;  %s5148_s13 = sshll.u32 %s6300_s30, 7 }
 0x1e9   : > { %5400 = vmatprep.subr.bf16.mxu1 %v5955_v23  ;;  %v5964_v54 = vld [vmem:[#allocation8 + $0x48] sm:$0xff]   ;;  %v5966_v14 = vld [vmem:[#allocation8 + $0x40] sm:$0xff]   ;;  %vm7087_vm11 = vmor %vm1618_vm9, %vm1619_vm10  ;;  %s7854_s20 = scalar_lea.vmem %s6528_s23, %s5148_s13 [#allocation3]  ;;  %s8053_s23 = sld [smem:[#allocation14_spill]] }
 0x1ea   : > { %v5965_v6 = vld [vmem:[#allocation8 + $0x8] sm:$0xff]   ;;  %v5967_v48 = vld [vmem:[#allocation8] sm:$0xff]   ;;  %v5970_v11 = vld [vmem:[#allocation8 + $0xb8] sm:$0xff]   ;;  %s5149_s6 = sshll.u32 %s6300_s30, 4  ;;  %s8054_s19 = sld [smem:[#allocation16_spill]] }
 0x1eb   : > { %5369 = vmatpush3.bf16.msra.mxu0 %v5954_v44  ;;  %v1578_v36 = vld [vmem:[%s7059_s1] sm:$0xf]  ;;  %v7063_v8 = vld [vmem:[%s7059_s1 + $0x4] sm:$0xf]  ;;  %v7066_v2 = vld [vmem:[%s7059_s1 + $0x8] sm:$0x1] }
 0x1ec   : > { %5401 = vmatpush3.bf16.msra.mxu1 %v5955_v23  ;;  %5370 = vmatprep.subr.bf16.mxu0 %v5956_v37  ;;  %v1622_v61 = vshrl.u32 %v1578_v36, 16  ;;  %v1625_v50 = vshll.u32 %v1578_v36, 16  ;;  %v1631_v4 = vshll.u32 %v7063_v8, 16  ;;  %v1635_v58 = vshrl.u32 %v7063_v8, 16  ;;  %v7072_v63 = vld [vmem:[%s7059_s1 + $0xc] sm:$0xf]  ;;  %vm7215_vm14 = vmor %vm2224_vm12, %vm2225_vm13 }
 0x1ed   : > { %5402 = vmatprep.subr.bf16.mxu1 %v5957_v24  ;;  %v1641_v45 = vshll.u32 %v7066_v2, 16  ;;  %v4852_v42 = vcombine.low %v1578_v36, %v7063_v8  ;;  %v7076_v49 = vld [vmem:[%s7059_s1 + $0x10] sm:$0xf]  ;;  %v7079_v52 = vld [vmem:[%s7059_s1 + $0x14] sm:$0x1]  ;;  %v1646_v5 = vshrl.u32 %v7072_v63, 16 }
 0x1ee   : > { %v1624_v34 = vrot.slane %v1622_v61, 4  ;;  %v1627_v1 = vrot.slane %v1625_v50, 5  ;;  %v1633_v3 = vrot.slane %v1631_v4, 5  ;;  %v1637_v51 = vrot.slane %v1635_v58, 4  ;;  %v7101_v19 = vld [vmem:[%s7059_s1 + $0x18] sm:$0xf] }
 0x1ef   : > { %5371 = vmatpush3.bf16.msra.mxu0 %v5956_v37  ;;  %5414 = vmatprep.mubr.bf16.mxu1 %v4852_v42  ;;  %v1649_v57 = vshll.u32 %v7072_v63, 16  ;;  %v1655_v10 = vshll.u32 %v7076_v49, 16  ;;  %v1659_v13 = vshrl.u32 %v7076_v49, 16  ;;  %v1643_v60 = vrot.slane %v1641_v45, 5  ;;  %v7104_v29 = vld [vmem:[%s7059_s1 + $0x1c] sm:$0xf] }
 0x1f0   : > { %5403 = vmatpush3.bf16.msra.mxu1 %v5957_v24  ;;  %5372 = vmatprep.subr.bf16.mxu0 %v5958_v18  ;;  %v1628_v7 = vor.u32 %v1627_v1, %v1624_v34  ;;  %v1638_v28 = vor.u32 %v1637_v51, %v1633_v3  ;;  %v1648_v16 = vrot.slane %v1646_v5, 4  ;;  %v1665_v9 = vshll.u32 %v7079_v52, 16  ;;  %v5971_v56 = vld [vmem:[#allocation8 + $0xf8] sm:$0xff]   ;;  %v7107_v32 = vld [vmem:[%s7059_s1 + $0x20] sm:$0x1]  ;;  %v5972_v36 = vld [vmem:[#allocation8 + $0xb0] sm:$0xff]  }
 0x1f1   : > { %5404 = vmatprep.subr.bf16.mxu1 %v5959_v30  ;;  %v1651_v31 = vrot.slane %v1649_v57, 5  ;;  %v1657_v62 = vrot.slane %v1655_v10, 5  ;;  %v1661_v40 = vrot.slane %v1659_v13, 4  ;;  %v2232_v38 = vrot.slane %v7066_v2, 5  ;;  %v7115_v37 = vld [vmem:[%s7059_s1 + $0x24] sm:$0xf] }
 0x1f2   : > { %v1629_v33 = vrot.slane %v1628_v7, 4  ;;  %v1639_v25 = vrot.slane %v1638_v28, 4  ;;  %v1667_v46 = vrot.slane %v1665_v9, 5  ;;  %v2239_v43 = vrot.slane %v7079_v52, 5  ;;  %v5973_v51 = vld [vmem:[#allocation8 + $0xf0] sm:$0xff]   ;;  %s5110_s14 = sshll.u32 %s8053_s23, 5 }
 0x1f3   : > { %5373 = vmatpush3.bf16.msra.mxu0 %v5958_v18  ;;  %v1652_v17 = vor.u32 %v1651_v31, %v1648_v16  ;;  %v1662_v15 = vor.u32 %v1661_v40, %v1657_v62  ;;  %v4853_v27 = vcombine.low %v7072_v63, %v7076_v49  ;;  %v1670_v26 = vshrl.u32 %v7101_v19, 16  ;;  %v7138_v9 = vld [vmem:[%s7059_s1 + $0x30] sm:$0xf]  ;;  %v5976_v40 = vld [vmem:[#allocation8 + $0xa8] sm:$0xff]   ;;  %s4655_s16 = sadd.s32 %s5149_s6, %s5110_s14  ;;  %s4658_s12 = sshll.u32 %s6541_s7, 4  ;;  %s7910_s12 = int_to_ptr.vmem [resolvable:$true] %s4658_s12 }
 0x1f4   : > { %5405 = vmatpush3.bf16.msra.mxu1 %v5959_v30  ;;  %5374 = vmatprep.subr.bf16.mxu0 %v5960_v20  ;;  %v1634_v41 = vsel %vm7087_vm11, %v1629_v33, %v1633_v3  ;;  %v1644_v22 = vsel %vm7087_vm11, %v1639_v25, %v1643_v60  ;;  %v1673_v55 = vshll.u32 %v7101_v19, 16  ;;  %v1679_v53 = vshll.u32 %v7104_v29, 16  ;;  %v7145_v25 = vld [vmem:[%s7059_s1 + $0x34] sm:$0xf]  ;;  %s5111_s30 = sshll.u32 %s4655_s16, 7  ;;  %s8055_s4 = sld [smem:[#allocation34_spill]] }
 0x1f5   : > { %5406 = vmatprep.subr.bf16.mxu1 %v5961_v39  ;;  %v4836_v21 = vcombine.low %v1634_v41, %v1644_v22  ;;  %v1653_v47 = vrot.slane %v1652_v17, 4  ;;  %v1663_v59 = vrot.slane %v1662_v15, 4  ;;  %v1683_v44 = vshrl.u32 %v7104_v29, 16  ;;  %s6192_s8 = scalar_lea.vmem %s7910_s12, 2048  ;;  %p8056_p10 = scmp.ne.s32.totalorder %s8054_s19, 0 }
 0x1f6   : > { %v1689_v23 = vshll.u32 %v7107_v32, 16  ;;  %v1672_v30 = vrot.slane %v1670_v26, 4  ;;  %v1675_v61 = vrot.slane %v1673_v55, 5  ;;  %v1681_v50 = vrot.slane %v1679_v53, 5  ;;  %v5978_v55 = vld [vmem:[#allocation8 + $0xa0] sm:$0xff]   ;;  %p6193_p3 = scmp.ne.s32.totalorder %s7910_s12, %s6192_s8  ;;  %s6326_s24 = smov [#allocation9]  }
 0x1f7   : > { %5375 = vmatpush3.bf16.msra.mxu0 %v5960_v20  ;;  %5382 = vmatprep.mubr.bf16.mxu0 %v4836_v21  ;;  %v1658_v24 = vsel %vm7087_vm11, %v1653_v47, %v1657_v62  ;;  %v1668_v18 = vsel %vm7087_vm11, %v1663_v59, %v1667_v46  ;;  %v7122_v20 = vld [vmem:[%s7059_s1 + $0x28] sm:$0xf]  ;;  %v1685_v4 = vrot.slane %v1683_v44, 4  ;;  %v1694_v45 = vshrl.u32 %v7115_v37, 16  ;;  %v5977_v46 = vld [vmem:[#allocation8 + $0xe8] sm:$0xff]  }
 0x1f8   : > { %5407 = vmatpush3.bf16.msra.mxu1 %v5961_v39  ;;  %5376 = vmatprep.subr.bf16.mxu0 %v5962_v12  ;;  %v7125_v39 = vld [vmem:[%s7059_s1 + $0x2c] sm:$0x1]  ;;  %v1691_v58 = vrot.slane %v1689_v23, 5  ;;  %v1697_v63 = vshll.u32 %v7115_v37, 16  ;;  %v1703_v34 = vshll.u32 %v7122_v20, 16  ;;  %v1676_v1 = vor.u32 %v1675_v61, %v1672_v30  ;;  %p6194_p12 = pnand %p6193_p3, %p8056_p10 }
 0x1f9   : > { %5408 = vmatprep.subr.bf16.mxu1 %v5963_v35  ;;  %v1686_v42 = vor.u32 %v1685_v4, %v1681_v50  ;;  %v1713_v3 = vshll.u32 %v7125_v39, 16  ;;  %v4854_v5 = vcombine.low %v7101_v19, %v7104_v29  ;;  %v4855_v16 = vcombine.low %v7115_v37, %v7122_v20  ;;  %v7166_v37 = vld [vmem:[%s7059_s1 + $0x44] sm:$0x1] }
 0x1fa   : > { %v1699_v7 = vrot.slane %v1697_v63, 5  ;;  %v1705_v57 = vrot.slane %v1703_v34, 5  ;;  %v1677_v10 = vrot.slane %v1676_v1, 4  ;;  %v1718_v41 = vshrl.u32 %v7138_v9, 16  ;;  %s7908_s15 = scalar_lea.hbm %s8055_s4, %s5111_s30  ;;  %p6195_p2 = pneg %p6194_p12 }
 0x1fb   : > { %5377 = vmatpush3.bf16.msra.mxu0 %v5962_v12  ;;  %v2229_v12 = vrot.slane %v7063_v8, 5  ;;  %v1687_v13 = vrot.slane %v1686_v42, 4  ;;  %v1715_v28 = vrot.slane %v1713_v3, 5  ;;  %v1721_v22 = vshll.u32 %v7138_v9, 16 }
 0x1fc   : > { %5409 = vmatpush3.bf16.msra.mxu1 %v5963_v35  ;;  %5378 = vmatprep.subr.bf16.mxu0 %v5964_v54  ;;  %v4837_v35 = vcombine.low %v1658_v24, %v1668_v18  ;;  %v1682_v33 = vsel %vm7087_vm11, %v1677_v10, %v1681_v50  ;;  %v1720_v21 = vrot.slane %v1718_v41, 4  ;;  %v1731_v47 = vshrl.u32 %v7145_v25, 16  ;;  %v5979_v18 = vld [vmem:[#allocation8 + $0xe0] sm:$0xff]  }
 0x1fd   : > { %5410 = vmatprep.subr.bf16.mxu1 %v5965_v6  ;;  %v1692_v31 = vsel %vm7087_vm11, %v1687_v13, %v1691_v58  ;;  %v1723_v53 = vrot.slane %v1721_v22, 5  ;;  %v4856_v23 = vcombine.low %v7138_v9, %v7145_v25  ;;  %v1761_v1 = vshll.u32 %v7166_v37, 16 }
 0x1fe   : > { %v4838_v17 = vcombine.low %v1682_v33, %v1692_v31  ;;  %v1733_v30 = vrot.slane %v1731_v47, 4  ;;  %v7186_v33 = vld [vmem:[%s7059_s1 + $0x50] sm:$0x1]  ;;  %v2257_v52 = vrot.slane %v7145_v25, 5 }
 0x1ff   : > { %5379 = vmatpush3.bf16.msra.mxu0 %v5964_v54  ;;  %v1707_v54 = vshrl.u32 %v7122_v20, 16  ;;  %v1724_v50 = vor.u32 %v1723_v53, %v1720_v21 }
 0x200   : > { %5411 = vmatpush3.bf16.msra.mxu1 %v5965_v6  ;;  %5380 = vmatprep.subr.bf16.mxu0 %v5966_v14  ;;  %v1696_v6 = vrot.slane %v1694_v45, 4 }
 0x201   : > { %5412 = vmatprep.subr.bf16.mxu1 %v5967_v48  ;;  %v1725_v42 = vrot.slane %v1724_v50, 4 }
 0x202   : > { %v1700_v60 = vor.u32 %v1699_v7, %v1696_v6  ;;  %v1763_v7 = vrot.slane %v1761_v1, 5 }
 0x203   : > { %5381 = vmatpush3.bf16.msra.mxu0 %v5966_v14  ;;  %v1709_v14 = vrot.slane %v1707_v54, 4 }
 0x204   : > { %5413 = vmatpush3.bf16.msra.mxu1 %v5967_v48  ;;  %5430 = vmatprep.subr.bf16.mxu0 %v5970_v11  ;;  %v7148_v48 = vld [vmem:[%s7059_s1 + $0x38] sm:$0x1]  ;;  %v1701_v15 = vrot.slane %v1700_v60, 4  ;;  %v7181_v60 = vld [vmem:[%s7059_s1 + $0x4c] sm:$0xf] }
 0x205   : > { %5462 = vmatprep.subr.bf16.mxu1 %v5971_v56  ;;  %v1710_v62 = vor.u32 %v1709_v14, %v1705_v57  ;;  %v1737_v59 = vshll.u32 %v7148_v48, 16  ;;  %v1779_v22 = vshrl.u32 %v7181_v60, 16 }
 0x206   : > { %5383 = vmatmul.mubr.bf16.vlgmr.msra.gmra.mxu0 %v4837_v35  ;;  %v1706_v26 = vsel %vm7087_vm11, %v1701_v15, %v1705_v57  ;;  %v5983_v57 = vld [vmem:[#allocation8 + $0xd8] sm:$0xff]   ;;  %v5984_v15 = vld [vmem:[#allocation8 + $0x90] sm:$0xff]  }
 0x207   : > { %5415 = vmatmul.mubr.bf16.vlgmr.msra.gmra.mxu1 %v4853_v27  ;;  %5431 = vmatpush3.bf16.msra.mxu0 %v5970_v11  ;;  %v1727_v27 = vshll.u32 %v7145_v25, 16  ;;  %v7154_v11 = vld [vmem:[%s7059_s1 + $0x3c] sm:$0xf]  ;;  %v1711_v19 = vrot.slane %v1710_v62, 4  ;;  %v1739_v35 = vrot.slane %v1737_v59, 5  ;;  %v1785_v59 = vshll.u32 %v7186_v33, 16 }
 0x208   : > { %5463 = vmatpush3.bf16.msra.mxu1 %v5971_v56  ;;  %5432 = vmatprep.subr.bf16.mxu0 %v5972_v36  ;;  %v7159_v56 = vld [vmem:[%s7059_s1 + $0x40] sm:$0xf]  ;;  %v1745_v4 = vshll.u32 %v7154_v11, 16  ;;  %v2259_v25 = vrot.slane %v2257_v52, 4 }
 0x209   : > { %5464 = vmatprep.subr.bf16.mxu1 %v5973_v51  ;;  %5418 = vmatprep.mubr.bf16.mxu1 %v4854_v5  ;;  %v1729_v44 = vrot.slane %v1727_v27, 5  ;;  %v1716_v24 = vsel %vm7087_vm11, %v1711_v19, %v1715_v28  ;;  %v1751_v58 = vshll.u32 %v7159_v56, 16  ;;  %v1755_v34 = vshrl.u32 %v7159_v56, 16  ;;  %v1590_v28 = vld [vmem:[%s7059_s1 + $0x48] sm:$0xf] }
 0x20a   : > { %5386 = vmatprep.mubr.bf16.mxu0 %v4838_v17  ;;  %v4839_v61 = vcombine.low %v1706_v26, %v1716_v24  ;;  %v1747_v54 = vrot.slane %v1745_v4, 5  ;;  %v4857_v14 = vcombine.low %v7154_v11, %v7159_v56  ;;  %v1766_v31 = vshrl.u32 %v1590_v28, 16  ;;  %v7194_v27 = vld [vmem:[%s7059_s1 + $0x58] sm:$0xf]  ;;  %v5985_v19 = vld [vmem:[#allocation8 + $0xd0] sm:$0xff]  }
 0x20b   : > { %5433 = vmatpush3.bf16.msra.mxu0 %v5972_v36  ;;  %v1742_v36 = vshrl.u32 %v7154_v11, 16  ;;  %v1734_v45 = vor.u32 %v1733_v30, %v1729_v44  ;;  %v1753_v3 = vrot.slane %v1751_v58, 5  ;;  %v1757_v6 = vrot.slane %v1755_v34, 4  ;;  %v7198_v26 = vld [vmem:[%s7059_s1 + $0x5c] sm:$0x1]  ;;  %v5988_v58 = vld [vmem:[#allocation8 + $0x88] sm:$0xff]  }
 0x20c   : > { %5465 = vmatpush3.bf16.msra.mxu1 %v5973_v51  ;;  %5434 = vmatprep.subr.bf16.mxu0 %v5976_v40  ;;  %v5982_v51 = vld [vmem:[#allocation8 + $0x98] sm:$0xff]   ;;  %v1730_v10 = vsel %vm7087_vm11, %v1725_v42, %v1729_v44  ;;  %v1769_v62 = vshll.u32 %v1590_v28, 16  ;;  %v1768_v21 = vrot.slane %v1766_v31, 4  ;;  %v4858_v24 = vcombine.low %v1590_v28, %v7181_v60 }
 0x20d   : > { %5466 = vmatprep.subr.bf16.mxu1 %v5977_v46  ;;  %v1744_v63 = vrot.slane %v1742_v36, 4  ;;  %v1735_v5 = vrot.slane %v1734_v45, 4  ;;  %v1758_v9 = vor.u32 %v1757_v6, %v1753_v3  ;;  %v1787_v30 = vrot.slane %v1785_v59, 5 }
 0x20e   : > { %5387 = vmatmul.mubr.bf16.gmra.mxu0 %v4839_v61  ;;  %v1771_v47 = vrot.slane %v1769_v62, 5  ;;  %v1799_v4 = vshll.u32 %v7194_v27, 16  ;;  %v1803_v34 = vshrl.u32 %v7194_v27, 16  ;;  %v1809_v1 = vshll.u32 %v7198_v26, 16 }
 0x20f   : > { %5419 = vmatmul.mubr.bf16.gmra.mxu1 %v4855_v16  ;;  %5435 = vmatpush3.bf16.msra.mxu0 %v5976_v40  ;;  %v1748_v13 = vor.u32 %v1747_v54, %v1744_v63  ;;  %v1740_v16 = vsel %vm7087_vm11, %v1735_v5, %v1739_v35  ;;  %v7189_v40 = vld [vmem:[%s7059_s1 + $0x54] sm:$0xf]  ;;  %v1759_v11 = vrot.slane %v1758_v9, 4  ;;  %v5989_v5 = vld [vmem:[#allocation8 + $0xc8] sm:$0xff]   ;;  %v5990_v9 = vld [vmem:[#allocation8 + $0x80] sm:$0xff]  }
 0x210   : > { %5467 = vmatpush3.bf16.msra.mxu1 %v5977_v46  ;;  %5436 = vmatprep.subr.bf16.mxu0 %v5978_v55  ;;  %v4840_v41 = vcombine.low %v1730_v10, %v1740_v16  ;;  %v1775_v46 = vshll.u32 %v7181_v60, 16  ;;  %v1790_v35 = vshrl.u32 %v7189_v40, 16  ;;  %v1793_v50 = vshll.u32 %v7189_v40, 16 }
 0x211   : > { %5468 = vmatprep.subr.bf16.mxu1 %v5979_v18  ;;  %5422 = vmatprep.mubr.bf16.mxu1 %v4856_v23  ;;  %v1749_v17 = vrot.slane %v1748_v13, 4  ;;  %v1781_v23 = vrot.slane %v1779_v22, 4  ;;  %v2231_v10 = vrot.slane %v2229_v12, 4  ;;  %v2236_v13 = vrot.slane %v7076_v49, 5  ;;  %v5992_v49 = vld [vmem:[%s7059_s1 + $0xc] sm:$0xff]  }
 0x212   : > { %5390 = vmatprep.mubr.bf16.mxu0 %v4840_v41  ;;  %v1777_v44 = vrot.slane %v1775_v46, 5  ;;  %v1792_v63 = vrot.slane %v1790_v35, 4  ;;  %v1795_v54 = vrot.slane %v1793_v50, 5  ;;  %v4859_v16 = vcombine.low %v7189_v40, %v7194_v27  ;;  %v5991_v46 = vld [vmem:[#allocation8 + $0xc0] sm:$0xff]   ;;  %v5997_v35 = vld [vmem:[#allocation8 + $0x170] sm:$0xff]  }
 0x213   : > { %5437 = vmatpush3.bf16.msra.mxu0 %v5978_v55  ;;  %v1754_v53 = vsel %vm7087_vm11, %v1749_v17, %v1753_v3  ;;  %v1764_v55 = vsel %vm7087_vm11, %v1759_v11, %v1763_v7  ;;  %v1801_v3 = vrot.slane %v1799_v4, 5  ;;  %v2200_v7 = vld [vmem:[%s7059_s1] sm:$0xe]  ;;  %v1811_v17 = vrot.slane %v1809_v1, 5  ;;  %v2201_v11 = vld [vmem:[%s7059_s1 + $0xc] sm:$0xe] }
 0x214   : > { %5469 = vmatpush3.bf16.msra.mxu1 %v5979_v18  ;;  %5438 = vmatprep.subr.bf16.mxu0 %v5982_v51  ;;  %v1772_v18 = vor.u32 %v1771_v47, %v1768_v21  ;;  %v4841_v36 = vcombine.low %v1754_v53, %v1764_v55  ;;  %v1782_v61 = vor.u32 %v1781_v23, %v1777_v44  ;;  %v4868_v31 = vrot.slane %v2200_v7, 9  ;;  %v5995_v23 = vld [vmem:[#allocation8 + $0x178] sm:$0xff]   ;;  %v6000_v7 = vld [vmem:[#allocation8 + $0x128] sm:$0xff]  }
 0x215   : > { %5470 = vmatprep.subr.bf16.mxu1 %v5983_v57  ;;  %v1796_v28 = vor.u32 %v1795_v54, %v1792_v63  ;;  %v4869_v8 = vrot.slane %v2201_v11, 9  ;;  %v2243_v53 = vrot.slane %v7104_v29, 5  ;;  %v2250_v50 = vrot.slane %v7122_v20, 5  ;;  %v2204_v1 = vld [vmem:[%s7059_s1 + $0x30] sm:$0xe] }
 0x216   : > { %v1773_v45 = vrot.slane %v1772_v18, 4  ;;  %5391 = vmatmul.mubr.bf16.gmra.mxu0 %v4841_v36  ;;  %v1783_v42 = vrot.slane %v1782_v61, 4  ;;  %v2230_v40 = vsel %vm7215_vm14, %v4868_v31, %v2229_v12  ;;  %v2246_v18 = vrot.slane %v7107_v32, 5  ;;  %v5998_v61 = vld [vmem:[%s7059_s1 + $0x24] sm:$0xff]   ;;  %v5999_v54 = vld [vmem:[%s7059_s1 + $0x30] sm:$0xff]  }
 0x217   : > { %5423 = vmatmul.mubr.bf16.gmra.mxu1 %v4857_v14  ;;  %5439 = vmatpush3.bf16.msra.mxu0 %v5982_v51  ;;  %v1805_v51 = vrot.slane %v1803_v34, 4  ;;  %v1797_v22 = vrot.slane %v1796_v28, 4  ;;  %v2245_v55 = vrot.slane %v2243_v53, 4  ;;  %v2237_v29 = vsel %vm7215_vm14, %v4869_v8, %v2236_v13  ;;  %v2203_v32 = vld [vmem:[%s7059_s1 + $0x24] sm:$0xe]  ;;  %v6004_v28 = vld [vmem:[%s7059_s1 + $0x3c] sm:$0xff]  }
 0x218   : > { %5471 = vmatpush3.bf16.msra.mxu1 %v5983_v57  ;;  %5440 = vmatprep.subr.bf16.mxu0 %v5984_v15  ;;  %v1778_v6 = vsel %vm7087_vm11, %v1773_v45, %v1777_v44  ;;  %v1788_v14 = vsel %vm7087_vm11, %v1783_v42, %v1787_v30  ;;  %v2202_v44 = vld [vmem:[%s7059_s1 + $0x18] sm:$0xe]  ;;  %v2253_v63 = vrot.slane %v7125_v39, 5  ;;  %v4871_v20 = vrot.slane %v2203_v32, 9 }
 0x219   : > { %5472 = vmatprep.subr.bf16.mxu1 %v5985_v19  ;;  %5426 = vmatprep.mubr.bf16.mxu1 %v4858_v24  ;;  %v4842_v62 = vcombine.low %v1778_v6, %v1788_v14  ;;  %v1806_v41 = vor.u32 %v1805_v51, %v1801_v3  ;;  %v1802_v47 = vsel %vm7087_vm11, %v1797_v22, %v1801_v3  ;;  %v4870_v24 = vrot.slane %v2202_v44, 9  ;;  %v5993_v30 = vld [vmem:[%s7059_s1 + $0x18] sm:$0xff]  }
 0x21a   : > { %v2252_v34 = vrot.slane %v2250_v50, 4  ;;  %v2264_v3 = vrot.slane %v7159_v56, 5  ;;  %v4872_v6 = vrot.slane %v2204_v1, 9  ;;  %v2260_v51 = vrot.slane %v7148_v48, 5  ;;  %v6003_v39 = vld [vmem:[#allocation8 + $0x160] sm:$0xff]  }
 0x21b   : > { %5441 = vmatpush3.bf16.msra.mxu0 %v5984_v15  ;;  %5394 = vmatprep.mubr.bf16.mxu0 %v4842_v62  ;;  %v1807_v21 = vrot.slane %v1806_v41, 4  ;;  %v2233_v15 = vsel %vm7215_vm14, %v2231_v10, %v2232_v38  ;;  %v5994_v38 = vld [vmem:[#allocation8 + $0x138] sm:$0xff]   ;;  %v2244_v4 = vsel %vm7215_vm14, %v4870_v24, %v2243_v53  ;;  %v2205_v10 = vld [vmem:[%s7059_s1 + $0x3c] sm:$0xe]  ;;  %v2271_v56 = vrot.slane %v7181_v60, 5 }
 0x21c   : > { %5473 = vmatpush3.bf16.msra.mxu1 %v5985_v19  ;;  %5442 = vmatprep.subr.bf16.mxu0 %v5988_v58  ;;  %v2238_v19 = vrot.slane %v2236_v13, 4  ;;  %v4876_v2 = vcombine.low %v2230_v40, %v2233_v15  ;;  %v2251_v13 = vsel %vm7215_vm14, %v4871_v20, %v2250_v50  ;;  %v2254_v14 = vsel %vm7215_vm14, %v2252_v34, %v2253_v63  ;;  %v4926_v24 = vld [vmem:[%s7059_s1 + $0xc] sm:$0xf]  ;;  %v6013_v50 = vld [vmem:[#allocation8 + $0x148] sm:$0xff]  }
 0x21d   : > { %5474 = vmatprep.subr.bf16.mxu1 %v5989_v5  ;;  %v1812_v59 = vsel %vm7087_vm11, %v1807_v21, %v1811_v17  ;;  %v2267_v48 = vrot.slane %v7166_v37, 5  ;;  %v2261_v31 = vsel %vm7215_vm14, %v2259_v25, %v2260_v51  ;;  %v4873_v62 = vrot.slane %v2205_v10, 9  ;;  %v6002_v37 = vld [vmem:[#allocation8 + $0x120] sm:$0xff]   ;;  %v2207_v21 = vld [vmem:[%s7059_s1 + $0x54] sm:$0xe]  ;;  %v6012_v51 = vld [vmem:[#allocation8 + $0x108] sm:$0xff]  }
 0x21e   : > { %v4843_v12 = vcombine.low %v1802_v47, %v1812_v59  ;;  %v2240_v36 = vsel %vm7215_vm14, %v2238_v19, %v2239_v43  ;;  %v5996_v43 = vld [vmem:[#allocation8 + $0x130] sm:$0xff]   ;;  %v2274_v41 = vrot.slane %v7186_v33, 5  ;;  %v4879_v17 = vcombine.low %v2251_v13, %v2254_v14  ;;  %v6007_v33 = vld [vmem:[#allocation8 + $0x158] sm:$0xff]   ;;  %v4930_v25 = vld [vmem:[%s7059_s1 + $0x1c] sm:$0xf] }
 0x21f   : > { %5427 = vmatmul.mubr.bf16.gmra.mxu1 %v4859_v16  ;;  %5443 = vmatpush3.bf16.msra.mxu0 %v5988_v58  ;;  %v2247_v58 = vsel %vm7215_vm14, %v2245_v55, %v2246_v18  ;;  %v4877_v45 = vcombine.low %v2237_v29, %v2240_v36  ;;  %v2266_v16 = vrot.slane %v2264_v3, 4  ;;  %v2273_v60 = vrot.slane %v2271_v56, 4  ;;  %v6005_v59 = vld [vmem:[%s7059_s1 + $0x48] sm:$0xff]   ;;  %v4928_v29 = vld [vmem:[%s7059_s1 + $0x14] sm:$0x1] }
 0x220   : > { %5475 = vmatpush3.bf16.msra.mxu1 %v5989_v5  ;;  %5444 = vmatprep.subr.bf16.mxu0 %v5990_v9  ;;  %v4878_v42 = vcombine.low %v2244_v4, %v2247_v58  ;;  %v6001_v5 = vld [vmem:[#allocation8 + $0x168] sm:$0xff]   ;;  %v2278_v22 = vrot.slane %v7194_v27, 5  ;;  %v2281_v15 = vrot.slane %v7198_v26, 5  ;;  %v4875_v19 = vrot.slane %v2207_v21, 9  ;;  %v6006_v26 = vld [vmem:[#allocation8 + $0x118] sm:$0xff]   ;;  %v6008_v55 = vld [vmem:[#allocation8 + $0x110] sm:$0xff]  }
 0x221   : > { %5476 = vmatprep.subr.bf16.mxu1 %v5991_v46  ;;  %5478 = vmatprep.mubr.bf16.mxu1 %v5992_v49  ;;  %v2265_v27 = vsel %vm7215_vm14, %v4873_v62, %v2264_v3  ;;  %v2268_v47 = vsel %vm7215_vm14, %v2266_v16, %v2267_v48  ;;  %v2275_v8 = vsel %vm7215_vm14, %v2273_v60, %v2274_v41  ;;  %v2764_v36 = vshrl.u32 %v4926_v24, 16  ;;  %v4931_v10 = vld [vmem:[%s7059_s1 + $0x20] sm:$0x1] }
 0x222   : > { %5395 = vmatmul.mubr.bf16.gmra.mxu0 %v4843_v12  ;;  %v2280_v40 = vrot.slane %v2278_v22, 4  ;;  %v7291_v12 = vsel %vm7215_vm14, %v4875_v19, %v2278_v22  ;;  %v4881_v44 = vcombine.low %v2265_v27, %v2268_v47  ;;  %v2783_v58 = vshll.u32 %v4928_v29, 16 }
 0x223   : > { %5445 = vmatpush3.bf16.msra.mxu0 %v5990_v9  ;;  %5446 = vmatprep.mubr.bf16.mxu0 %v4876_v2  ;;  %v2258_v9 = vsel %vm7215_vm14, %v4872_v6, %v2257_v52  ;;  %v4966_v52 = vld [vmem:[%s7059_s1 + $0xc] sm:$0xe]  ;;  %v2766_v63 = vrot.slane %v2764_v36, 4  ;;  %v3202_v1 = vrot.slane %v4928_v29, 5  ;;  %v2797_v48 = vshll.u32 %v4930_v25, 16 }
 0x224   : > { %5477 = vmatpush3.bf16.msra.mxu1 %v5991_v46  ;;  %5494 = vmatprep.subr.bf16.mxu0 %v5994_v38  ;;  %v2206_v46 = vld [vmem:[%s7059_s1 + $0x48] sm:$0xe]  ;;  %v4880_v11 = vcombine.low %v2258_v9, %v2261_v31  ;;  %v7295_v2 = vsel %vm7215_vm14, %v2280_v40, %v2281_v15  ;;  %v4974_v34 = vrot.slane %v4966_v52, 9  ;;  %v2801_v9 = vshrl.u32 %v4930_v25, 16  ;;  %v6015_v31 = vld [vmem:[#allocation8 + $0x140] sm:$0xff]  }
 0x225   : > { %5526 = vmatprep.subr.bf16.mxu1 %v5995_v23  ;;  %v4874_v49 = vrot.slane %v2206_v46, 9  ;;  %v2799_v22 = vrot.slane %v2797_v48, 5  ;;  %v3206_v15 = vrot.slane %v4930_v25, 5  ;;  %v3209_v47 = vrot.slane %v4931_v10, 5  ;;  %v4934_v29 = vld [vmem:[%s7059_s1 + $0x2c] sm:$0x1] }
 0x227   : > { %5479 = vmatmul.mubr.bf16.vlgmr.msra.gmra.mxu1 %v5993_v30  ;;  %v2272_v53 = vsel %vm7215_vm14, %v4874_v49, %v2271_v56  ;;  %v4883_v30 = vcombine.low %v7291_v12, %v7295_v2  ;;  %v2807_v49 = vshll.u32 %v4931_v10, 16  ;;  %v4969_v10 = vld [vmem:[%s7059_s1 + $0x30] sm:$0xe] }
 0x228   : > { %5527 = vmatpush3.bf16.msra.mxu1 %v5995_v23  ;;  %5482 = vmatprep.mubr.bf16.mxu1 %v5998_v61  ;;  %v6010_v23 = vld [vmem:[%s7059_s1 + $0x54] sm:$0xff]   ;;  %v4882_v18 = vcombine.low %v2272_v53, %v2275_v8  ;;  %v2767_v61 = vshll.u32 %v4926_v24, 16  ;;  %v4932_v24 = vld [vmem:[%s7059_s1 + $0x24] sm:$0xf] }
 0x229   : > { %5528 = vmatprep.subr.bf16.mxu1 %v5997_v35  ;;  %v2809_v27 = vrot.slane %v2807_v49, 5  ;;  %v2812_v36 = vshrl.u32 %v4932_v24, 16 }
 0x22a   : > { %5447 = vmatmul.mubr.bf16.vlgmr.msra.gmra.mxu0 %v4877_v45  ;;  %v2769_v20 = vrot.slane %v2767_v61, 5  ;;  %v2815_v61 = vshll.u32 %v4932_v24, 16 }
 0x22b   : > { %5495 = vmatpush3.bf16.msra.mxu0 %v5994_v38  ;;  %5450 = vmatprep.mubr.bf16.mxu0 %v4878_v42  ;;  %v6009_v38 = vld [vmem:[#allocation8 + $0x150] sm:$0xff]   ;;  %v4929_v42 = vld [vmem:[%s7059_s1 + $0x18] sm:$0xf] }
 0x22c   : > { %5529 = vmatpush3.bf16.msra.mxu1 %v5997_v35  ;;  %5496 = vmatprep.subr.bf16.mxu0 %v5996_v43  ;;  %v4927_v35 = vld [vmem:[%s7059_s1 + $0x10] sm:$0xf]  ;;  %v2788_v13 = vshrl.u32 %v4929_v42, 16  ;;  %v2791_v14 = vshll.u32 %v4929_v42, 16 }
 0x22d   : > { %5530 = vmatprep.subr.bf16.mxu1 %v6001_v5  ;;  %v2773_v32 = vshll.u32 %v4927_v35, 16  ;;  %v2777_v4 = vshrl.u32 %v4927_v35, 16  ;;  %v3199_v45 = vrot.slane %v4927_v35, 5 }
 0x22e   : > { %v2793_v46 = vrot.slane %v2791_v14, 5 }
 0x22f   : > { %5483 = vmatmul.mubr.bf16.gmra.mxu1 %v5999_v54  ;;  %5497 = vmatpush3.bf16.msra.mxu0 %v5996_v43  ;;  %v6011_v43 = vld [vmem:[%s7059_s1 + $0x60] sm:$0xff]   ;;  %v2775_v54 = vrot.slane %v2773_v32, 5  ;;  %v2779_v3 = vrot.slane %v2777_v4, 4  ;;  %v3201_v6 = vrot.slane %v3199_v45, 4 }
 0x230   : > { %5531 = vmatpush3.bf16.msra.mxu1 %v6001_v5  ;;  %5498 = vmatprep.subr.bf16.mxu0 %v6000_v7  ;;  %v2785_v5 = vrot.slane %v2783_v58, 5  ;;  %v6016_v58 = vld [vmem:[#allocation8 + $0x1b8] sm:$0xff]  }
 0x231   : > { %5532 = vmatprep.subr.bf16.mxu1 %v6003_v39  ;;  %5486 = vmatprep.mubr.bf16.mxu1 %v6004_v28  ;;  %v4967_v28 = vld [vmem:[%s7059_s1 + $0x18] sm:$0xe]  ;;  %v2780_v56 = vor.u32 %v2779_v3, %v2775_v54  ;;  %v3203_v16 = vsel %vm7215_vm14, %v3201_v6, %v3202_v1  ;;  %v6018_v6 = vld [vmem:[#allocation8 + $0x1b0] sm:$0xff]  }
 0x232   : > { %5451 = vmatmul.mubr.bf16.gmra.mxu0 %v4879_v17  ;;  %v2790_v17 = vrot.slane %v2788_v13, 4  ;;  %v4975_v40 = vrot.slane %v4967_v28, 9 }
 0x233   : > { %5499 = vmatpush3.bf16.msra.mxu0 %v6000_v7  ;;  %5454 = vmatprep.mubr.bf16.mxu0 %v4880_v11  ;;  %v2770_v7 = vor.u32 %v2769_v20, %v2766_v63  ;;  %v2781_v60 = vrot.slane %v2780_v56, 4  ;;  %v2817_v63 = vrot.slane %v2815_v61, 5  ;;  %v2831_v20 = vshll.u32 %v4934_v29, 16 }
 0x234   : > { %5533 = vmatpush3.bf16.msra.mxu1 %v6003_v39  ;;  %5500 = vmatprep.subr.bf16.mxu0 %v6002_v37  ;;  %v3200_v39 = vsel %vm7215_vm14, %v4974_v34, %v3199_v45  ;;  %v2794_v21 = vor.u32 %v2793_v46, %v2790_v17  ;;  %v3207_v53 = vsel %vm7215_vm14, %v4975_v40, %v3206_v15  ;;  %v6019_v45 = vld [vmem:[#allocation8 + $0x1f0] sm:$0xff]   ;;  %v4936_v34 = vld [vmem:[%s7059_s1 + $0x34] sm:$0xf] }
 0x235   : > { %5534 = vmatprep.subr.bf16.mxu1 %v6007_v33  ;;  %v2771_v62 = vrot.slane %v2770_v7, 4  ;;  %v4982_v41 = vcombine.low %v3200_v39, %v3203_v16  ;;  %v3216_v7 = vrot.slane %v4934_v29, 5 }
 0x237   : > { %5487 = vmatmul.mubr.bf16.gmra.mxu1 %v6005_v59  ;;  %5501 = vmatpush3.bf16.msra.mxu0 %v6002_v37  ;;  %v2803_v37 = vrot.slane %v2801_v9, 4  ;;  %v2776_v11 = vsel %vm7087_vm11, %v2771_v62, %v2775_v54  ;;  %v6014_v59 = vld [vmem:[#allocation8 + $0x100] sm:$0xff]   ;;  %v2845_v9 = vshll.u32 %v4936_v34, 16 }
 0x238   : > { %5535 = vmatpush3.bf16.msra.mxu1 %v6007_v33  ;;  %5502 = vmatprep.subr.bf16.mxu0 %v6006_v26  ;;  %v2786_v33 = vsel %vm7087_vm11, %v2781_v60, %v2785_v5  ;;  %v7335_v5 = vld [vmem:[%s7059_s1 + $0x38] sm:$0x1]  ;;  %v6021_v60 = vld [vmem:[#allocation8 + $0x1e8] sm:$0xff]  }
 0x239   : > { %5536 = vmatprep.subr.bf16.mxu1 %v6009_v38  ;;  %5490 = vmatprep.mubr.bf16.mxu1 %v6010_v23  ;;  %v2804_v19 = vor.u32 %v2803_v37, %v2799_v22  ;;  %v4950_v8 = vcombine.low %v2776_v11, %v2786_v33  ;;  %v6017_v23 = vld [vmem:[#allocation8 + $0x1f8] sm:$0xff]   ;;  %v2855_v46 = vshll.u32 %v7335_v5, 16  ;;  %v2847_v49 = vrot.slane %v2845_v9, 5 }
 0x23a   : > { %5455 = vmatmul.mubr.bf16.gmra.mxu0 %v4881_v44  ;;  %v4977_v33 = vrot.slane %v4969_v10, 9 }
 0x23b   : > { %5503 = vmatpush3.bf16.msra.mxu0 %v6006_v26  ;;  %5458 = vmatprep.mubr.bf16.mxu0 %v4882_v18  ;;  %v2795_v26 = vrot.slane %v2794_v21, 4  ;;  %v2805_v44 = vrot.slane %v2804_v19, 4  ;;  %v4938_v19 = vld [vmem:[%s7059_s1 + $0x3c] sm:$0xf] }
 0x23c   : > { %5537 = vmatpush3.bf16.msra.mxu1 %v6009_v38  ;;  %5504 = vmatprep.subr.bf16.mxu0 %v6008_v55  ;;  %v3208_v38 = vrot.slane %v3206_v15, 4  ;;  %v2857_v15 = vrot.slane %v2855_v46, 5  ;;  %v2860_v24 = vshrl.u32 %v4938_v19, 16 }
 0x23d   : > { %5538 = vmatprep.subr.bf16.mxu1 %v6013_v50  ;;  %v2800_v18 = vsel %vm7087_vm11, %v2795_v26, %v2799_v22  ;;  %v2810_v32 = vsel %vm7087_vm11, %v2805_v44, %v2809_v27  ;;  %v6020_v26 = vld [vmem:[#allocation8 + $0x1a8] sm:$0xff]  }
 0x23e   : > { %v3210_v35 = vsel %vm7215_vm14, %v3208_v38, %v3209_v47  ;;  %v4951_v52 = vcombine.low %v2800_v18, %v2810_v32  ;;  %v4939_v38 = vld [vmem:[%s7059_s1 + $0x40] sm:$0xf] }
 0x23f   : > { %5491 = vmatmul.mubr.bf16.gmra.mxu1 %v6011_v43  ;;  %5505 = vmatpush3.bf16.msra.mxu0 %v6008_v55  ;;  %v4933_v55 = vld [vmem:[%s7059_s1 + $0x28] sm:$0xf]  ;;  %v4983_v4 = vcombine.low %v3207_v53, %v3210_v35  ;;  %v2814_v43 = vrot.slane %v2812_v36, 4  ;;  %v6023_v53 = vld [vmem:[#allocation8 + $0x1e0] sm:$0xff]   ;;  %v2869_v18 = vshll.u32 %v4939_v38, 16  ;;  %v2873_v61 = vshrl.u32 %v4939_v38, 16 }
 0x240   : > { %5539 = vmatpush3.bf16.msra.mxu1 %v6013_v50  ;;  %5506 = vmatprep.subr.bf16.mxu0 %v6012_v51  ;;  %v4968_v50 = vld [vmem:[%s7059_s1 + $0x24] sm:$0xe]  ;;  %v2821_v12 = vshll.u32 %v4933_v55, 16  ;;  %v2825_v2 = vshrl.u32 %v4933_v55, 16  ;;  %v3213_v3 = vrot.slane %v4933_v55, 5  ;;  %v2863_v55 = vshll.u32 %v4938_v19, 16 }
 0x241   : > { %5540 = vmatprep.subr.bf16.mxu1 %v6015_v31  ;;  %5542 = vmatprep.mubr.bf16.mxu1 %v4982_v41  ;;  %v4976_v54 = vrot.slane %v4968_v50, 9  ;;  %v2818_v25 = vor.u32 %v2817_v63, %v2814_v43  ;;  %v4970_v50 = vld [vmem:[%s7059_s1 + $0x3c] sm:$0xe]  ;;  %v4941_v63 = vld [vmem:[%s7059_s1 + $0x48] sm:$0xf] }
 0x242   : > { %5459 = vmatmul.mubr.bf16.gmra.mxu0 %v4883_v30  ;;  %v4935_v30 = vld [vmem:[%s7059_s1 + $0x30] sm:$0xf]  ;;  %v2823_v1 = vrot.slane %v2821_v12, 5  ;;  %v2827_v42 = vrot.slane %v2825_v2, 4  ;;  %v3215_v28 = vrot.slane %v3213_v3, 4  ;;  %v2865_v12 = vrot.slane %v2863_v55, 5 }
 0x243   : > { %5507 = vmatpush3.bf16.msra.mxu0 %v6012_v51  ;;  %5510 = vmatprep.mubr.bf16.mxu0 %v4950_v8  ;;  %v2833_v51 = vrot.slane %v2831_v20, 5  ;;  %v2836_v39 = vshrl.u32 %v4935_v30, 16  ;;  %v3214_v14 = vsel %vm7215_vm14, %v4976_v54, %v3213_v3  ;;  %v2839_v56 = vshll.u32 %v4935_v30, 16  ;;  %v4942_v20 = vld [vmem:[%s7059_s1 + $0x4c] sm:$0xf] }
 0x244   : > { %5541 = vmatpush3.bf16.msra.mxu1 %v6015_v31  ;;  %5508 = vmatprep.subr.bf16.mxu0 %v6014_v59  ;;  %v2828_v13 = vor.u32 %v2827_v42, %v2823_v1  ;;  %v2819_v16 = vrot.slane %v2818_v25, 4  ;;  %v2849_v31 = vshrl.u32 %v4936_v34, 16  ;;  %v3217_v41 = vsel %vm7215_vm14, %v3215_v28, %v3216_v7  ;;  %v7363_v3 = vld [vmem:[%s7059_s1 + $0x50] sm:$0x1]  ;;  %v4944_v19 = vld [vmem:[%s7059_s1 + $0x54] sm:$0xf] }
 0x245   : > { %5590 = vmatprep.subr.bf16.mxu1 %v6017_v23  ;;  %v2838_v48 = vrot.slane %v2836_v39, 4  ;;  %v2841_v17 = vrot.slane %v2839_v56, 5  ;;  %v4984_v37 = vcombine.low %v3214_v14, %v3217_v41  ;;  %v3223_v8 = vrot.slane %v7335_v5, 5  ;;  %v6025_v5 = vld [vmem:[#allocation8 + $0x1d8] sm:$0xff]   ;;  %v4971_v39 = vld [vmem:[%s7059_s1 + $0x48] sm:$0xe] }
 0x246   : > { %v2829_v62 = vrot.slane %v2828_v13, 4  ;;  %v2824_v22 = vsel %vm7087_vm11, %v2819_v16, %v2823_v1  ;;  %v2851_v11 = vrot.slane %v2849_v31, 4  ;;  %v2871_v2 = vrot.slane %v2869_v18, 5  ;;  %v6024_v31 = vld [vmem:[#allocation8 + $0x198] sm:$0xff]  }
 0x247   : > { %5543 = vmatmul.mubr.bf16.vlgmr.msra.gmra.mxu1 %v4983_v4  ;;  %5509 = vmatpush3.bf16.msra.mxu0 %v6014_v59  ;;  %v2842_v40 = vor.u32 %v2841_v17, %v2838_v48  ;;  %v3220_v59 = vrot.slane %v4936_v34, 5  ;;  %v6022_v4 = vld [vmem:[#allocation8 + $0x1a0] sm:$0xff]   ;;  %v4978_v54 = vrot.slane %v4970_v50, 9  ;;  %v2884_v13 = vshrl.u32 %v4941_v63, 16  ;;  %v4972_v50 = vld [vmem:[%s7059_s1 + $0x54] sm:$0xe] }
 0x248   : > { %5591 = vmatpush3.bf16.msra.mxu1 %v6017_v23  ;;  %5558 = vmatprep.subr.bf16.mxu0 %v6016_v58  ;;  %v2834_v21 = vsel %vm7087_vm11, %v2829_v62, %v2833_v51  ;;  %v2852_v47 = vor.u32 %v2851_v11, %v2847_v49  ;;  %v4940_v23 = vld [vmem:[%s7059_s1 + $0x44] sm:$0x1]  ;;  %v3227_v51 = vrot.slane %v4939_v38, 5  ;;  %v2887_v14 = vshll.u32 %v4941_v63, 16  ;;  %v4947_v63 = vld [vmem:[%s7059_s1 + $0x60] sm:$0xf] }
 0x249   : > { %5592 = vmatprep.subr.bf16.mxu1 %v6019_v45  ;;  %v4952_v27 = vcombine.low %v2824_v22, %v2834_v21  ;;  %5546 = vmatprep.mubr.bf16.mxu1 %v4984_v37  ;;  %v2843_v44 = vrot.slane %v2842_v40, 4  ;;  %v3221_v29 = vsel %vm7215_vm14, %v4977_v33, %v3220_v59  ;;  %v3222_v36 = vrot.slane %v3220_v59, 4  ;;  %v6029_v38 = vld [vmem:[#allocation8 + $0x1c8] sm:$0xff]  }
 0x24a   : > { %5511 = vmatmul.mubr.bf16.vlgmr.msra.gmra.mxu0 %v4951_v52  ;;  %v2853_v35 = vrot.slane %v2852_v47, 4  ;;  %v2879_v43 = vshll.u32 %v4940_v23, 16  ;;  %v3230_v7 = vrot.slane %v4940_v23, 5  ;;  %v2893_v28 = vshll.u32 %v4942_v20, 16  ;;  %v4946_v23 = vld [vmem:[%s7059_s1 + $0x5c] sm:$0x1] }
 0x24b   : > { %5559 = vmatpush3.bf16.msra.mxu0 %v6016_v58  ;;  %5514 = vmatprep.mubr.bf16.mxu0 %v4952_v27  ;;  %v2848_v32 = vsel %vm7087_vm11, %v2843_v44, %v2847_v49  ;;  %v2862_v58 = vrot.slane %v2860_v24, 4  ;;  %v3224_v52 = vsel %vm7215_vm14, %v3222_v36, %v3223_v8  ;;  %v3228_v16 = vsel %vm7215_vm14, %v4978_v54, %v3227_v51  ;;  %v4945_v27 = vld [vmem:[%s7059_s1 + $0x58] sm:$0xf] }
 0x24c   : > { %5593 = vmatpush3.bf16.msra.mxu1 %v6019_v45  ;;  %5560 = vmatprep.subr.bf16.mxu0 %v6018_v6  ;;  %v2858_v30 = vsel %vm7087_vm11, %v2853_v35, %v2857_v15  ;;  %v2875_v45 = vrot.slane %v2873_v61, 4  ;;  %v4985_v1 = vcombine.low %v3221_v29, %v3224_v52  ;;  %v2881_v25 = vrot.slane %v2879_v43, 5 }
 0x24d   : > { %5594 = vmatprep.subr.bf16.mxu1 %v6021_v60  ;;  %v4953_v34 = vcombine.low %v2848_v32, %v2858_v30  ;;  %v2866_v42 = vor.u32 %v2865_v12, %v2862_v58  ;;  %v3229_v48 = vrot.slane %v3227_v51, 4  ;;  %v2897_v9 = vshrl.u32 %v4942_v20, 16 }
 0x24e   : > { %v2886_v41 = vrot.slane %v2884_v13, 4  ;;  %v2889_v17 = vrot.slane %v2887_v14, 5  ;;  %v2895_v46 = vrot.slane %v2893_v28, 5  ;;  %v2903_v11 = vshll.u32 %v7363_v3, 16 }
 0x24f   : > { %5561 = vmatpush3.bf16.msra.mxu0 %v6018_v6  ;;  %v2876_v6 = vor.u32 %v2875_v45, %v2871_v2  ;;  %5547 = vmatmul.mubr.bf16.gmra.mxu1 %v4985_v1  ;;  %v2867_v10 = vrot.slane %v2866_v42, 4  ;;  %v3231_v37 = vsel %vm7215_vm14, %v3229_v48, %v3230_v7  ;;  %v2899_v49 = vrot.slane %v2897_v9, 4 }
 0x250   : > { %5595 = vmatpush3.bf16.msra.mxu1 %v6021_v60  ;;  %5562 = vmatprep.subr.bf16.mxu0 %v6020_v26  ;;  %v6027_v60 = vld [vmem:[#allocation8 + $0x1d0] sm:$0xff]   ;;  %v4986_v40 = vcombine.low %v3228_v16, %v3231_v37  ;;  %v2890_v15 = vor.u32 %v2889_v17, %v2886_v41  ;;  %v4979_v33 = vrot.slane %v4971_v39, 9  ;;  %v2905_v59 = vrot.slane %v2903_v11, 5  ;;  %v4973_v39 = vld [vmem:[%s7059_s1 + $0x60] sm:$0xe] }
 0x251   : > { %5596 = vmatprep.subr.bf16.mxu1 %v6023_v53  ;;  %v2877_v56 = vrot.slane %v2876_v6, 4  ;;  %v2872_v62 = vsel %vm7087_vm11, %v2867_v10, %v2871_v2  ;;  %v2900_v47 = vor.u32 %v2899_v49, %v2895_v46  ;;  %v3234_v8 = vrot.slane %v4942_v20, 5  ;;  %v6028_v2 = vld [vmem:[#allocation8 + $0x188] sm:$0xff]  }
 0x252   : > { %5515 = vmatmul.mubr.bf16.gmra.mxu0 %v4953_v34  ;;  %5550 = vmatprep.mubr.bf16.mxu1 %v4986_v40  ;;  %v2891_v44 = vrot.slane %v2890_v15, 4  ;;  %v2908_v24 = vshrl.u32 %v4944_v19, 16  ;;  %v2911_v55 = vshll.u32 %v4944_v19, 16  ;;  %v2917_v18 = vshll.u32 %v4945_v27, 16  ;;  %v4948_v20 = vld [vmem:[%s7059_s1 + $0x64] sm:$0xf] }
 0x253   : > { %5563 = vmatpush3.bf16.msra.mxu0 %v6020_v26  ;;  %v2882_v22 = vsel %vm7087_vm11, %v2877_v56, %v2881_v25  ;;  %v3237_v26 = vrot.slane %v7363_v3, 5  ;;  %v2901_v35 = vrot.slane %v2900_v47, 4  ;;  %v3235_v29 = vsel %vm7215_vm14, %v4979_v33, %v3234_v8  ;;  %v7391_v3 = vld [vmem:[%s7059_s1 + $0x68] sm:$0x1] }
 0x254   : > { %5597 = vmatpush3.bf16.msra.mxu1 %v6023_v53  ;;  %5564 = vmatprep.subr.bf16.mxu0 %v6022_v4  ;;  %v4954_v21 = vcombine.low %v2872_v62, %v2882_v22  ;;  %v6026_v53 = vld [vmem:[#allocation8 + $0x190] sm:$0xff]   ;;  %v3236_v36 = vrot.slane %v3234_v8, 4  ;;  %v2921_v61 = vshrl.u32 %v4945_v27, 16  ;;  %v2896_v32 = vsel %vm7087_vm11, %v2891_v44, %v2895_v46  ;;  %v5032_v8 = vld [vmem:[%s7059_s1 + $0x18] sm:$0xf] }
 0x255   : > { %5598 = vmatprep.subr.bf16.mxu1 %v6025_v5  ;;  %v2913_v58 = vrot.slane %v2911_v55, 5  ;;  %v2919_v12 = vrot.slane %v2917_v18, 5  ;;  %v2906_v30 = vsel %vm7087_vm11, %v2901_v35, %v2905_v59  ;;  %v2927_v43 = vshll.u32 %v4946_v23, 16 }
 0x256   : > { %5518 = vmatprep.mubr.bf16.mxu0 %v4954_v21  ;;  %v3238_v52 = vsel %vm7215_vm14, %v3236_v36, %v3237_v26  ;;  %v2923_v45 = vrot.slane %v2921_v61, 4  ;;  %v4955_v34 = vcombine.low %v2896_v32, %v2906_v30  ;;  %v4980_v54 = vrot.slane %v4972_v50, 9  ;;  %v7428_v30 = vld [vmem:[%s7059_s1 + $0x28] sm:$0xf] }
 0x257   : > { %5565 = vmatpush3.bf16.msra.mxu0 %v6022_v4  ;;  %v2910_v4 = vrot.slane %v2908_v24, 4  ;;  %v4987_v1 = vcombine.low %v3235_v29, %v3238_v52  ;;  %v2929_v25 = vrot.slane %v2927_v43, 5  ;;  %v3241_v51 = vrot.slane %v4945_v27, 5  ;;  %v6032_v29 = vld [vmem:[%s7059_s1 + $0x18] sm:$0xff]  }
 0x258   : > { %5599 = vmatpush3.bf16.msra.mxu1 %v6025_v5  ;;  %5566 = vmatprep.subr.bf16.mxu0 %v6024_v31  ;;  %v6031_v5 = vld [vmem:[#allocation8 + $0x1c0] sm:$0xff]   ;;  %v2924_v6 = vor.u32 %v2923_v45, %v2919_v12  ;;  %v3244_v7 = vrot.slane %v4946_v23, 5  ;;  %v2932_v13 = vshrl.u32 %v4947_v63, 16  ;;  %v2935_v14 = vshll.u32 %v4947_v63, 16 }
 0x259   : > { %5600 = vmatprep.subr.bf16.mxu1 %v6027_v60  ;;  %v2914_v42 = vor.u32 %v2913_v58, %v2910_v4  ;;  %5551 = vmatmul.mubr.bf16.gmra.mxu1 %v4987_v1  ;;  %v2941_v28 = vshll.u32 %v4948_v20, 16  ;;  %v3242_v16 = vsel %vm7215_vm14, %v4980_v54, %v3241_v51  ;;  %v3243_v48 = vrot.slane %v3241_v51, 4 }
 0x25a   : > { %5519 = vmatmul.mubr.bf16.gmra.mxu0 %v4955_v34  ;;  %v2925_v56 = vrot.slane %v2924_v6, 4  ;;  %v2945_v9 = vshrl.u32 %v4948_v20, 16  ;;  %v2934_v41 = vrot.slane %v2932_v13, 4  ;;  %v2937_v17 = vrot.slane %v2935_v14, 5  ;;  %v6033_v13 = vld [vmem:[%s7059_s1 + $0x24] sm:$0xff]  }
 0x25b   : > { %5567 = vmatpush3.bf16.msra.mxu0 %v6024_v31  ;;  %v2915_v10 = vrot.slane %v2914_v42, 4  ;;  %v6030_v31 = vld [vmem:[#allocation8 + $0x180] sm:$0xff]   ;;  %v2943_v46 = vrot.slane %v2941_v28, 5  ;;  %v3245_v37 = vsel %vm7215_vm14, %v3243_v48, %v3244_v7  ;;  %v2951_v11 = vshll.u32 %v7391_v3, 16 }
 0x25c   : > { %5601 = vmatpush3.bf16.msra.mxu1 %v6027_v60  ;;  %5568 = vmatprep.subr.bf16.mxu0 %v6026_v53  ;;  %v7398_v60 = vld [vmem:[#allocation8 + $0x238] sm:$0xff]   ;;  %v2930_v22 = vsel %vm7087_vm11, %v2925_v56, %v2929_v25  ;;  %v2947_v49 = vrot.slane %v2945_v9, 4  ;;  %v4988_v40 = vcombine.low %v3242_v16, %v3245_v37  ;;  %v2938_v15 = vor.u32 %v2937_v17, %v2934_v41  ;;  %v7446_v17 = vld [vmem:[#allocation8 + $0x230] sm:$0xff]  }
 0x25d   : > { %5602 = vmatprep.subr.bf16.mxu1 %v6029_v38  ;;  %v2920_v62 = vsel %vm7087_vm11, %v2915_v10, %v2919_v12  ;;  %v4981_v33 = vrot.slane %v4973_v39, 9  ;;  %v2953_v27 = vrot.slane %v2951_v11, 5  ;;  %v3248_v47 = vrot.slane %v4948_v20, 5  ;;  %v7431_v20 = vld [vmem:[%s7059_s1 + $0x2c] sm:$0x1] }
 0x25e   : > { %v4956_v21 = vcombine.low %v2920_v62, %v2930_v22  ;;  %v2948_v19 = vor.u32 %v2947_v49, %v2943_v46  ;;  %v3251_v59 = vrot.slane %v7391_v3, 5  ;;  %5554 = vmatprep.mubr.bf16.mxu1 %v4988_v40  ;;  %v2939_v26 = vrot.slane %v2938_v15, 4  ;;  %v5038_v9 = vld [vmem:[%s7059_s1 + $0x30] sm:$0xf] }
 0x25f   : > { %5569 = vmatpush3.bf16.msra.mxu0 %v6026_v53  ;;  %v7408_v53 = vld [vmem:[%s7059_s1 + $0x1c] sm:$0xf]  ;;  %v3734_v44 = vshrl.u32 %v5032_v8, 16  ;;  %v3249_v24 = vsel %vm7215_vm14, %v4981_v33, %v3248_v47  ;;  %v3250_v55 = vrot.slane %v3248_v47, 4  ;;  %v3737_v18 = vshll.u32 %v5032_v8, 16 }
 0x260   : > { %5603 = vmatpush3.bf16.msra.mxu1 %v6029_v38  ;;  %5570 = vmatprep.subr.bf16.mxu0 %v6028_v2  ;;  %v7411_v38 = vld [vmem:[%s7059_s1 + $0x20] sm:$0x1]  ;;  %v2949_v23 = vrot.slane %v2948_v19, 4  ;;  %v2944_v35 = vsel %vm7087_vm11, %v2939_v26, %v2943_v46  ;;  %v3743_v61 = vshll.u32 %v7408_v53, 16  ;;  %v3747_v50 = vshrl.u32 %v7408_v53, 16 }
 0x261   : > { %5604 = vmatprep.subr.bf16.mxu1 %v6031_v5  ;;  %5522 = vmatprep.mubr.bf16.mxu0 %v4956_v21  ;;  %v3736_v36 = vrot.slane %v3734_v44, 4  ;;  %v3252_v4 = vsel %vm7215_vm14, %v3250_v55, %v3251_v59  ;;  %v3739_v58 = vrot.slane %v3737_v18, 5  ;;  %v3753_v12 = vshll.u32 %v7411_v38, 16  ;;  %v7449_v46 = vld [vmem:[%s7059_s1 + $0x38] sm:$0x1]  ;;  %v6036_v21 = vld [vmem:[%s7059_s1 + $0x30] sm:$0xff]  }
 0x262   : > { %v2954_v32 = vsel %vm7087_vm11, %v2949_v23, %v2953_v27  ;;  %v4989_v45 = vcombine.low %v3249_v24, %v3252_v4  ;;  %v3745_v43 = vrot.slane %v3743_v61, 5  ;;  %v3749_v63 = vrot.slane %v3747_v50, 4  ;;  %v5041_v59 = vld [vmem:[%s7059_s1 + $0x3c] sm:$0xf]  ;;  %v7459_v23 = vld [vmem:[%s7059_s1 + $0x40] sm:$0xf] }
 0x263   : > { %5571 = vmatpush3.bf16.msra.mxu0 %v6028_v2  ;;  %v5035_v2 = vld [vmem:[%s7059_s1 + $0x24] sm:$0xf]  ;;  %v4957_v52 = vcombine.low %v2944_v35, %v2954_v32  ;;  %v3740_v34 = vor.u32 %v3739_v58, %v3736_v36  ;;  %v3755_v1 = vrot.slane %v3753_v12, 5  ;;  %v3771_v6 = vshrl.u32 %v7428_v30, 16 }
 0x264   : > { %5605 = vmatpush3.bf16.msra.mxu1 %v6031_v5  ;;  %5572 = vmatprep.subr.bf16.mxu0 %v6030_v31  ;;  %v3758_v42 = vshrl.u32 %v5035_v2, 16  ;;  %v3761_v54 = vshll.u32 %v5035_v2, 16  ;;  %v3750_v3 = vor.u32 %v3749_v63, %v3745_v43  ;;  %v3767_v5 = vshll.u32 %v7428_v30, 16  ;;  %v7462_v24 = vld [vmem:[%s7059_s1 + $0x44] sm:$0x1] }
 0x265   : > { %5670 = vmatprep.subr.bf16.mxu1 %v7398_v60  ;;  %5523 = vmatmul.mubr.bf16.gmra.mxu0 %v4957_v52  ;;  %v3777_v25 = vshll.u32 %v7431_v20, 16  ;;  %v3741_v51 = vrot.slane %v3740_v34, 4  ;;  %v3773_v28 = vrot.slane %v3771_v6, 4  ;;  %v3782_v22 = vshrl.u32 %v5038_v9, 16  ;;  %v7466_v36 = vld [vmem:[#allocation8 + $0x228] sm:$0xff]  }
 0x266   : > { %5555 = vmatmul.mubr.bf16.gmra.mxu1 %v4989_v45  ;;  %5574 = vmatprep.mubr.bf16.mxu0 %v6032_v29  ;;  %v3760_v7 = vrot.slane %v3758_v42, 4  ;;  %v3763_v39 = vrot.slane %v3761_v54, 5  ;;  %v3751_v10 = vrot.slane %v3750_v3, 4  ;;  %v3769_v14 = vrot.slane %v3767_v5, 5  ;;  %v6040_v3 = vld [vmem:[%s7059_s1 + $0x48] sm:$0xff]  }
 0x267   : > { %5573 = vmatpush3.bf16.msra.mxu0 %v6030_v31  ;;  %v3779_v56 = vrot.slane %v3777_v25, 5  ;;  %v3746_v16 = vsel %vm7087_vm11, %v3741_v51, %v3745_v43  ;;  %v7442_v31 = vld [vmem:[%s7059_s1 + $0x34] sm:$0xf]  ;;  %v3785_v37 = vshll.u32 %v5038_v9, 16  ;;  %v3784_v19 = vrot.slane %v3782_v22, 4  ;;  %v6037_v43 = vld [vmem:[%s7059_s1 + $0x3c] sm:$0xff]  }
 0x268   : > { %5622 = vmatprep.subr.bf16.mxu0 %v7398_v60  ;;  %v3764_v48 = vor.u32 %v3763_v39, %v3760_v7  ;;  %v3756_v62 = vsel %vm7087_vm11, %v3751_v10, %v3755_v1  ;;  %v3774_v41 = vor.u32 %v3773_v28, %v3769_v14  ;;  %v3791_v40 = vshll.u32 %v7442_v31, 16  ;;  %v5044_v5 = vld [vmem:[%s7059_s1 + $0x48] sm:$0xf]  ;;  %v7480_v6 = vld [vmem:[%s7059_s1 + $0x4c] sm:$0xf] }
 0x269   : > { %v5056_v49 = vcombine.low %v3746_v16, %v3756_v62  ;;  %v3795_v15 = vshrl.u32 %v7442_v31, 16  ;;  %v3787_v27 = vrot.slane %v3785_v37, 5  ;;  %v3801_v47 = vshll.u32 %v7449_v46, 16  ;;  %v7489_v7 = vld [vmem:[%s7059_s1 + $0x50] sm:$0x1] }
 0x26a   : > { %v3765_v11 = vrot.slane %v3764_v48, 4  ;;  %v3775_v33 = vrot.slane %v3774_v41, 4  ;;  %v3793_v26 = vrot.slane %v3791_v40, 5  ;;  %v3806_v29 = vshrl.u32 %v5041_v59, 16  ;;  %v5047_v16 = vld [vmem:[%s7059_s1 + $0x54] sm:$0xf] }
 0x26b   : > { %5606 = vmatprep.mubr.bf16.mxu1 %v5056_v49  ;;  %v3797_v44 = vrot.slane %v3795_v15, 4  ;;  %v3788_v18 = vor.u32 %v3787_v27, %v3784_v19  ;;  %v3803_v35 = vrot.slane %v3801_v47, 5  ;;  %v3809_v32 = vshll.u32 %v5041_v59, 16  ;;  %v7497_v22 = vld [vmem:[%s7059_s1 + $0x58] sm:$0xf] }
 0x26c   : > { %v3770_v8 = vsel %vm7087_vm11, %v3765_v11, %v3769_v14  ;;  %v3780_v55 = vsel %vm7087_vm11, %v3775_v33, %v3779_v56  ;;  %v3815_v4 = vshll.u32 %v7459_v23, 16  ;;  %v3808_v12 = vrot.slane %v3806_v29, 4  ;;  %v6042_v29 = vld [vmem:[#allocation8 + $0x218] sm:$0xff]  }
 0x26d   : > { %5575 = vmatmul.mubr.bf16.vlgmr.msra.gmra.mxu0 %v6033_v13  ;;  %v5057_v61 = vcombine.low %v3770_v8, %v3780_v55  ;;  %v3798_v50 = vor.u32 %v3797_v44, %v3793_v26  ;;  %v3789_v58 = vrot.slane %v3788_v18, 4  ;;  %v3819_v2 = vshrl.u32 %v7459_v23, 16  ;;  %v6041_v55 = vld [vmem:[%s7059_s1 + $0x54] sm:$0xff]  }
 0x26e   : > { %5623 = vmatpush3.bf16.msra.mxu0 %v7398_v60  ;;  %5578 = vmatprep.mubr.bf16.mxu0 %v6036_v21  ;;  %v3825_v52 = vshll.u32 %v7462_v24, 16  ;;  %v3811_v63 = vrot.slane %v3809_v32, 5  ;;  %v3817_v34 = vrot.slane %v3815_v4, 5  ;;  %v3830_v39 = vshrl.u32 %v5044_v5, 16  ;;  %v7501_v21 = vld [vmem:[%s7059_s1 + $0x5c] sm:$0x1] }
 0x26f   : > { %5624 = vmatprep.subr.bf16.mxu0 %v7446_v17  ;;  %5607 = vmatmul.mubr.bf16.vlgmr.msra.gmra.mxu1 %v5057_v61  ;;  %v3799_v45 = vrot.slane %v3798_v50, 4  ;;  %v3794_v1 = vsel %vm7087_vm11, %v3789_v58, %v3793_v26  ;;  %v3821_v42 = vrot.slane %v3819_v2, 4  ;;  %v3833_v10 = vshll.u32 %v5044_v5, 16 }
 0x270   : > { %5678 = vmatpush3.bf16.msra.mxu1 %v7398_v60  ;;  %v3827_v54 = vrot.slane %v3825_v52, 5  ;;  %v3812_v51 = vor.u32 %v3811_v63, %v3808_v12  ;;  %v7486_v60 = vld [vmem:[#allocation8 + $0x220] sm:$0xff]   ;;  %v3839_v28 = vshll.u32 %v7480_v6, 16  ;;  %v3843_v56 = vshrl.u32 %v7480_v6, 16 }
 0x271   : > { %5671 = vmatprep.subr.bf16.mxu1 %v7446_v17  ;;  %v3804_v25 = vsel %vm7087_vm11, %v3799_v45, %v3803_v35  ;;  %v3822_v14 = vor.u32 %v3821_v42, %v3817_v34  ;;  %v3832_v9 = vrot.slane %v3830_v39, 4  ;;  %v3835_v62 = vrot.slane %v3833_v10, 5  ;;  %v7520_v45 = vld [vmem:[#allocation8 + $0x210] sm:$0xff]   ;;  %v6044_v42 = vld [vmem:[%s7059_s1 + $0x60] sm:$0xff]  }
 0x272   : > { %5625 = vmatpush3.bf16.msra.mxu0 %v7446_v17  ;;  %v5058_v13 = vcombine.low %v3794_v1, %v3804_v25  ;;  %v3813_v48 = vrot.slane %v3812_v51, 4  ;;  %v3849_v41 = vshll.u32 %v7489_v7, 16  ;;  %v3841_v49 = vrot.slane %v3839_v28, 5 }
 0x273   : > { %5626 = vmatprep.subr.bf16.mxu0 %v7466_v36  ;;  %v3823_v37 = vrot.slane %v3822_v14, 4  ;;  %v3845_v11 = vrot.slane %v3843_v56, 4  ;;  %v3854_v40 = vshrl.u32 %v5047_v16, 16  ;;  %v3836_v33 = vor.u32 %v3835_v62, %v3832_v9  ;;  %v5053_v56 = vld [vmem:[%s7059_s1 + $0x6c] sm:$0xf] }
 0x274   : > { %5679 = vmatpush3.bf16.msra.mxu1 %v7446_v17  ;;  %5610 = vmatprep.mubr.bf16.mxu1 %v5058_v13  ;;  %v3818_v15 = vsel %vm7087_vm11, %v3813_v48, %v3817_v34  ;;  %v3851_v19 = vrot.slane %v3849_v41, 5  ;;  %v3857_v27 = vshll.u32 %v5047_v16, 16  ;;  %v3863_v8 = vshll.u32 %v7497_v22, 16  ;;  %v7545_v62 = vld [vmem:[%s7059_s1 + $0x70] sm:$0xf] }
 0x275   : > { %5579 = vmatmul.mubr.bf16.gmra.mxu0 %v6037_v43  ;;  %5672 = vmatprep.subr.bf16.mxu1 %v7466_v36  ;;  %v3828_v17 = vsel %vm7087_vm11, %v3823_v37, %v3827_v54  ;;  %v3846_v47 = vor.u32 %v3845_v11, %v3841_v49  ;;  %v3856_v59 = vrot.slane %v3854_v40, 4  ;;  %v3837_v44 = vrot.slane %v3836_v33, 4  ;;  %v7524_v43 = vld [vmem:[%s7059_s1 + $0x64] sm:$0xf]  ;;  %v7535_v54 = vld [vmem:[%s7059_s1 + $0x68] sm:$0x1] }
 0x276   : > { %5627 = vmatpush3.bf16.msra.mxu0 %v7466_v36  ;;  %5582 = vmatprep.mubr.bf16.mxu0 %v6040_v3  ;;  %v5059_v26 = vcombine.low %v3818_v15, %v3828_v17  ;;  %v3859_v18 = vrot.slane %v3857_v27, 5  ;;  %v3867_v35 = vshrl.u32 %v7497_v22, 16  ;;  %v3865_v50 = vrot.slane %v3863_v8, 5  ;;  %v7548_v41 = vld [vmem:[%s7059_s1 + $0x74] sm:$0x1] }
 0x277   : > { %5628 = vmatprep.subr.bf16.mxu0 %v7486_v60  ;;  %v3847_v61 = vrot.slane %v3846_v47, 4  ;;  %v3873_v32 = vshll.u32 %v7501_v21, 16  ;;  %v4204_v4 = vrot.slane %v7497_v22, 5  ;;  %v3842_v58 = vsel %vm7087_vm11, %v3837_v44, %v3841_v49 }
 0x278   : > { %5680 = vmatpush3.bf16.msra.mxu1 %v7466_v36  ;;  %v3860_v12 = vor.u32 %v3859_v18, %v3856_v59  ;;  %v3869_v2 = vrot.slane %v3867_v35, 4  ;;  %v4207_v52 = vrot.slane %v7501_v21, 5  ;;  %v5050_v36 = vld [vmem:[%s7059_s1 + $0x60] sm:$0xf]  ;;  %v3887_v13 = vshll.u32 %v7524_v43, 16 }
 0x279   : > { %5611 = vmatmul.mubr.bf16.gmra.mxu1 %v5059_v26  ;;  %5673 = vmatprep.subr.bf16.mxu1 %v7486_v60  ;;  %v3852_v63 = vsel %vm7087_vm11, %v3847_v61, %v3851_v19  ;;  %v3875_v34 = vrot.slane %v3873_v32, 5  ;;  %v7531_v1 = vrot.slane %v4204_v4, 4  ;;  %v3878_v3 = vshrl.u32 %v5050_v36, 16  ;;  %v5072_v26 = vld [vmem:[%s7059_s1 + $0x18] sm:$0xe] }
 0x27a   : > { %5629 = vmatpush3.bf16.msra.mxu0 %v7486_v60  ;;  %v5060_v5 = vcombine.low %v3842_v58, %v3852_v63  ;;  %v3861_v25 = vrot.slane %v3860_v12, 4  ;;  %v3870_v51 = vor.u32 %v3869_v2, %v3865_v50  ;;  %v3881_v39 = vshll.u32 %v5050_v36, 16  ;;  %v5076_v12 = vld [vmem:[%s7059_s1 + $0x48] sm:$0xe] }
 0x27b   : > { %5630 = vmatprep.subr.bf16.mxu0 %v6042_v29  ;;  %v3880_v10 = vrot.slane %v3878_v3, 4  ;;  %v3891_v14 = vshrl.u32 %v7524_v43, 16  ;;  %v3897_v28 = vshll.u32 %v7535_v54, 16  ;;  %v3889_v37 = vrot.slane %v3887_v13, 5  ;;  %v5073_v3 = vld [vmem:[%s7059_s1 + $0x24] sm:$0xe] }
 0x27c   : > { %5681 = vmatpush3.bf16.msra.mxu1 %v7486_v60  ;;  %5614 = vmatprep.mubr.bf16.mxu1 %v5060_v5  ;;  %v3866_v16 = vsel %vm7087_vm11, %v3861_v25, %v3865_v50  ;;  %v3871_v48 = vrot.slane %v3870_v51, 4  ;;  %v3883_v9 = vrot.slane %v3881_v39, 5  ;;  %v7550_v60 = vld [vmem:[#allocation8 + $0x208] sm:$0xff]   ;;  %v3902_v40 = vshrl.u32 %v5053_v56, 16 }
 0x27d   : > { %5583 = vmatmul.mubr.bf16.gmra.mxu0 %v6041_v55  ;;  %5674 = vmatprep.subr.bf16.mxu1 %v6042_v29  ;;  %v3893_v49 = vrot.slane %v3891_v14, 4  ;;  %v3899_v11 = vrot.slane %v3897_v28, 5  ;;  %v3905_v19 = vshll.u32 %v5053_v56, 16  ;;  %v3911_v27 = vshll.u32 %v7545_v62, 16  ;;  %v6045_v55 = vld [vmem:[%s7059_s1 + $0x6c] sm:$0xff]  }
 0x27e   : > { %5631 = vmatpush3.bf16.msra.mxu0 %v6042_v29  ;;  %v3876_v15 = vsel %vm7087_vm11, %v3871_v48, %v3875_v34  ;;  %5586 = vmatprep.mubr.bf16.mxu0 %v6044_v42  ;;  %v3884_v33 = vor.u32 %v3883_v9, %v3880_v10  ;;  %v3904_v59 = vrot.slane %v3902_v40, 4  ;;  %v3915_v8 = vshrl.u32 %v7545_v62, 16  ;;  %v6047_v34 = vld [vmem:[#allocation8 + $0x200] sm:$0xff]   ;;  %v5077_v14 = vld [vmem:[%s7059_s1 + $0x54] sm:$0xe] }
 0x27f   : > { %5632 = vmatprep.subr.bf16.mxu0 %v7520_v45  ;;  %v5061_v17 = vcombine.low %v3866_v16, %v3876_v15  ;;  %v3894_v47 = vor.u32 %v3893_v49, %v3889_v37  ;;  %v3907_v18 = vrot.slane %v3905_v19, 5  ;;  %v3913_v35 = vrot.slane %v3911_v27, 5  ;;  %v5074_v48 = vld [vmem:[%s7059_s1 + $0x30] sm:$0xe] }
 0x280   : > { %5682 = vmatpush3.bf16.msra.mxu1 %v6042_v29  ;;  %v3885_v44 = vrot.slane %v3884_v33, 4  ;;  %v3921_v61 = vshll.u32 %v7548_v41, 16  ;;  %v3917_v29 = vrot.slane %v3915_v8, 4  ;;  %v5080_v32 = vrot.slane %v5072_v26, 9 }
 0x281   : > { %5675 = vmatprep.subr.bf16.mxu1 %v7520_v45  ;;  %5615 = vmatmul.mubr.bf16.gmra.mxu1 %v5061_v17  ;;  %v3895_v50 = vrot.slane %v3894_v47, 4  ;;  %v4169_v58 = vrot.slane %v7408_v53, 5  ;;  %v3908_v36 = vor.u32 %v3907_v18, %v3904_v59  ;;  %v4172_v42 = vrot.slane %v7411_v38, 5  ;;  %v5078_v47 = vld [vmem:[%s7059_s1 + $0x60] sm:$0xe] }
 0x282   : > { %5633 = vmatpush3.bf16.msra.mxu0 %v7520_v45  ;;  %v3890_v2 = vsel %vm7087_vm11, %v3885_v44, %v3889_v37  ;;  %v3923_v63 = vrot.slane %v3921_v61, 5  ;;  %v3918_v53 = vor.u32 %v3917_v29, %v3913_v35  ;;  %v5084_v13 = vrot.slane %v5076_v12, 9  ;;  %v5079_v61 = vld [vmem:[%s7059_s1 + $0x6c] sm:$0xe] }
 0x283   : > { %5634 = vmatprep.subr.bf16.mxu0 %v7550_v60  ;;  %v3900_v5 = vsel %vm7087_vm11, %v3895_v50, %v3899_v11  ;;  %v4170_v25 = vsel %vm7215_vm14, %v5080_v32, %v4169_v58  ;;  %v4171_v51 = vrot.slane %v4169_v58, 4  ;;  %v3909_v10 = vrot.slane %v3908_v36, 4 }
 0x284   : > { %5683 = vmatpush3.bf16.msra.mxu1 %v7520_v45  ;;  %v5062_v39 = vcombine.low %v3890_v2, %v3900_v5  ;;  %v4197_v38 = vrot.slane %v7480_v6, 5  ;;  %v3919_v28 = vrot.slane %v3918_v53, 4  ;;  %v4200_v56 = vrot.slane %v7489_v7, 5 }
 0x285   : > { %5587 = vmatmul.mubr.bf16.gmra.mxu0 %v6045_v55  ;;  %5676 = vmatprep.subr.bf16.mxu1 %v7550_v60  ;;  %v4173_v45 = vsel %vm7215_vm14, %v4171_v51, %v4172_v42  ;;  %v5081_v16 = vrot.slane %v5073_v3, 9  ;;  %v3914_v9 = vsel %vm7087_vm11, %v3909_v10, %v3913_v35  ;;  %v4176_v7 = vrot.slane %v7428_v30, 5 }
 0x286   : > { %5635 = vmatpush3.bf16.msra.mxu0 %v7550_v60  ;;  %5618 = vmatprep.mubr.bf16.mxu1 %v5062_v39  ;;  %v5088_v37 = vcombine.low %v4170_v25, %v4173_v45  ;;  %v4198_v6 = vsel %vm7215_vm14, %v5084_v13, %v4197_v38  ;;  %v4199_v49 = vrot.slane %v4197_v38, 4  ;;  %v3924_v11 = vsel %vm7087_vm11, %v3919_v28, %v3923_v63 }
 0x287   : > { %5636 = vmatprep.subr.bf16.mxu0 %v6047_v34  ;;  %v4179_v40 = vrot.slane %v7431_v20, 5  ;;  %v5085_v15 = vrot.slane %v5077_v14, 9  ;;  %v5063_v33 = vcombine.low %v3914_v9, %v3924_v11  ;;  %v5082_v27 = vrot.slane %v5074_v48, 9  ;;  %v5075_v20 = vld [vmem:[%s7059_s1 + $0x3c] sm:$0xe] }
 0x288   : > { %5684 = vmatpush3.bf16.msra.mxu1 %v7550_v60  ;;  %5638 = vmatprep.mubr.bf16.mxu0 %v5088_v37  ;;  %v4201_v19 = vsel %vm7215_vm14, %v4199_v49, %v4200_v56  ;;  %v4183_v17 = vrot.slane %v7442_v31, 5  ;;  %v4177_v60 = vsel %vm7215_vm14, %v5081_v16, %v4176_v7  ;;  %v4178_v59 = vrot.slane %v4176_v7, 4 }
 0x289   : > { %5677 = vmatprep.subr.bf16.mxu1 %v6047_v34  ;;  %v5092_v0 = vcombine.low %v4198_v6, %v4201_v19  ;;  %v4208_v30 = vsel %vm7215_vm14, %v7531_v1, %v4207_v52  ;;  %5619 = vmatmul.mubr.bf16.gmra.mxu1 %v5063_v33  ;;  %v4205_v31 = vsel %vm7215_vm14, %v5085_v15, %v4204_v4  ;;  %v4186_v44 = vrot.slane %v7449_v46, 5 }
 0x28a   : > { %5637 = vmatpush3.bf16.msra.mxu0 %v6047_v34  ;;  %v4184_v8 = vsel %vm7215_vm14, %v5082_v27, %v4183_v17  ;;  %v4185_v26 = vrot.slane %v4183_v17, 4  ;;  %v4180_v21 = vsel %vm7215_vm14, %v4178_v59, %v4179_v40  ;;  %v5086_v52 = vrot.slane %v5078_v47, 9 }
 0x28b   : > { %5646 = vmatprep.mubr.bf16.mxu1 %v5092_v0  ;;  %v4211_v1 = vrot.slane %v7524_v43, 5  ;;  %v4214_v55 = vrot.slane %v7535_v54, 5  ;;  %v5089_v22 = vcombine.low %v4177_v60, %v4180_v21  ;;  %v5083_v18 = vrot.slane %v5075_v20, 9 }
 0x28c   : > { %5685 = vmatpush3.bf16.msra.mxu1 %v6047_v34  ;;  %v4187_v4 = vsel %vm7215_vm14, %v4185_v26, %v4186_v44  ;;  %v4190_v35 = vrot.slane %v7459_v23, 5  ;;  %v4193_v32 = vrot.slane %v7462_v24, 5  ;;  %v5093_v58 = vcombine.low %v4205_v31, %v4208_v30 }
 0x28d   : > { %v5090_v50 = vcombine.low %v4184_v8, %v4187_v4  ;;  %v4212_v46 = vsel %vm7215_vm14, %v5086_v52, %v4211_v1  ;;  %v4213_v29 = vrot.slane %v4211_v1, 4  ;;  %5639 = vmatmul.mubr.bf16.vlgmr.msra.gmra.mxu0 %v5089_v22  ;;  %v4218_v54 = vrot.slane %v7545_v62, 5 }
 0x28e   : > { %v4192_v43 = vrot.slane %v4190_v35, 4  ;;  %v4191_v23 = vsel %vm7215_vm14, %v5083_v18, %v4190_v35  ;;  %v5087_v2 = vrot.slane %v5079_v61, 9  ;;  %v4221_v36 = vrot.slane %v7548_v41, 5 }
 0x28f   : > { %5642 = vmatprep.mubr.bf16.mxu0 %v5090_v50  ;;  %v4215_v12 = vsel %vm7215_vm14, %v4213_v29, %v4214_v55  ;;  %v4220_v24 = vrot.slane %v4218_v54, 4 }
 0x290   : > { %v5094_v63 = vcombine.low %v4212_v46, %v4215_v12  ;;  %v4194_v34 = vsel %vm7215_vm14, %v4192_v43, %v4193_v32  ;;  %v4219_v62 = vsel %vm7215_vm14, %v5087_v2, %v4218_v54 }
 0x291   : > { %5647 = vmatmul.mubr.bf16.vlgmr.msra.gmra.mxu1 %v5093_v58  ;;  %v5091_v42 = vcombine.low %v4191_v23, %v4194_v34  ;;  %v4222_v3 = vsel %vm7215_vm14, %v4220_v24, %v4221_v36 }
 0x292   : > { %5650 = vmatprep.mubr.bf16.mxu1 %v5094_v63  ;;  %v5095_v5 = vcombine.low %v4219_v62, %v4222_v3 }
 0x295   : > { %5643 = vmatmul.mubr.bf16.gmra.mxu0 %v5091_v42 }
 0x299   : > { %5651 = vmatmul.mubr.bf16.gmra.mxu1 %v5095_v5 }
 0x2c6   : > { %v5384_v53 = vpop.f32.mrf.mxu0 }
 0x2c7   : > { %v5416_v25 = vpop.f32.mrf.mxu1 }
 0x2c8   : > { %v2146_v41 = vadd.f32 %v5416_v25, %v5384_v53  ;;  %v1944_v51 = vpop.f32.mrf.mxu0 }
 0x2c9   : > { %v2137_v39 = vpop.f32.mrf.mxu1 }
 0x2ca   : > { %v2138_v10 = vadd.f32 %v2137_v39, %v1944_v51  ;;  %v5385_v13 = vpop.f32.mrf.mxu0 }
 0x2cb   : > { %v5417_v38 = vpop.f32.mrf.mxu1 }
 0x2cc   : > { %v2149_v14 = vadd.f32 %v5417_v38, %v5385_v13  ;;  %v1947_v28 = vpop.f32.mrf.mxu0 }
 0x2cd   : > { %v2140_v45 = vpop.f32.mrf.mxu1 }
 0x2ce   : > { %v2141_v56 = vadd.f32 %v2140_v45, %v1947_v28  ;;  %v5388_v16 = vpop.f32.mrf.mxu0 }
 0x2cf   : > { %v5420_v48 = vpop.f32.mrf.mxu1 }
 0x2d0   : > { %v2162_v9 = vadd.f32 %v5420_v48, %v5388_v16  ;;  %v1960_v57 = vpop.f32.mrf.mxu0 }
 0x2d1   : > { %v2153_v37 = vpop.f32.mrf.mxu1 }
 0x2d2   : > { %v2154_v6 = vadd.f32 %v2153_v37, %v1960_v57  ;;  %v5389_v49 = vpop.f32.mrf.mxu0 }
 0x2d3   : > { %v5421_v11 = vpop.f32.mrf.mxu1 }
 0x2d4   : > { %v2165_v7 = vadd.f32 %v5421_v11, %v5389_v49  ;;  %v1963_v40 = vpop.f32.mrf.mxu0 }
 0x2d5   : > { %v2156_v15 = vpop.f32.mrf.mxu1 }
 0x2d6   : > { %v2157_v33 = vadd.f32 %v2156_v15, %v1963_v40  ;;  %v5392_v27 = vpop.f32.mrf.mxu0 }
 0x2d7   : > { %v5424_v19 = vpop.f32.mrf.mxu1 }
 0x2d8   : > { %v2178_v47 = vadd.f32 %v5424_v19, %v5392_v27  ;;  %v1976_v0 = vpop.f32.mrf.mxu0 }
 0x2d9   : > { %v2169_v17 = vpop.f32.mrf.mxu1 }
 0x2da   : > { %v2170_v59 = vadd.f32 %v2169_v17, %v1976_v0  ;;  %v5393_v30 = vpop.f32.mrf.mxu0 }
 0x2db   : > { %v5425_v60 = vpop.f32.mrf.mxu1 }
 0x2dc   : > { %v2181_v31 = vadd.f32 %v5425_v60, %v5393_v30  ;;  %v1979_v8 = vpop.f32.mrf.mxu0 }
 0x2dd   : > { %v2172_v20 = vpop.f32.mrf.mxu1 }
 0x2de   : > { %v2173_v44 = vadd.f32 %v2172_v20, %v1979_v8 }
 0x2df   : > { %v5428_v26 = vpop.f32.mrf.mxu1 }
 0x2e1   : > { %v2185_v21 = vpop.f32.mrf.mxu1 }
 0x2e2   : > { %v5396_v52 = vpop.f32.mrf.mxu0 }
 0x2e3   : > { %v5429_v1 = vpop.f32.mrf.mxu1  ;;  %v2194_v55 = vadd.f32 %v5428_v26, %v5396_v52 }
 0x2e4   : > { %v1992_v22 = vpop.f32.mrf.mxu0 }
 0x2e5   : > { %v2188_v4 = vpop.f32.mrf.mxu1  ;;  %v2186_v18 = vadd.f32 %v2185_v21, %v1992_v22 }
 0x2e6   : > { %v5397_v35 = vpop.f32.mrf.mxu0 }
 0x2e7   : > { %v5480_v61 = vpop.f32.mrf.mxu1  ;;  %v2197_v50 = vadd.f32 %v5429_v1, %v5397_v35 }
 0x2e8   : > { %v1995_v46 = vpop.f32.mrf.mxu0 }
 0x2e9   : > { %v2660_v29 = vpop.f32.mrf.mxu1  ;;  %v7633_v32 = vadd.f32 %v2188_v4, %v1995_v46 }
 0x2ea   : > { %v5448_v58 = vpop.f32.mrf.mxu0 }
 0x2eb   : > { %v5481_v43 = vpop.f32.mrf.mxu1  ;;  %v2479_v54 = vadd.f32 %v5448_v58, %v2146_v41 }
 0x2ec   : > { %v2414_v12 = vpop.f32.mrf.mxu0 }
 0x2ed   : > { %v2663_v23 = vpop.f32.mrf.mxu1  ;;  %v7635_v2 = vadd.f32 %v5480_v61, %v2479_v54  ;;  %v2477_v36 = vadd.f32 %v2414_v12, %v2138_v10 }
 0x2ee   : > { %v5449_v63 = vpop.f32.mrf.mxu0 }
 0x2ef   : > { %v5484_v34 = vpop.f32.mrf.mxu1  ;;  %v7637_v24 = vadd.f32 %v2660_v29, %v2477_v36  ;;  %v2480_v42 = vadd.f32 %v5449_v63, %v2149_v14 }
 0x2f0   : > { %v2417_v62 = vpop.f32.mrf.mxu0 }
 0x2f1   : > { %v2676_v3 = vpop.f32.mrf.mxu1  ;;  %v7639_v5 = vadd.f32 %v5481_v43, %v2480_v42  ;;  %v2478_v53 = vadd.f32 %v2417_v62, %v2141_v56 }
 0x2f2   : > { %v5452_v25 = vpop.f32.mrf.mxu0 }
 0x2f3   : > { %v5485_v51 = vpop.f32.mrf.mxu1  ;;  %v7641_v39 = vadd.f32 %v2663_v23, %v2478_v53  ;;  %v2483_v41 = vadd.f32 %v5452_v25, %v2162_v9 }
 0x2f4   : > { %v2430_v13 = vpop.f32.mrf.mxu0 }
 0x2f5   : > { %v2679_v38 = vpop.f32.mrf.mxu1  ;;  %v7643_v28 = vadd.f32 %v5484_v34, %v2483_v41  ;;  %v2481_v10 = vadd.f32 %v2430_v13, %v2154_v6 }
 0x2f6   : > { %v5453_v45 = vpop.f32.mrf.mxu0 }
 0x2f7   : > { %v5488_v16 = vpop.f32.mrf.mxu1  ;;  %v7645_v48 = vadd.f32 %v2676_v3, %v2481_v10  ;;  %v2484_v14 = vadd.f32 %v5453_v45, %v2165_v7 }
 0x2f8   : > { %v2433_v57 = vpop.f32.mrf.mxu0 }
 0x2f9   : > { %v2692_v37 = vpop.f32.mrf.mxu1  ;;  %v2730_v49 = vadd.f32 %v5485_v51, %v2484_v14  ;;  %v2482_v11 = vadd.f32 %v2433_v57, %v2157_v33 }
 0x2fa   : > { %v5456_v56 = vpop.f32.mrf.mxu0 }
 0x2fb   : > { %v5489_v40 = vpop.f32.mrf.mxu1  ;;  %v2728_v15 = vadd.f32 %v2679_v38, %v2482_v11  ;;  %v2487_v19 = vadd.f32 %v5456_v56, %v2178_v47 }
 0x2fc   : > { %v2446_v27 = vpop.f32.mrf.mxu0 }
 0x2fd   : > { %v2695_v9 = vpop.f32.mrf.mxu1  ;;  %v7647_v17 = vadd.f32 %v5488_v16, %v2487_v19  ;;  %v2485_v0 = vadd.f32 %v2446_v27, %v2170_v59 }
 0x2fe   : > { %v5457_v60 = vpop.f32.mrf.mxu0 }
 0x2ff   : > { %v5492_v6 = vpop.f32.mrf.mxu1  ;;  %v7649_v30 = vadd.f32 %v2692_v37, %v2485_v0  ;;  %v2488_v20 = vadd.f32 %v5457_v60, %v2181_v31 }
 0x300   : > { %v2449_v8 = vpop.f32.mrf.mxu0 }
 0x301   : > { %v2708_v7 = vpop.f32.mrf.mxu1  ;;  %v7651_v26 = vadd.f32 %v5489_v40, %v2488_v20  ;;  %v2486_v21 = vadd.f32 %v2449_v8, %v2173_v44 }
 0x302   : > { %v5460_v33 = vpop.f32.mrf.mxu0 }
 0x303   : > { %v5493_v52 = vpop.f32.mrf.mxu1  ;;  %v7653_v1 = vadd.f32 %v2695_v9, %v2486_v21  ;;  %v2491_v47 = vadd.f32 %v5460_v33, %v2194_v55 }
 0x304   : > { %v2462_v22 = vpop.f32.mrf.mxu0 }
 0x305   : > { %v2711_v4 = vpop.f32.mrf.mxu1  ;;  %v7655_v35 = vadd.f32 %v5492_v6, %v2491_v47  ;;  %v2489_v59 = vadd.f32 %v2462_v22, %v2186_v18 }
 0x306   : > { %v5461_v61 = vpop.f32.mrf.mxu0 }
 0x307   : > { %v7657_v46 = vpop.f32.mrf.mxu1  ;;  %v7659_v29 = vadd.f32 %v2708_v7, %v2489_v59  ;;  %v2492_v31 = vadd.f32 %v5461_v61, %v2197_v50 }
 0x308   : > { %v2465_v58 = vpop.f32.mrf.mxu0 }
 0x309   : > { %v7661_v43 = vpop.f32.mrf.mxu1  ;;  %v7663_v44 = vadd.f32 %v5493_v52, %v2492_v31  ;;  %v2490_v54 = vadd.f32 %v2465_v58, %v7633_v32 }
 0x30a   : > { %v5512_v12 = vpop.f32.mrf.mxu0 }
 0x30b   : > { %v7666_v55 = vadd.f32 %v2711_v4, %v2490_v54  ;;  %v7668_v23 = vpop.f32.mrf.mxu1 }
 0x30c   : > { %v3086_v36 = vpop.f32.mrf.mxu0 }
 0x30d   : > { %v7670_v63 = vpop.f32.mrf.mxu1 }
 0x30e   : > { %v5513_v18 = vpop.f32.mrf.mxu0 }
 0x30f   : > { %v7672_v62 = vpop.f32.mrf.mxu1 }
 0x310   : > { %v3089_v34 = vpop.f32.mrf.mxu0 }
 0x311   : > { %v7674_v3 = vpop.f32.mrf.mxu1 }
 0x312   : > { %v5516_v42 = vpop.f32.mrf.mxu0 }
 0x313   : > { %v5549_v25 = vpop.f32.mrf.mxu1 }
 0x314   : > { %v3102_v50 = vpop.f32.mrf.mxu0 }
 0x315   : > { %v3403_v38 = vpop.f32.mrf.mxu1 }
 0x316   : > { %v5517_v53 = vpop.f32.mrf.mxu0 }
 0x317   : > { %v3156_v51 = vadd.f32 %v5517_v53, %v2730_v49 }
 0x318   : > { %v3105_v32 = vpop.f32.mrf.mxu0 }
 0x319   : > { %v7676_v41 = vadd.f32 %v5549_v25, %v3156_v51  ;;  %v3154_v13 = vadd.f32 %v3105_v32, %v2728_v15  ;;  %v7680_v16 = vpop.f32.mrf.mxu1 }
 0x31a   : > { %v5520_v45 = vpop.f32.mrf.mxu0 }
 0x31b   : > { %8029 = vst [vmem:[#allocation19_spill] sm:$0xff] %v7676_v41  ;;  %v7678_v10 = vadd.f32 %v3403_v38, %v3154_v13  ;;  %v3416_v57 = vpop.f32.mrf.mxu1  ;;  %v3150_v41 = vadd.f32 %v3089_v34, %v7641_v39 }
 0x31c   : > { %v3118_v14 = vpop.f32.mrf.mxu0 }
 0x31d   : > { %8030 = vst [vmem:[#allocation20_spill] sm:$0xff] %v7678_v10  ;;  %v7682_v11 = vpop.f32.mrf.mxu1  ;;  %v3151_v10 = vadd.f32 %v5512_v12, %v7635_v2  ;;  %v3159_v2 = vadd.f32 %v5520_v45, %v7647_v17  ;;  %v3157_v12 = vadd.f32 %v3118_v14, %v7649_v30 }
 0x31e   : > { %v5521_v37 = vpop.f32.mrf.mxu0 }
 0x31f   : > { %v7684_v40 = vpop.f32.mrf.mxu1 }
 0x320   : > { %v3121_v56 = vpop.f32.mrf.mxu0 }
 0x325   : > { %v5524_v19 = vpop.f32.mrf.mxu0 }
 0x326   : > { %v7686_v49 = vpop.f32.mrf.mxu1  ;;  %v3163_v34 = vadd.f32 %v5524_v19, %v7655_v35 }
 0x327   : > { %v3134_v27 = vpop.f32.mrf.mxu0 }
 0x328   : > { %v7688_v9 = vpop.f32.mrf.mxu1 }
 0x329   : > { %v5525_v15 = vpop.f32.mrf.mxu0 }
 0x32a   : > { %v7690_v0 = vpop.f32.mrf.mxu1  ;;  %v3164_v17 = vadd.f32 %v5525_v15, %v7663_v44  ;;  %v8042_v15 = vld [vmem:[#allocation19_spill] sm:$0xff] }
 0x32b   : > { %8031 = vst [vmem:[#allocation21_spill] sm:$0xff] %v7690_v0  ;;  %v3137_v60 = vpop.f32.mrf.mxu0 }
 0x32c   : > { %v7692_v6 = vpop.f32.mrf.mxu1 }
 0x32d   : > { %8032 = vst [vmem:[#allocation22_spill] sm:$0xff] %v7692_v6  ;;  %v5576_v20 = vpop.f32.mrf.mxu0 }
 0x32f   : > { %v3630_v8 = vpop.f32.mrf.mxu0  ;;  %v5608_v7 = vpop.f32.mrf.mxu1 }
 0x331   : > { %v5577_v21 = vpop.f32.mrf.mxu0  ;;  %v7694_v33 = vpop.f32.mrf.mxu1 }
 0x332   : > { %8033 = vst [vmem:[#allocation23_spill] sm:$0xff] %v7694_v33  ;;  %v3149_v33 = vadd.f32 %v3086_v36, %v7637_v24  ;;  %v3448_v36 = vadd.f32 %v7670_v63, %v3150_v41  ;;  %v3457_v63 = vadd.f32 %v7680_v16, %v3159_v2 }
 0x333   : > { %v3633_v52 = vpop.f32.mrf.mxu0  ;;  %v5609_v47 = vpop.f32.mrf.mxu1 }
 0x334   : > { %v8041_v16 = vld [vmem:[#allocation22_spill] sm:$0xff] }
 0x335   : > { %v7696_v22 = vpop.f32.mrf.mxu1  ;;  %v5580_v4 = vpop.f32.mrf.mxu0 }
 0x336   : > { %8034 = vst [vmem:[#allocation24_spill] sm:$0xff] %v7696_v22 }
 0x337   : > { %v3646_v59 = vpop.f32.mrf.mxu0 }
 0x339   : > { %v7698_v61 = vpop.f32.mrf.mxu1  ;;  %v5581_v31 = vpop.f32.mrf.mxu0 }
 0x33a   : > { %8035 = vst [vmem:[#allocation25_spill] sm:$0xff] %v7698_v61  ;;  %v3152_v61 = vadd.f32 %v5513_v18, %v7639_v5  ;;  %v3447_v5 = vadd.f32 %v7661_v43, %v3149_v33  ;;  %v3160_v18 = vadd.f32 %v5521_v37, %v7651_v26  ;;  %v3455_v26 = vadd.f32 %v3416_v57, %v3157_v12  ;;  %v8044_v33 = vld [vmem:[#allocation20_spill] sm:$0xff] }
 0x33b   : > { %v7700_v58 = vpop.f32.mrf.mxu1  ;;  %v3649_v54 = vpop.f32.mrf.mxu0  ;;  %v7755_v12 = vld [vmem:[%s8049_s27] ss:$0 sm:$0xff]  ;;  %s6196_s27 = sshll.u32 %s6326_s24, 4  ;;  %s6197_s27 = int_to_ptr.vmem [resolvable:$false] %s6196_s27 }
 0x33c   : > { %8036 = vst [vmem:[#allocation26_spill] sm:$0xff] %v7700_v58  ;;  %v3450_v39 = vadd.f32 %v7668_v23, %v3152_v61  ;;  %v3162_v23 = vadd.f32 %v3137_v60, %v7666_v55  ;;  %v3693_v41 = vadd.f32 %v3630_v8, %v3447_v5  ;;  %v3458_v35 = vadd.f32 %v7682_v11, %v3160_v18  ;;  %v8040_v55 = vld [vmem:[#allocation21_spill] sm:$0xff]  ;;  %v8043_v8 = vld [vmem:[#allocation23_spill] sm:$0xff]  ;;  %s6198_s13 = scalar_lea.vmem %s6197_s27, 4096  ;;  %p6199_p4 = scmp.lt.s32.totalorder %s7910_s12, %s6197_s27 }
 0x33d   : > { %v7702_v53 = vpop.f32.mrf.mxu1  ;;  %v5584_v25 = vpop.f32.mrf.mxu0  ;;  %v3700_v60 = vadd.f32 %v5581_v31, %v8042_v15  ;;  %p6200_p6 = scmp.lt.s32.totalorder %s6198_s13, %s6192_s8 }
 0x33e   : > { %8037 = vst [vmem:[#allocation27_spill] sm:$0xff] %v7702_v53  ;;  %v3155_v53 = vadd.f32 %v5516_v42, %v7643_v28  ;;  %v3460_v57 = vadd.f32 %v8041_v16, %v3162_v23  ;;  %v4119_v11 = vadd.f32 %v8043_v8, %v3693_v41 }
 0x33f   : > { %v7704_v51 = vpop.f32.mrf.mxu1  ;;  %v3662_v32 = vpop.f32.mrf.mxu0  ;;  %p6201_p5 = por %p6200_p6, %p6199_p4 }
 0x340   : > { %8038 = vst [vmem:[#allocation28_spill] sm:$0xff] %v7704_v51  ;;  %v3153_v51 = vadd.f32 %v3102_v50, %v7645_v48  ;;  %v3158_v48 = vadd.f32 %v3121_v56, %v7653_v1  ;;  %v3453_v30 = vadd.f32 %v7672_v62, %v3155_v53  ;;  %v3461_v62 = vadd.f32 %v7686_v49, %v3163_v34  ;;  %v7745_v49 = vld [vmem:[%s8045_s21] ss:$0 sm:$0xff]  ;;  %s7916_s21 = scalar_lea.sflag [#allocation5], %s337_s5 }
 0x341   : > { %v5585_v13 = vpop.f32.mrf.mxu0  ;;  %v7706_v38 = vpop.f32.mrf.mxu1  ;;  %v3462_v56 = vadd.f32 %v8040_v55, %v3164_v17  ;;  %v8047_v53 = vld [vmem:[#allocation25_spill] sm:$0xff]  ;;  %p6202_p1 = pnand %p6201_p5, %p6195_p2 }
 0x342   : > { %8039 = vst [vmem:[#allocation29_spill] sm:$0xff] %v7706_v38  ;;  %v3449_v38 = vadd.f32 %v7657_v46, %v3151_v10  ;;  %v3161_v46 = vadd.f32 %v3134_v27, %v7659_v29  ;;  %v3451_v43 = vadd.f32 %v7674_v3, %v3153_v51  ;;  %v3696_v10 = vadd.f32 %v5577_v21, %v3450_v39 }
 0x343   : > { %v3665_v22 = vpop.f32.mrf.mxu0  ;;  %v7712_v58 = vpop.f32.mrf.mxu1  ;;  %v3694_v29 = vadd.f32 %v3633_v52, %v3448_v36  ;;  %v3699_v14 = vadd.f32 %v5580_v4, %v3453_v30  ;;  %v3456_v37 = vadd.f32 %v7684_v40, %v3158_v48  ;;  %v3698_v52 = vadd.f32 %v3649_v54, %v8044_v33  ;;  %v8048_v51 = vld [vmem:[#allocation26_spill] sm:$0xff] }
 0x344   : > { %v3695_v50 = vadd.f32 %v5576_v20, %v3449_v38  ;;  %v3697_v44 = vadd.f32 %v3646_v59, %v3451_v43  ;;  %v3459_v3 = vadd.f32 %v7688_v9, %v3161_v46  ;;  %v3703_v20 = vadd.f32 %v5584_v25, %v3457_v63  ;;  %v8046_v9 = vld [vmem:[#allocation24_spill] sm:$0xff] }
 0x345   : > { %v5588_v6 = vpop.f32.mrf.mxu0  ;;  %v7716_v0 = vpop.f32.mrf.mxu1  ;;  %v4122_v21 = vadd.f32 %v5609_v47, %v3696_v10  ;;  %v3701_v4 = vadd.f32 %v3662_v32, %v3455_v26  ;;  %v4120_v61 = vadd.f32 %v8046_v9, %v3694_v29  ;;  %v3704_v38 = vadd.f32 %v5585_v13, %v3458_v35  ;;  %v8050_v39 = vld [vmem:[#allocation27_spill] sm:$0xff] }
 0x346   : > { %v4121_v27 = vadd.f32 %v5608_v7, %v3695_v50  ;;  %v4125_v7 = vadd.f32 %v8047_v53, %v3699_v14  ;;  %v7750_v31 = vadd.f32 %v8048_v51, %v3697_v44  ;;  %v3702_v47 = vadd.f32 %v3665_v22, %v3456_v37 }
 0x347   : > { %v3678_v24 = vpop.f32.mrf.mxu0  ;;  %v4091_v28 = vpop.f32.mrf.mxu1  ;;  %v3707_v2 = vadd.f32 %v5588_v6, %v3461_v62  ;;  %v7758_v36 = vadd.f32 %v8050_v39, %v3700_v60  ;;  %v8052_v17 = vld [vmem:[#allocation28_spill] sm:$0xff]  ;;  %v4127_v6 = vadd.f32 %v7712_v58, %v3701_v4  ;;  %v4130_v41 = vadd.f32 %v7716_v0, %v3704_v38 }
 0x348   : > { %v3705_v54 = vadd.f32 %v3678_v24, %v3459_v3  ;;  %v7763_v13 = vadd.f32 %v8052_v17, %v3698_v52  ;;  %v4128_v10 = vadd.f32 %v4091_v28, %v3702_v47 }
 0x349   : > { %v5589_v42 = vpop.f32.mrf.mxu0  ;;  %v5620_v1 = vpop.f32.mrf.mxu1  ;;  %v8051_v18 = vld [vmem:[#allocation29_spill] sm:$0xff] }
 0x34a   : > { %v4129_v48 = vadd.f32 %v8051_v18, %v3703_v20  ;;  %v3708_v22 = vadd.f32 %v5589_v42, %v3462_v56  ;;  %v4133_v35 = vadd.f32 %v5620_v1, %v3707_v2 }
 0x34b   : > { %v3681_v45 = vpop.f32.mrf.mxu0  ;;  %v4104_v19 = vpop.f32.mrf.mxu1 }
 0x34c   : > { %v3706_v24 = vadd.f32 %v3681_v45, %v3460_v57  ;;  %v4131_v29 = vadd.f32 %v4104_v19, %v3705_v54 }
 0x34d   : > { %v5621_v40 = vpop.f32.mrf.mxu1  ;;  %v5640_v59 = vpop.f32.mrf.mxu0 }
 0x34e   : > { %v4419_v25 = vadd.f32 %v5640_v59, %v4121_v27  ;;  %v4134_v62 = vadd.f32 %v5621_v40, %v3708_v22 }
 0x34f   : > { %v4107_v32 = vpop.f32.mrf.mxu1  ;;  %v4354_v5 = vpop.f32.mrf.mxu0 }
 0x350   : > { %v4442_v34 = vmul.f32 %v7745_v49, %v4419_v25  ;;  %v4417_v46 = vadd.f32 %v4354_v5, %v4119_v11  ;;  %v7776_v3 = vadd.f32 %v4107_v32, %v3706_v24 }
 0x351   : > { %v5648_v30 = vpop.f32.mrf.mxu1  ;;  %v5641_v43 = vpop.f32.mrf.mxu0 }
 0x352   : > { %v7767_v23 = vadd.f32 %v7755_v12, %v4442_v34  ;;  %v4427_v50 = vadd.f32 %v5648_v30, %v4129_v48  ;;  %v4440_v63 = vmul.f32 %v7745_v49, %v4417_v46  ;;  %v4420_v26 = vadd.f32 %v5641_v43, %v4122_v21 }
 0x353   : > { %v4386_v14 = vpop.f32.mrf.mxu1  ;;  %v4357_v44 = vpop.f32.mrf.mxu0 }
 0x354   : > { %v4481_v58 = vsub.f32 0.0, %v7767_v23  ;;  %v4450_v42 = vmul.f32 %v7745_v49, %v4427_v50  ;;  %v7774_v45 = vadd.f32 %v7755_v12, %v4440_v63  ;;  %v4425_v37 = vadd.f32 %v4386_v14, %v4127_v6 }
 0x355   : > { %v4443_v55 = vmul.f32 %v7745_v49, %v4420_v26  ;;  %v5649_v56 = vpop.f32.mrf.mxu1  ;;  %v4418_v0 = vadd.f32 %v4357_v44, %v4120_v61  ;;  %v5644_v28 = vpop.f32.mrf.mxu0 }
 0x356   : > { %v4499_v1 = vmul.f32 1.442695, %v4481_v58  ;;  %v7780_v19 = vadd.f32 %v7755_v12, %v4450_v42  ;;  %v4479_v16 = vsub.f32 0.0, %v7774_v45  ;;  %v4448_v57 = vmul.f32 %v7745_v49, %v4425_v37 }
 0x357   : > { %v7785_v27 = vadd.f32 %v7755_v12, %v4443_v55  ;;  %v4428_v15 = vadd.f32 %v5649_v56, %v4130_v41  ;;  %v4441_v60 = vmul.f32 %v7745_v49, %v4418_v0  ;;  %v4389_v20 = vpop.f32.mrf.mxu1  ;;  %v4423_v8 = vadd.f32 %v5644_v28, %v4125_v7  ;;  %v4370_v52 = vpop.f32.mrf.mxu0 }
 0x358   : > { %6048 = vpow2.f32 %v4499_v1  ;;  %v4489_v11 = vsub.f32 0.0, %v7780_v19  ;;  %v4495_v21 = vmul.f32 1.442695, %v4479_v16  ;;  %v7790_v33 = vadd.f32 %v7755_v12, %v4448_v57 }
 0x359   : > { %v4482_v4 = vsub.f32 0.0, %v7785_v27  ;;  %v4451_v40 = vmul.f32 %v7745_v49, %v4428_v15  ;;  %v7795_v59 = vadd.f32 %v7755_v12, %v4441_v60  ;;  %v4426_v9 = vadd.f32 %v4389_v20, %v4128_v10  ;;  %v5652_v61 = vpop.f32.mrf.mxu1  ;;  %v5645_v18 = vpop.f32.mrf.mxu0 }
 0x35a   : > { %v4515_v53 = vmul.f32 1.442695, %v4489_v11  ;;  %6050 = vpow2.f32 %v4495_v21  ;;  %v4487_v7 = vsub.f32 0.0, %v7790_v33  ;;  %v4446_v51 = vmul.f32 %v7745_v49, %v4423_v8 }
 0x35b   : > { %v4501_v25 = vmul.f32 1.442695, %v4482_v4  ;;  %v7800_v38 = vadd.f32 %v7755_v12, %v4451_v40  ;;  %v4480_v47 = vsub.f32 0.0, %v7795_v59  ;;  %v4449_v2 = vmul.f32 %v7745_v49, %v4426_v9  ;;  %v4402_v54 = vpop.f32.mrf.mxu1 }
 0x35c   : > { %6052 = vpow2.f32 %v4515_v53  ;;  %v4511_v32 = vmul.f32 1.442695, %v4487_v7  ;;  %v7805_v5 = vadd.f32 %v7755_v12, %v4446_v51  ;;  %v4431_v39 = vadd.f32 %v5652_v61, %v4133_v35  ;;  %v4373_v35 = vpop.f32.mrf.mxu0 }
 0x35d   : > { %6054 = vpow2.f32 %v4501_v25  ;;  %v4490_v48 = vsub.f32 0.0, %v7800_v38  ;;  %v4497_v34 = vmul.f32 1.442695, %v4480_v47  ;;  %v7809_v46 = vadd.f32 %v7755_v12, %v4449_v2  ;;  %v5653_v17 = vpop.f32.mrf.mxu1 }
 0x35e   : > { %6056 = vpow2.f32 %v4511_v32  ;;  %v4485_v6 = vsub.f32 0.0, %v7805_v5  ;;  %v4454_v22 = vmul.f32 %v7745_v49, %v4431_v39  ;;  %v4421_v24 = vadd.f32 %v4370_v52, %v7750_v31 }
 0x35f   : > { %v4517_v30 = vmul.f32 1.442695, %v4490_v48  ;;  %6058 = vpow2.f32 %v4497_v34  ;;  %v4488_v43 = vsub.f32 0.0, %v7809_v46  ;;  %v4429_v50 = vadd.f32 %v4402_v54, %v4131_v29  ;;  %v4405_v31 = vpop.f32.mrf.mxu1 }
 0x360   : > { %v4507_v63 = vmul.f32 1.442695, %v4485_v6  ;;  %v7816_v26 = vadd.f32 %v7755_v12, %v4454_v22  ;;  %v4444_v41 = vmul.f32 %v7745_v49, %v4421_v24  ;;  %v4424_v10 = vadd.f32 %v5645_v18, %v7758_v36 }
 0x361   : > { %6060 = vpow2.f32 %v4517_v30  ;;  %v4513_v14 = vmul.f32 1.442695, %v4488_v43  ;;  %v4452_v44 = vmul.f32 %v7745_v49, %v4429_v50  ;;  %v4432_v58 = vadd.f32 %v5653_v17, %v4134_v62 }
 0x362   : > { %6062 = vpow2.f32 %v4507_v63  ;;  %v4493_v42 = vsub.f32 0.0, %v7816_v26  ;;  %v7823_v29 = vadd.f32 %v7755_v12, %v4444_v41  ;;  %v4447_v37 = vmul.f32 %v7745_v49, %v4424_v10  ;;  %v4595_v41 = vld [vmem:[%s7854_s20 + $0x10] sm:$0xff] }
 0x363   : > { %6064 = vpow2.f32 %v4513_v14  ;;  %v7827_v55 = vadd.f32 %v7755_v12, %v4452_v44  ;;  %v4455_v36 = vmul.f32 %v7745_v49, %v4432_v58  ;;  %v4422_v56 = vadd.f32 %v4373_v35, %v7763_v13  ;;  %v4593_v44 = vld [vmem:[%s7854_s20] sm:$0xff] }
 0x364   : > { %v4523_v0 = vmul.f32 1.442695, %v4493_v42  ;;  %v4483_v62 = vsub.f32 0.0, %v7823_v29  ;;  %v7833_v28 = vadd.f32 %v7755_v12, %v4447_v37  ;;  %v4430_v1 = vadd.f32 %v4405_v31, %v7776_v3 }
 0x365   : > { %v6049_v16 = vpop.eup %6048  ;;  %v4491_v57 = vsub.f32 0.0, %v7827_v55  ;;  %v4445_v15 = vmul.f32 %v7745_v49, %v4422_v56  ;;  %v7841_v4 = vadd.f32 %v7755_v12, %v4455_v36  ;;  %v4603_v56 = vld [vmem:[%s7854_s20 + $0x50] sm:$0xff] }
 0x366   : > { %v4529_v60 = vadd.f32 1.0, %v6049_v16  ;;  %6066 = vpow2.f32 %v4523_v0  ;;  %v4503_v20 = vmul.f32 1.442695, %v4483_v62  ;;  %v4453_v13 = vmul.f32 %v7745_v49, %v4430_v1  ;;  %v4596_v16 = vld [vmem:[%s7854_s20 + $0x18] sm:$0xff] }
 0x367   : > { %v6051_v8 = vpop.eup %6050  ;;  %v4519_v11 = vmul.f32 1.442695, %v4491_v57  ;;  %v4486_v52 = vsub.f32 0.0, %v7833_v28  ;;  %v7844_v40 = vadd.f32 %v7755_v12, %v4445_v15  ;;  %v4494_v2 = vsub.f32 0.0, %v7841_v4  ;;  %v4601_v15 = vld [vmem:[%s7854_s20 + $0x40] sm:$0xff] }
 0x368   : > { %6068 = vrcp.f32 %v4529_v60  ;;  %v4527_v21 = vadd.f32 1.0, %v6051_v8  ;;  %v7847_v49 = vadd.f32 %v7755_v12, %v4453_v13 }
 0x369   : > { %v6053_v3 = vpop.eup %6052  ;;  %6070 = vpow2.f32 %v4503_v20  ;;  %v4509_v47 = vmul.f32 1.442695, %v4486_v52  ;;  %v4484_v32 = vsub.f32 0.0, %v7844_v40  ;;  %v4525_v6 = vmul.f32 1.442695, %v4494_v2 }
 0x36a   : > { %v6055_v9 = vpop.eup %6054  ;;  %v4537_v61 = vadd.f32 1.0, %v6053_v3  ;;  %6072 = vrcp.f32 %v4527_v21  ;;  %v4492_v12 = vsub.f32 0.0, %v7847_v49 }
 0x36b   : > { %v6057_v53 = vpop.eup %6056  ;;  %v4530_v7 = vadd.f32 1.0, %v6055_v9  ;;  %6074 = vpow2.f32 %v4519_v11  ;;  %v4505_v24 = vmul.f32 1.442695, %v4484_v32  ;;  %v4594_v11 = vld [vmem:[%s7854_s20 + $0x8] sm:$0xff] }
 0x36c   : > { %v6059_v51 = vpop.eup %6058  ;;  %6076 = vrcp.f32 %v4537_v61  ;;  %v4535_v25 = vadd.f32 1.0, %v6057_v53  ;;  %v4521_v43 = vmul.f32 1.442695, %v4492_v12  ;;  %v4607_v12 = vld [vmem:[%s7854_s20 + $0x70] sm:$0xff] }
 0x36d   : > { %6078 = vrcp.f32 %v4530_v7  ;;  %v4528_v54 = vadd.f32 1.0, %v6059_v51 }
 0x36e   : > { %v6061_v39 = vpop.eup %6060  ;;  %6080 = vrcp.f32 %v4535_v25  ;;  %v4602_v25 = vld [vmem:[%s7854_s20 + $0x48] sm:$0xff] }
 0x36f   : > { %v6063_v18 = vpop.eup %6062  ;;  %v4538_v48 = vadd.f32 1.0, %v6061_v39  ;;  %6082 = vrcp.f32 %v4528_v54 }
 0x370   : > { %v6065_v34 = vpop.eup %6064  ;;  %v4533_v17 = vadd.f32 1.0, %v6063_v18  ;;  %6084 = vpow2.f32 %v4509_v47 }
 0x371   : > { %6086 = vrcp.f32 %v4538_v48  ;;  %v4536_v22 = vadd.f32 1.0, %v6065_v34 }
 0x372   : > { %6088 = vrcp.f32 %v4533_v17 }
 0x373   : > { %v6067_v30 = vpop.eup %6066  ;;  %6090 = vrcp.f32 %v4536_v22 }
 0x374   : > { %v4541_v50 = vadd.f32 1.0, %v6067_v30  ;;  %6092 = vpow2.f32 %v4525_v6 }
 0x375   : > { %v6069_v63 = vpop.eup %6068  ;;  %6094 = vpow2.f32 %v4505_v24  ;;  %v4597_v24 = vld [vmem:[%s7854_s20 + $0x20] sm:$0xff] }
 0x376   : > { %v6071_v10 = vpop.eup %6070  ;;  %v4577_v35 = vmul.f32 %v6069_v63, %v7767_v23  ;;  %6096 = vrcp.f32 %v4541_v50  ;;  %v4605_v50 = vld [vmem:[%s7854_s20 + $0x60] sm:$0xff] }
 0x377   : > { %v6073_v14 = vpop.eup %6072  ;;  %v4531_v58 = vadd.f32 1.0, %v6071_v10  ;;  %6098 = vpow2.f32 %v4521_v43 }
 0x378   : > { %v6075_v31 = vpop.eup %6074  ;;  %v4611_v42 = vadd.f32 %v4595_v41, %v4577_v35  ;;  %v4575_v37 = vmul.f32 %v6073_v14, %v7774_v45  ;;  %v4600_v35 = vld [vmem:[%s7854_s20 + $0x38] sm:$0xff] }
 0x379   : > { %v6077_v36 = vpop.eup %6076  ;;  %6100 = vrcp.f32 %v4531_v58  ;;  %v4539_v0 = vadd.f32 1.0, %v6075_v31  ;;  %v4608_v58 = vld [vmem:[%s7854_s20 + $0x78] sm:$0xff] }
 0x37a   : > { %v6079_v62 = vpop.eup %6078  ;;  %4627 = vst [vmem:[%s6541_s7 + $0x10] sm:$0xff] %v4611_v42  ;;  %v4585_v23 = vmul.f32 %v6077_v36, %v7780_v19  ;;  %v4609_v1 = vadd.f32 %v4593_v44, %v4575_v37  ;;  %v4598_v42 = vld [vmem:[%s7854_s20 + $0x28] sm:$0xff] }
 0x37b   : > { %v6081_v57 = vpop.eup %6080  ;;  %v4578_v60 = vmul.f32 %v6079_v62, %v7785_v27  ;;  %6102 = vrcp.f32 %v4539_v0  ;;  %v4604_v27 = vld [vmem:[%s7854_s20 + $0x58] sm:$0xff] }
 0x37c   : > { %v6083_v45 = vpop.eup %6082  ;;  %v4619_v20 = vadd.f32 %v4603_v56, %v4585_v23  ;;  %4625 = vst [vmem:[%s6541_s7] sm:$0xff] %v4609_v1  ;;  %v4583_v8 = vmul.f32 %v6081_v57, %v7790_v33  ;;  %v4599_v33 = vld [vmem:[%s7854_s20 + $0x30] sm:$0xff]  ;;  %v4606_v56 = vld [vmem:[%s7854_s20 + $0x68] sm:$0xff] }
 0x37d   : > { %v6085_v19 = vpop.eup %6084  ;;  %v4612_v13 = vadd.f32 %v4596_v16, %v4578_v60  ;;  %v4576_v21 = vmul.f32 %v6083_v45, %v7795_v59 }
 0x37e   : > { %v6087_v52 = vpop.eup %6086  ;;  %4635 = vst [vmem:[%s6541_s7 + $0x50] sm:$0xff] %v4619_v20  ;;  %v4617_v3 = vadd.f32 %v4601_v15, %v4583_v8  ;;  %v4534_v9 = vadd.f32 1.0, %v6085_v19 }
 0x37f   : > { %v6089_v61 = vpop.eup %6088  ;;  %4628 = vst [vmem:[%s6541_s7 + $0x18] sm:$0xff] %v4612_v13  ;;  %v4586_v53 = vmul.f32 %v6087_v52, %v7800_v38  ;;  %v4610_v7 = vadd.f32 %v4594_v11, %v4576_v21 }
 0x380   : > { %v6091_v51 = vpop.eup %6090  ;;  %4633 = vst [vmem:[%s6541_s7 + $0x40] sm:$0xff] %v4617_v3  ;;  %v4581_v59 = vmul.f32 %v6089_v61, %v7805_v5  ;;  %6104 = vrcp.f32 %v4534_v9 }
 0x381   : > { %v6093_v47 = vpop.eup %6092  ;;  %v4620_v2 = vadd.f32 %v4604_v27, %v4586_v53  ;;  %4626 = vst [vmem:[%s6541_s7 + $0x8] sm:$0xff] %v4610_v7  ;;  %v4584_v54 = vmul.f32 %v6091_v51, %v7809_v46 }
 0x382   : > { %v6095_v32 = vpop.eup %6094  ;;  %v4615_v39 = vadd.f32 %v4599_v33, %v4581_v59  ;;  %v4542_v38 = vadd.f32 1.0, %v6093_v47 }
 0x383   : > { %v6097_v18 = vpop.eup %6096  ;;  %4636 = vst [vmem:[%s6541_s7 + $0x58] sm:$0xff] %v4620_v2  ;;  %v4618_v48 = vadd.f32 %v4602_v25, %v4584_v54  ;;  %v4532_v34 = vadd.f32 1.0, %v6095_v32 }
 0x384   : > { %v6099_v17 = vpop.eup %6098  ;;  %4631 = vst [vmem:[%s6541_s7 + $0x30] sm:$0xff] %v4615_v39  ;;  %v4589_v5 = vmul.f32 %v6097_v18, %v7816_v26  ;;  %6106 = vrcp.f32 %v4542_v38 }
 0x385   : > { %4634 = vst [vmem:[%s6541_s7 + $0x48] sm:$0xff] %v4618_v48  ;;  %6108 = vrcp.f32 %v4532_v34  ;;  %v4540_v46 = vadd.f32 1.0, %v6099_v17 }
 0x386   : > { %v6101_v6 = vpop.eup %6100  ;;  %v4623_v22 = vadd.f32 %v4607_v12, %v4589_v5 }
 0x387   : > { %v4579_v30 = vmul.f32 %v6101_v6, %v7823_v29  ;;  %6110 = vrcp.f32 %v4540_v46 }
 0x388   : > { %v6103_v43 = vpop.eup %6102  ;;  %4639 = vst [vmem:[%s6541_s7 + $0x70] sm:$0xff] %v4623_v22 }
 0x389   : > { %v4613_v26 = vadd.f32 %v4597_v24, %v4579_v30  ;;  %v4587_v63 = vmul.f32 %v6103_v43, %v7827_v55 }
 0x38b   : > { %4629 = vst [vmem:[%s6541_s7 + $0x20] sm:$0xff] %v4613_v26  ;;  %v4621_v41 = vadd.f32 %v4605_v50, %v4587_v63 }
 0x38d   : > { %v6105_v10 = vpop.eup %6104  ;;  %4637 = vst [vmem:[%s6541_s7 + $0x60] sm:$0xff] %v4621_v41 }
 0x38e   : > { %v4582_v29 = vmul.f32 %v6105_v10, %v7833_v28 }
 0x390   : > { %v4616_v14 = vadd.f32 %v4600_v35, %v4582_v29 }
 0x391   : > { %v6107_v44 = vpop.eup %6106 }
 0x392   : > { %v6109_v31 = vpop.eup %6108  ;;  %4632 = vst [vmem:[%s6541_s7 + $0x38] sm:$0xff] %v4616_v14  ;;  %v4590_v55 = vmul.f32 %v6107_v44, %v7841_v4 }
 0x393   : > { %v4580_v37 = vmul.f32 %v6109_v31, %v7844_v40 }
 0x394   : > { %v6111_v36 = vpop.eup %6110  ;;  %v4624_v28 = vadd.f32 %v4608_v58, %v4590_v55 }
 0x395   : > { %v4614_v0 = vadd.f32 %v4598_v42, %v4580_v37  ;;  %v4588_v62 = vmul.f32 %v6111_v36, %v7847_v49 }
 0x396   : > { %4640 = vst [vmem:[%s6541_s7 + $0x78] sm:$0xff] %v4624_v28 }
 0x397   : > { %4630 = vst [vmem:[%s6541_s7 + $0x28] sm:$0xff] %v4614_v0  ;;  %v4622_v4 = vadd.f32 %v4606_v56, %v4588_v62 }
 0x399   : > { %4638 = vst [vmem:[%s6541_s7 + $0x68] sm:$0xff] %v4622_v4 }
 0x39a   : > { %6205 = shalt.err (!%p6202_p1)
}
 0x39b   : > { %s6206_s5 = scalar_lea.hbm %s7908_s15, 2048  ;;  %s6210_s23 = scalar_lea.hbm %s8055_s4, 8192 }
 0x39c   : > { %p6207_p7 = scmp.ne.s32.totalorder %s7908_s15, %s6206_s5  ;;  %p6211_p0 = scmp.lt.s32.totalorder %s7908_s15, %s8055_s4 }
 0x39d   : > { %p6212_p8 = scmp.lt.s32.totalorder %s6210_s23, %s6206_s5 }
 0x39e   : > { %p6208_p9 = pnand %p6207_p7, %p8056_p10 }
 0x39f   : > { %p6213_p11 = por %p6212_p8, %p6211_p0 }
 0x3a0   : > { %p6209_p13 = pneg %p6208_p9 }
 0x3a2   : > { %p6214_p3 = pnand %p6213_p11, %p6209_p13 }
 0x3a4   : > { %6217 = shalt.err (!%p6214_p3)
}
 0x3a5   : > { %s6327_s16 = smov 128   ;;  %s6328_s30 = smov 8  }
 0x3a6   : > { %5696 = dma.vmem_to_hbm [thread:$0]  (%p8056_p10), %s7910_s12, 2048, %s7908_s15, %s7916_s21, %s6327_s16, %s6327_s16, %s6328_s30  }
 0x3a7 PF: > { %s8057_s22 = sld [smem:[#allocation13_spill]]  ;;  %p5718_p12 = scmp.ge.s32.totalorder %s6316_s11, 2 }
 0x3a8   : > { %s8058_s1 = sld [smem:[#allocation17_spill]] }
 0x3ad   : > { %s4673_s8 = sand.u32 1, %s8057_s22  }
 0x3ae   : > { %p8059_p2 = scmp.ne.s32.totalorder %s8058_s1, 0  ;;  %s4674_s24 = scalar_lea.sflag [#allocation5], %s4673_s8 }
 0x3b0   : > { %p5710_p4 = pnand %p5718_p12, %p8059_p2 }
 0x3b2   : > { %p5711_p6 = pneg %p5710_p4 }
 0x3b4   : > { %6271 = dma.done.wait (%p5711_p6), %s4674_s24, 2048  }
 0x3b5   : > { %6273 = vsyncadd (%p5711_p6), %s4674_s24, 4294965248  ;;  %s24_s11 = sadd.s32 1, %s6316_s11   ;;  %s8060_s30 = sld [smem:[#allocation15_spill]] }
 0x3b6   : > { %p21_p5 = scmp.ge.s32.totalorder %s24_s11, 6   ;;  %s8061_s19 = sld [smem:[#allocation18_spill]] }
 0x3b7   : > { %s8062_s24 = smov %s6280_s25  ;;  %s8063_s25 = smov %s6284_s26 }
 0x3b8   : > { %s8064_s26 = smov %s6511_s9  ;;  %s8065_s27 = smov %s6292_s28 }
 0x3b9   : > { %s8066_s28 = smov %s6296_s29  ;;  %s8067_s29 = smov %s6506_s17 }
 0x3ba   : > { %s8068_s8 = smov %s6312_s10  ;;  %s8070_s10 = smov %s8076_s18 }
 0x3bb   :  { %23 = sbr.rel (!%p21_p5) target bundleno = 16 (0x10), region = 119 }
 0x3bc   : > { %s8069_s9 = smov %s8061_s19 }
 0x3c0   :  { %4679 = vsyncpa [#allocation4], 1 }
 0x3c1   :  { %4681 = vsyncpa [#allocation4 + $0x1], 1 }
 0x3c2   :  { %4682 = vsyncpa [#allocation7], 1 }
 0x3c3   :  { %4683 = vsyncpa [#allocation5], 1 }
 0x3c4   :  { %4685 = vsyncpa [#allocation5 + $0x1], 1 }

</bundles_post_ra>
